<compile_context>
chip_gen: v7x
topology: tpu7x:2x2x1
jax: 0.10.0
libtpu: 0.0.40
codegen_flags: <defaults>
</compile_context>

<pallas_src>
import functools

import jax
import jax.numpy as jnp
import numpy as np
from jax import lax
from jax.experimental import pallas as pl
from jax.experimental.pallas import tpu as pltpu

_BN_EPS = 1e-5
_HALO = 8          # zero halo rows at the head of each batch block (>= pad)
_VMEM = pl.BlockSpec(memory_space=pltpu.MemorySpace.VMEM)


def _cdiv(a, b):
    return -(-a // b)


def _round_up(n, m):
    return _cdiv(n, m) * m


def _stage_geometry(L0, K):
    """Per-stage (L_in, L_out, L_out_pad, blk) for the halo'd scratch layout.

    Each batch occupies `blk = L_out_pad * pool` rows in the stage-input
    scratch, so one sublane-strided load (stride = pool) walks every batch's
    pooling phase at once, and all per-batch slices start on 8-row boundaries.
    `blk >= _HALO + L_in + pad` holds by construction.
    """
    pad = K // 2
    dims = []
    L_in = L0
    for pool in (2, 5, 5):
        L_out = L_in // pool
        L_out_pad = _round_up(L_out + _cdiv(_HALO + pad, pool), 8)
        dims.append((L_in, L_out, L_out_pad, L_out_pad * pool))
        L_in = L_out
    return dims


# ----------------------------- fused Pallas kernel ---------------------------


def fused_forward_kernel(
    x_ref,            # (B, L0, 1)   raw input, length on sublanes
    w1_ref, s1_ref,   # (K*1,  C1), (1, C1)   BN-folded conv1 weight / shift
    w2_ref, s2_ref,   # (K*C1, C2), (1, C2)
    w3_ref, s3_ref,   # (K*C2, C3), (1, C3)
    w4_ref, b4_ref,   # (L3*C3, 200), (1, 200)  fc4 (rows permuted to (l, c))
    w5_ref, b5_ref,   # (200, 200), (1, 200)
    w6_ref, b6_ref,   # (200, out), (1, out)
    o_ref,            # (B, out)
    h1_ref, h2_ref, h3_ref,   # stacked halo-padded stage inputs (2-D VMEM)
    p3_ref,                   # (B*L3_pad, C3) staging for the (l, c) flatten
    *, B, L0, K,
):
    pad = K // 2
    (_, L1, L1p, blk0), (_, L2, L2p, blk1), (_, L3, L3p, blk2) = \
        _stage_geometry(L0, K)

    # Hoisted parameter loads (ref loads are effectful and not CSE'd).
    w1, s1 = w1_ref[...], s1_ref[...]
    w2, s2 = w2_ref[...], s2_ref[...]
    w3, s3 = w3_ref[...], s3_ref[...]

    def fill_padded(h_ref, blk, L, src):
        # Write L activation rows per batch block (8-aligned start) and zero
        # only the halo / alignment rows in between (not the whole scratch).
        C = h_ref.shape[1]
        total = h_ref.shape[0]
        h_ref[0:_HALO, :] = jnp.zeros((_HALO, C), jnp.float32)
        for b in range(B):
            lo = b * blk + _HALO
            h_ref[lo:lo + L, :] = src(b)
            hi = total if b == B - 1 else (b + 1) * blk + _HALO
            h_ref[lo + L:hi, :] = jnp.zeros((hi - lo - L, C), jnp.float32)

    def conv_relu_pool(h_ref, pool, L_out_pad, W, s):
        # conv(+folded BN) + ReLU + maxpool(pool) for every batch at once.
        # Phase r covers output positions i*pool + r; each phase is K strided
        # im2col loads + one MXU matmul over all batches; the pool is a
        # running max on the matmul results (never leaves vregs).  Rows
        # i >= L_out of each batch block are alignment padding and discarded.
        M = B * L_out_pad
        acc = None
        for r in range(pool):
            im = jnp.concatenate(
                [h_ref[pl.ds(_HALO - pad + r + t, M, stride=pool), :]
                 for t in range(K)], axis=-1)               # (M, K*Cin)
            z = jnp.dot(im, W, preferred_element_type=jnp.float32)
            acc = z if acc is None else jnp.maximum(acc, z)
        return jnp.maximum(acc + s, 0.0)                     # (M, Cout)

    # ---- stage 1: pad raw input in VMEM, conv+BN+ReLU+maxpool(2) ------------
    fill_padded(h1_ref, blk0, L0, lambda b: x_ref[b])
    p1 = conv_relu_pool(h1_ref, 2, L1p, w1, s1)              # (B*L1p, C1)

    # ---- stage 2: conv+BN+ReLU+maxpool(5) -----------------------------------
    fill_padded(h2_ref, blk1, L1, lambda b: p1[b * L1p:b * L1p + L1, :])
    p2 = conv_relu_pool(h2_ref, 5, L2p, w2, s2)              # (B*L2p, C2)

    # ---- stage 3: conv+BN+ReLU+maxpool(5) -----------------------------------
    fill_padded(h3_ref, blk2, L2, lambda b: p2[b * L2p:b * L2p + L2, :])
    p3_ref[...] = conv_relu_pool(h3_ref, 5, L3p, w3, s3)     # (B*L3p, C3)

    # ---- flatten in (l, c) order: aligned strided reads + one lane concat ---
    flat = jnp.concatenate(
        [p3_ref[pl.ds(l, B, stride=L3p), :] for l in range(L3)],
        axis=-1)                                             # (B, L3*C3)

    # ---- MLP: fc4 -> ReLU -> fc5 -> ReLU -> fc6 (dropout == identity) -------
    h = jnp.maximum(
        jnp.dot(flat, w4_ref[...], preferred_element_type=jnp.float32)
        + b4_ref[...], 0.0)
    h = jnp.maximum(
        jnp.dot(h, w5_ref[...], preferred_element_type=jnp.float32)
        + b5_ref[...], 0.0)
    o_ref[...] = (
        jnp.dot(h, w6_ref[...], preferred_element_type=jnp.float32)
        + b6_ref[...])


# ------------------------------ wrappers -------------------------------------


def prepare_params(p, K, input_shape):
    """One-time parameter prep: fold BN into conv weights, permute fc4 rows."""
    assert K % 2 == 1, "padding=K//2 keeps length only for odd kernel_size"
    prep = {}

    def fold(i):
        w = p[f"conv{i}_w"]                       # (Cout, Cin, K) torch layout
        b = p[f"conv{i}_b"]
        g, bt, m, v = p[f"bn{i}_g"], p[f"bn{i}_b"], p[f"bn{i}_m"], p[f"bn{i}_v"]
        scale = g / jnp.sqrt(v + _BN_EPS)          # (Cout,)
        wk = jnp.transpose(w, (2, 1, 0)) * scale[None, None, :]   # (K, Cin, Cout)
        Kk, Cin, Cout = wk.shape
        prep[f"w{i}"] = wk.reshape(Kk * Cin, Cout).astype(jnp.float32)
        prep[f"s{i}"] = ((b - m) * scale + bt).reshape(1, Cout).astype(jnp.float32)

    fold(1), fold(2), fold(3)

    C3 = p["conv3_w"].shape[0]
    L1 = input_shape // 2
    L2 = L1 // 5
    L3 = L2 // 5
    assert input_shape % 2 == 0 and L1 % 5 == 0 and L2 % 5 == 0, \
        "pooling must be exact so the torch flatten size formula matches"

    # torch flattens channel-major (c*L3 + l); the kernel flattens (l*C3 + c).
    w4 = p["fc4_w"]                                # (C3*L3, 200)
    assert w4.shape[0] == C3 * L3
    prep["w4"] = w4.reshape(C3, L3, -1).transpose(1, 0, 2).reshape(L3 * C3, -1)
    prep["b4"] = p["fc4_b"].reshape(1, -1)
    prep["w5"] = p["fc5_w"]
    prep["b5"] = p["fc5_b"].reshape(1, -1)
    prep["w6"] = p["fc6_w"]
    prep["b6"] = p["fc6_b"].reshape(1, -1)
    return prep


def pallas_forward(x, prep, K):
    """x: (B, input_shape) float32 -> (B, out_shape) logits (single pallas_call)."""
    B, L0 = x.shape
    pad = K // 2
    assert K % 2 == 1 and pad <= _HALO, "odd kernel_size with K//2 <= 8 required"
    C1 = prep["w1"].shape[1]
    C2 = prep["w2"].shape[1]
    C3 = prep["w3"].shape[1]
    n_out = prep["w6"].shape[1]
    (_, L1, L1p, blk0), (_, L2, L2p, blk1), (_, L3, L3p, blk2) = \
        _stage_geometry(L0, K)
    assert L0 == 2 * L1 and L1 == 5 * L2 and L2 == 5 * L3, \
        "pooling must divide exactly (matches the torch flatten size formula)"

    kern = functools.partial(fused_forward_kernel, B=B, L0=L0, K=K)
    return pl.pallas_call(
        kern,
        out_shape=jax.ShapeDtypeStruct((B, n_out), jnp.float32),
        in_specs=[_VMEM] * 13,
        out_specs=_VMEM,
        scratch_shapes=[
            pltpu.VMEM((B * blk0 + 2 * _HALO, 1), jnp.float32),    # h1 (padded)
            pltpu.VMEM((B * blk1 + 2 * _HALO, C1), jnp.float32),   # h2 (padded)
            pltpu.VMEM((B * blk2 + 2 * _HALO, C2), jnp.float32),   # h3 (padded)
            pltpu.VMEM((B * L3p, C3), jnp.float32),                # p3 staging
        ],
    )(x[:, :, None],   # trailing unit channel dim only (metadata reshape)
      prep["w1"], prep["s1"], prep["w2"], prep["s2"], prep["w3"], prep["s3"],
      prep["w4"], prep["b4"], prep["w5"], prep["b5"], prep["w6"], prep["b6"])


# --------------------------- pure-JAX reference -------------------------------


def reference_forward(x, p, K):
    h = x[:, None, :]  # (B, 1, L)  NCW, like torch
    for i, pool in ((1, 2), (2, 5), (3, 5)):
        w = p[f"conv{i}_w"]  # (Cout, Cin, K) torch layout
        b = p[f"conv{i}_b"]
        h = lax.conv_general_dilated(
            h, w, window_strides=(1,), padding=[(K // 2, K // 2)],
            dimension_numbers=("NCH", "OIH", "NCH"))
        h = h + b[None, :, None]
        g, bt, m, v = (p[f"bn{i}_g"], p[f"bn{i}_b"], p[f"bn{i}_m"], p[f"bn{i}_v"])
        h = (h - m[None, :, None]) / jnp.sqrt(v[None, :, None] + _BN_EPS)
        h = h * g[None, :, None] + bt[None, :, None]
        h = jnp.maximum(h, 0.0)
        B, C, L = h.shape
        Lo = L // pool
        h = jnp.max(h[:, :, : Lo * pool].reshape(B, C, Lo, pool), axis=-1)
    B = h.shape[0]
    h = h.reshape(B, -1)
    h = jnp.maximum(h @ p["fc4_w"] + p["fc4_b"], 0.0)
    h = jnp.maximum(h @ p["fc5_w"] + p["fc5_b"], 0.0)
    return h @ p["fc6_w"] + p["fc6_b"]


# ------------------------------- params ---------------------------------------


def init_params(key, input_shape, out_shape, K, C1=8):
    C2, C3 = 2 * C1, 4 * C1
    size = int(input_shape * C1 / 2)
    size = int(size * 2 / 5)
    size = int(size * 2 / 5)  # fc4 input features (matches the torch module)

    keys = iter(jax.random.split(key, 32))
    p = {}

    def conv(cout, cin):
        return jax.random.normal(next(keys), (cout, cin, K), jnp.float32) * 0.2

    def bn(c):
        g = jax.random.uniform(next(keys), (c,), jnp.float32, 0.5, 1.5)
        b = jax.random.normal(next(keys), (c,), jnp.float32) * 0.1
        m = jax.random.normal(next(keys), (c,), jnp.float32) * 0.1
        v = jax.random.uniform(next(keys), (c,), jnp.float32, 0.5, 1.5)
        return g, b, m, v

    p["conv1_w"] = conv(C1, 1)
    p["conv1_b"] = jax.random.normal(next(keys), (C1,), jnp.float32) * 0.05
    p["bn1_g"], p["bn1_b"], p["bn1_m"], p["bn1_v"] = bn(C1)
    p["conv2_w"] = conv(C2, C1)
    p["conv2_b"] = jax.random.normal(next(keys), (C2,), jnp.float32) * 0.05
    p["bn2_g"], p["bn2_b"], p["bn2_m"], p["bn2_v"] = bn(C2)
    p["conv3_w"] = conv(C3, C2)
    p["conv3_b"] = jax.random.normal(next(keys), (C3,), jnp.float32) * 0.05
    p["bn3_g"], p["bn3_b"], p["bn3_m"], p["bn3_v"] = bn(C3)

    def linear(fan_in, fan_out):
        w = jax.random.normal(next(keys), (fan_in, fan_out), jnp.float32)
        w = w / jnp.sqrt(float(fan_in))
        b = jax.random.normal(next(keys), (fan_out,), jnp.float32) * 0.05
        return w, b

    p["fc4_w"], p["fc4_b"] = linear(size, 200)
    p["fc5_w"], p["fc5_b"] = linear(200, 200)
    p["fc6_w"], p["fc6_b"] = linear(200, out_shape)
    return p


# --------------------------------- main ----------------------------------------

if __name__ == "__main__":
    INPUT_SHAPE = 100   # divisible by 2*5*5 so pooling is exact, as in ASCAD use
    OUT_SHAPE = 10
    KERNEL_SIZE = 3
    BATCH = 4

    key = jax.random.PRNGKey(0)
    kx, kp = jax.random.split(key)
    x = jax.random.normal(kx, (BATCH, INPUT_SHAPE), jnp.float32)
    params = init_params(kp, INPUT_SHAPE, OUT_SHAPE, KERNEL_SIZE)
    prep = prepare_params(params, KERNEL_SIZE, INPUT_SHAPE)

    fwd = jax.jit(functools.partial(pallas_forward, K=KERNEL_SIZE))
    out = jax.block_until_ready(fwd(x, prep))
    ref = jax.block_until_ready(reference_forward(x, params, KERNEL_SIZE))

    assert out.shape == (BATCH, OUT_SHAPE), out.shape
    np.testing.assert_allclose(np.asarray(out), np.asarray(ref), rtol=2e-2, atol=2e-2)
    print("KERNEL_OK")
</pallas_src>

<mosaic_0001>
module attributes {stable_mosaic.version = 11 : i64} {
  func.func @fused_forward_kernel(%arg0: memref<4x100x1xf32, #tpu.memory_space<vmem>>, %arg1: memref<3x8xf32, #tpu.memory_space<vmem>>, %arg2: memref<1x8xf32, #tpu.memory_space<vmem>>, %arg3: memref<24x16xf32, #tpu.memory_space<vmem>>, %arg4: memref<1x16xf32, #tpu.memory_space<vmem>>, %arg5: memref<48x32xf32, #tpu.memory_space<vmem>>, %arg6: memref<1x32xf32, #tpu.memory_space<vmem>>, %arg7: memref<64x200xf32, #tpu.memory_space<vmem>>, %arg8: memref<1x200xf32, #tpu.memory_space<vmem>>, %arg9: memref<200x200xf32, #tpu.memory_space<vmem>>, %arg10: memref<1x200xf32, #tpu.memory_space<vmem>>, %arg11: memref<200x10xf32, #tpu.memory_space<vmem>>, %arg12: memref<1x10xf32, #tpu.memory_space<vmem>>, %arg13: memref<4x10xf32, #tpu.memory_space<vmem>>, %arg14: memref<464x1xf32, #tpu.memory_space<vmem>>, %arg15: memref<336x8xf32, #tpu.memory_space<vmem>>, %arg16: memref<176x16xf32, #tpu.memory_space<vmem>>, %arg17: memref<32x32xf32, #tpu.memory_space<vmem>>) attributes {dimension_semantics = [], scalar_prefetch = 0 : i64, scratch_operands = 4 : i64, tpu.core_type = #tpu.core_type<tc>} {
    %c0 = arith.constant 0 : index
    %c0_0 = arith.constant 0 : index
    %0 = vector.load %arg1[%c0, %c0_0] : memref<3x8xf32, #tpu.memory_space<vmem>>, vector<3x8xf32>
    %c0_1 = arith.constant 0 : index
    %c0_2 = arith.constant 0 : index
    %1 = vector.load %arg2[%c0_1, %c0_2] : memref<1x8xf32, #tpu.memory_space<vmem>>, vector<1x8xf32>
    %c0_3 = arith.constant 0 : index
    %c0_4 = arith.constant 0 : index
    %2 = vector.load %arg3[%c0_3, %c0_4] : memref<24x16xf32, #tpu.memory_space<vmem>>, vector<24x16xf32>
    %c0_5 = arith.constant 0 : index
    %c0_6 = arith.constant 0 : index
    %3 = vector.load %arg4[%c0_5, %c0_6] : memref<1x16xf32, #tpu.memory_space<vmem>>, vector<1x16xf32>
    %c0_7 = arith.constant 0 : index
    %c0_8 = arith.constant 0 : index
    %4 = vector.load %arg5[%c0_7, %c0_8] : memref<48x32xf32, #tpu.memory_space<vmem>>, vector<48x32xf32>
    %c0_9 = arith.constant 0 : index
    %c0_10 = arith.constant 0 : index
    %5 = vector.load %arg6[%c0_9, %c0_10] : memref<1x32xf32, #tpu.memory_space<vmem>>, vector<1x32xf32>
    %cst = arith.constant 0.000000e+00 : f32
    %6 = vector.broadcast %cst : f32 to vector<8x1xf32>
    %c0_11 = arith.constant 0 : index
    %c0_12 = arith.constant 0 : index
    %7 = vector.load %arg14[%c0_11, %c0_12] : memref<464x1xf32, #tpu.memory_space<vmem>>, vector<8x1xf32>
    tpu.vector_store %arg14[%c0_11, %c0_12], %6 {strides = array<i32>} : memref<464x1xf32, #tpu.memory_space<vmem>>, vector<8x1xf32>,
    %c0_13 = arith.constant 0 : index
    %c0_14 = arith.constant 0 : index
    %c0_15 = arith.constant 0 : index
    %8 = vector.load %arg0[%c0_13, %c0_14, %c0_15] : memref<4x100x1xf32, #tpu.memory_space<vmem>>, vector<1x100x1xf32>
    %9 = vector.shape_cast %8 : vector<1x100x1xf32> to vector<100x1xf32>
    %c8 = arith.constant 8 : index
    %c0_16 = arith.constant 0 : index
    %10 = vector.load %arg14[%c8, %c0_16] : memref<464x1xf32, #tpu.memory_space<vmem>>, vector<100x1xf32>
    tpu.vector_store %arg14[%c8, %c0_16], %9 {strides = array<i32>} : memref<464x1xf32, #tpu.memory_space<vmem>>, vector<100x1xf32>,
    %cst_17 = arith.constant 0.000000e+00 : f32
    %11 = vector.broadcast %cst_17 : f32 to vector<12x1xf32>
    %c108 = arith.constant 108 : index
    %c0_18 = arith.constant 0 : index
    %12 = vector.load %arg14[%c108, %c0_18] : memref<464x1xf32, #tpu.memory_space<vmem>>, vector<12x1xf32>
    tpu.vector_store %arg14[%c108, %c0_18], %11 {strides = array<i32>} : memref<464x1xf32, #tpu.memory_space<vmem>>, vector<12x1xf32>,
    %c1 = arith.constant 1 : index
    %c0_19 = arith.constant 0 : index
    %c0_20 = arith.constant 0 : index
    %13 = vector.load %arg0[%c1, %c0_19, %c0_20] : memref<4x100x1xf32, #tpu.memory_space<vmem>>, vector<1x100x1xf32>
    %14 = vector.shape_cast %13 : vector<1x100x1xf32> to vector<100x1xf32>
    %c120 = arith.constant 120 : index
    %c0_21 = arith.constant 0 : index
    %15 = vector.load %arg14[%c120, %c0_21] : memref<464x1xf32, #tpu.memory_space<vmem>>, vector<100x1xf32>
    tpu.vector_store %arg14[%c120, %c0_21], %14 {strides = array<i32>} : memref<464x1xf32, #tpu.memory_space<vmem>>, vector<100x1xf32>,
    %cst_22 = arith.constant 0.000000e+00 : f32
    %16 = vector.broadcast %cst_22 : f32 to vector<12x1xf32>
    %c220 = arith.constant 220 : index
    %c0_23 = arith.constant 0 : index
    %17 = vector.load %arg14[%c220, %c0_23] : memref<464x1xf32, #tpu.memory_space<vmem>>, vector<12x1xf32>
    tpu.vector_store %arg14[%c220, %c0_23], %16 {strides = array<i32>} : memref<464x1xf32, #tpu.memory_space<vmem>>, vector<12x1xf32>,
    %c2 = arith.constant 2 : index
    %c0_24 = arith.constant 0 : index
    %c0_25 = arith.constant 0 : index
    %18 = vector.load %arg0[%c2, %c0_24, %c0_25] : memref<4x100x1xf32, #tpu.memory_space<vmem>>, vector<1x100x1xf32>
    %19 = vector.shape_cast %18 : vector<1x100x1xf32> to vector<100x1xf32>
    %c232 = arith.constant 232 : index
    %c0_26 = arith.constant 0 : index
    %20 = vector.load %arg14[%c232, %c0_26] : memref<464x1xf32, #tpu.memory_space<vmem>>, vector<100x1xf32>
    tpu.vector_store %arg14[%c232, %c0_26], %19 {strides = array<i32>} : memref<464x1xf32, #tpu.memory_space<vmem>>, vector<100x1xf32>,
    %cst_27 = arith.constant 0.000000e+00 : f32
    %21 = vector.broadcast %cst_27 : f32 to vector<12x1xf32>
    %c332 = arith.constant 332 : index
    %c0_28 = arith.constant 0 : index
    %22 = vector.load %arg14[%c332, %c0_28] : memref<464x1xf32, #tpu.memory_space<vmem>>, vector<12x1xf32>
    tpu.vector_store %arg14[%c332, %c0_28], %21 {strides = array<i32>} : memref<464x1xf32, #tpu.memory_space<vmem>>, vector<12x1xf32>,
    %c3 = arith.constant 3 : index
    %c0_29 = arith.constant 0 : index
    %c0_30 = arith.constant 0 : index
    %23 = vector.load %arg0[%c3, %c0_29, %c0_30] : memref<4x100x1xf32, #tpu.memory_space<vmem>>, vector<1x100x1xf32>
    %24 = vector.shape_cast %23 : vector<1x100x1xf32> to vector<100x1xf32>
    %c344 = arith.constant 344 : index
    %c0_31 = arith.constant 0 : index
    %25 = vector.load %arg14[%c344, %c0_31] : memref<464x1xf32, #tpu.memory_space<vmem>>, vector<100x1xf32>
    tpu.vector_store %arg14[%c344, %c0_31], %24 {strides = array<i32>} : memref<464x1xf32, #tpu.memory_space<vmem>>, vector<100x1xf32>,
    %cst_32 = arith.constant 0.000000e+00 : f32
    %26 = vector.broadcast %cst_32 : f32 to vector<20x1xf32>
    %c444 = arith.constant 444 : index
    %c0_33 = arith.constant 0 : index
    %27 = vector.load %arg14[%c444, %c0_33] : memref<464x1xf32, #tpu.memory_space<vmem>>, vector<20x1xf32>
    tpu.vector_store %arg14[%c444, %c0_33], %26 {strides = array<i32>} : memref<464x1xf32, #tpu.memory_space<vmem>>, vector<20x1xf32>,
    %c7 = arith.constant 7 : index
    %c0_34 = arith.constant 0 : index
    %28 = tpu.strided_load %arg14[%c7, %c0_34] {strides = array<i32: 2, 1>} : memref<464x1xf32, #tpu.memory_space<vmem>>, vector<224x1xf32>
    %c8_35 = arith.constant 8 : index
    %c0_36 = arith.constant 0 : index
    %29 = tpu.strided_load %arg14[%c8_35, %c0_36] {strides = array<i32: 2, 1>} : memref<464x1xf32, #tpu.memory_space<vmem>>, vector<224x1xf32>
    %c9 = arith.constant 9 : index
    %c0_37 = arith.constant 0 : index
    %30 = tpu.strided_load %arg14[%c9, %c0_37] {strides = array<i32: 2, 1>} : memref<464x1xf32, #tpu.memory_space<vmem>>, vector<224x1xf32>
    %31 = tpu.concatenate %28, %29, %30 in 1 : vector<224x1xf32>, vector<224x1xf32>, vector<224x1xf32> -> vector<224x3xf32>
    %cst_38 = arith.constant dense<0.000000e+00> : vector<224x8xf32>
    %32 = tpu.matmul %31, %0, %cst_38 {dimension_numbers = #tpu.dot_dimension_numbers<[1], [0], [0], [1], [0, 0, 1, 1], [], []>} : vector<224x3xf32>, vector<3x8xf32>, vector<224x8xf32> -> vector<224x8xf32>
    %c8_39 = arith.constant 8 : index
    %c0_40 = arith.constant 0 : index
    %33 = tpu.strided_load %arg14[%c8_39, %c0_40] {strides = array<i32: 2, 1>} : memref<464x1xf32, #tpu.memory_space<vmem>>, vector<224x1xf32>
    %c9_41 = arith.constant 9 : index
    %c0_42 = arith.constant 0 : index
    %34 = tpu.strided_load %arg14[%c9_41, %c0_42] {strides = array<i32: 2, 1>} : memref<464x1xf32, #tpu.memory_space<vmem>>, vector<224x1xf32>
    %c10 = arith.constant 10 : index
    %c0_43 = arith.constant 0 : index
    %35 = tpu.strided_load %arg14[%c10, %c0_43] {strides = array<i32: 2, 1>} : memref<464x1xf32, #tpu.memory_space<vmem>>, vector<224x1xf32>
    %36 = tpu.concatenate %33, %34, %35 in 1 : vector<224x1xf32>, vector<224x1xf32>, vector<224x1xf32> -> vector<224x3xf32>
    %cst_44 = arith.constant dense<0.000000e+00> : vector<224x8xf32>
    %37 = tpu.matmul %36, %0, %cst_44 {dimension_numbers = #tpu.dot_dimension_numbers<[1], [0], [0], [1], [0, 0, 1, 1], [], []>} : vector<224x3xf32>, vector<3x8xf32>, vector<224x8xf32> -> vector<224x8xf32>
    %38 = arith.maximumf %32, %37 : vector<224x8xf32>
    %39 = vector.broadcast %1 : vector<1x8xf32> to vector<224x8xf32>
    %40 = arith.addf %38, %39 : vector<224x8xf32>
    %cst_45 = arith.constant 0.000000e+00 : f32
    %41 = vector.broadcast %cst_45 : f32 to vector<224x8xf32>
    %42 = arith.maximumf %40, %41 : vector<224x8xf32>
    %cst_46 = arith.constant 0.000000e+00 : f32
    %43 = vector.broadcast %cst_46 : f32 to vector<8x8xf32>
    %c0_47 = arith.constant 0 : index
    %c0_48 = arith.constant 0 : index
    %44 = vector.load %arg15[%c0_47, %c0_48] : memref<336x8xf32, #tpu.memory_space<vmem>>, vector<8x8xf32>
    tpu.vector_store %arg15[%c0_47, %c0_48], %43 {strides = array<i32>} : memref<336x8xf32, #tpu.memory_space<vmem>>, vector<8x8xf32>,
    %45 = vector.extract_strided_slice %42 {offsets = [0, 0], sizes = [50, 8], strides = [1, 1]} : vector<224x8xf32> to vector<50x8xf32>
    %c8_49 = arith.constant 8 : index
    %c0_50 = arith.constant 0 : index
    %46 = vector.load %arg15[%c8_49, %c0_50] : memref<336x8xf32, #tpu.memory_space<vmem>>, vector<50x8xf32>
    tpu.vector_store %arg15[%c8_49, %c0_50], %45 {strides = array<i32>} : memref<336x8xf32, #tpu.memory_space<vmem>>, vector<50x8xf32>,
    %cst_51 = arith.constant 0.000000e+00 : f32
    %47 = vector.broadcast %cst_51 : f32 to vector<30x8xf32>
    %c58 = arith.constant 58 : index
    %c0_52 = arith.constant 0 : index
    %48 = vector.load %arg15[%c58, %c0_52] : memref<336x8xf32, #tpu.memory_space<vmem>>, vector<30x8xf32>
    tpu.vector_store %arg15[%c58, %c0_52], %47 {strides = array<i32>} : memref<336x8xf32, #tpu.memory_space<vmem>>, vector<30x8xf32>,
    %49 = vector.extract_strided_slice %42 {offsets = [56, 0], sizes = [50, 8], strides = [1, 1]} : vector<224x8xf32> to vector<50x8xf32>
    %c88 = arith.constant 88 : index
    %c0_53 = arith.constant 0 : index
    %50 = vector.load %arg15[%c88, %c0_53] : memref<336x8xf32, #tpu.memory_space<vmem>>, vector<50x8xf32>
    tpu.vector_store %arg15[%c88, %c0_53], %49 {strides = array<i32>} : memref<336x8xf32, #tpu.memory_space<vmem>>, vector<50x8xf32>,
    %cst_54 = arith.constant 0.000000e+00 : f32
    %51 = vector.broadcast %cst_54 : f32 to vector<30x8xf32>
    %c138 = arith.constant 138 : index
    %c0_55 = arith.constant 0 : index
    %52 = vector.load %arg15[%c138, %c0_55] : memref<336x8xf32, #tpu.memory_space<vmem>>, vector<30x8xf32>
    tpu.vector_store %arg15[%c138, %c0_55], %51 {strides = array<i32>} : memref<336x8xf32, #tpu.memory_space<vmem>>, vector<30x8xf32>,
    %53 = vector.extract_strided_slice %42 {offsets = [112, 0], sizes = [50, 8], strides = [1, 1]} : vector<224x8xf32> to vector<50x8xf32>
    %c168 = arith.constant 168 : index
    %c0_56 = arith.constant 0 : index
    %54 = vector.load %arg15[%c168, %c0_56] : memref<336x8xf32, #tpu.memory_space<vmem>>, vector<50x8xf32>
    tpu.vector_store %arg15[%c168, %c0_56], %53 {strides = array<i32>} : memref<336x8xf32, #tpu.memory_space<vmem>>, vector<50x8xf32>,
    %cst_57 = arith.constant 0.000000e+00 : f32
    %55 = vector.broadcast %cst_57 : f32 to vector<30x8xf32>
    %c218 = arith.constant 218 : index
    %c0_58 = arith.constant 0 : index
    %56 = vector.load %arg15[%c218, %c0_58] : memref<336x8xf32, #tpu.memory_space<vmem>>, vector<30x8xf32>
    tpu.vector_store %arg15[%c218, %c0_58], %55 {strides = array<i32>} : memref<336x8xf32, #tpu.memory_space<vmem>>, vector<30x8xf32>,
    %57 = vector.extract_strided_slice %42 {offsets = [168, 0], sizes = [50, 8], strides = [1, 1]} : vector<224x8xf32> to vector<50x8xf32>
    %c248 = arith.constant 248 : index
    %c0_59 = arith.constant 0 : index
    %58 = vector.load %arg15[%c248, %c0_59] : memref<336x8xf32, #tpu.memory_space<vmem>>, vector<50x8xf32>
    tpu.vector_store %arg15[%c248, %c0_59], %57 {strides = array<i32>} : memref<336x8xf32, #tpu.memory_space<vmem>>, vector<50x8xf32>,
    %cst_60 = arith.constant 0.000000e+00 : f32
    %59 = vector.broadcast %cst_60 : f32 to vector<38x8xf32>
    %c298 = arith.constant 298 : index
    %c0_61 = arith.constant 0 : index
    %60 = vector.load %arg15[%c298, %c0_61] : memref<336x8xf32, #tpu.memory_space<vmem>>, vector<38x8xf32>
    tpu.vector_store %arg15[%c298, %c0_61], %59 {strides = array<i32>} : memref<336x8xf32, #tpu.memory_space<vmem>>, vector<38x8xf32>,
    %c7_62 = arith.constant 7 : index
    %c0_63 = arith.constant 0 : index
    %61 = tpu.strided_load %arg15[%c7_62, %c0_63] {strides = array<i32: 5, 1>} : memref<336x8xf32, #tpu.memory_space<vmem>>, vector<64x8xf32>
    %c8_64 = arith.constant 8 : index
    %c0_65 = arith.constant 0 : index
    %62 = tpu.strided_load %arg15[%c8_64, %c0_65] {strides = array<i32: 5, 1>} : memref<336x8xf32, #tpu.memory_space<vmem>>, vector<64x8xf32>
    %c9_66 = arith.constant 9 : index
    %c0_67 = arith.constant 0 : index
    %63 = tpu.strided_load %arg15[%c9_66, %c0_67] {strides = array<i32: 5, 1>} : memref<336x8xf32, #tpu.memory_space<vmem>>, vector<64x8xf32>
    %64 = tpu.concatenate %61, %62, %63 in 1 : vector<64x8xf32>, vector<64x8xf32>, vector<64x8xf32> -> vector<64x24xf32>
    %cst_68 = arith.constant dense<0.000000e+00> : vector<64x16xf32>
    %65 = tpu.matmul %64, %2, %cst_68 {dimension_numbers = #tpu.dot_dimension_numbers<[1], [0], [0], [1], [0, 0, 1, 1], [], []>} : vector<64x24xf32>, vector<24x16xf32>, vector<64x16xf32> -> vector<64x16xf32>
    %c8_69 = arith.constant 8 : index
    %c0_70 = arith.constant 0 : index
    %66 = tpu.strided_load %arg15[%c8_69, %c0_70] {strides = array<i32: 5, 1>} : memref<336x8xf32, #tpu.memory_space<vmem>>, vector<64x8xf32>
    %c9_71 = arith.constant 9 : index
    %c0_72 = arith.constant 0 : index
    %67 = tpu.strided_load %arg15[%c9_71, %c0_72] {strides = array<i32: 5, 1>} : memref<336x8xf32, #tpu.memory_space<vmem>>, vector<64x8xf32>
    %c10_73 = arith.constant 10 : index
    %c0_74 = arith.constant 0 : index
    %68 = tpu.strided_load %arg15[%c10_73, %c0_74] {strides = array<i32: 5, 1>} : memref<336x8xf32, #tpu.memory_space<vmem>>, vector<64x8xf32>
    %69 = tpu.concatenate %66, %67, %68 in 1 : vector<64x8xf32>, vector<64x8xf32>, vector<64x8xf32> -> vector<64x24xf32>
    %cst_75 = arith.constant dense<0.000000e+00> : vector<64x16xf32>
    %70 = tpu.matmul %69, %2, %cst_75 {dimension_numbers = #tpu.dot_dimension_numbers<[1], [0], [0], [1], [0, 0, 1, 1], [], []>} : vector<64x24xf32>, vector<24x16xf32>, vector<64x16xf32> -> vector<64x16xf32>
    %71 = arith.maximumf %65, %70 : vector<64x16xf32>
    %c9_76 = arith.constant 9 : index
    %c0_77 = arith.constant 0 : index
    %72 = tpu.strided_load %arg15[%c9_76, %c0_77] {strides = array<i32: 5, 1>} : memref<336x8xf32, #tpu.memory_space<vmem>>, vector<64x8xf32>
    %c10_78 = arith.constant 10 : index
    %c0_79 = arith.constant 0 : index
    %73 = tpu.strided_load %arg15[%c10_78, %c0_79] {strides = array<i32: 5, 1>} : memref<336x8xf32, #tpu.memory_space<vmem>>, vector<64x8xf32>
    %c11 = arith.constant 11 : index
    %c0_80 = arith.constant 0 : index
    %74 = tpu.strided_load %arg15[%c11, %c0_80] {strides = array<i32: 5, 1>} : memref<336x8xf32, #tpu.memory_space<vmem>>, vector<64x8xf32>
    %75 = tpu.concatenate %72, %73, %74 in 1 : vector<64x8xf32>, vector<64x8xf32>, vector<64x8xf32> -> vector<64x24xf32>
    %cst_81 = arith.constant dense<0.000000e+00> : vector<64x16xf32>
    %76 = tpu.matmul %75, %2, %cst_81 {dimension_numbers = #tpu.dot_dimension_numbers<[1], [0], [0], [1], [0, 0, 1, 1], [], []>} : vector<64x24xf32>, vector<24x16xf32>, vector<64x16xf32> -> vector<64x16xf32>
    %77 = arith.maximumf %71, %76 : vector<64x16xf32>
    %c10_82 = arith.constant 10 : index
    %c0_83 = arith.constant 0 : index
    %78 = tpu.strided_load %arg15[%c10_82, %c0_83] {strides = array<i32: 5, 1>} : memref<336x8xf32, #tpu.memory_space<vmem>>, vector<64x8xf32>
    %c11_84 = arith.constant 11 : index
    %c0_85 = arith.constant 0 : index
    %79 = tpu.strided_load %arg15[%c11_84, %c0_85] {strides = array<i32: 5, 1>} : memref<336x8xf32, #tpu.memory_space<vmem>>, vector<64x8xf32>
    %c12 = arith.constant 12 : index
    %c0_86 = arith.constant 0 : index
    %80 = tpu.strided_load %arg15[%c12, %c0_86] {strides = array<i32: 5, 1>} : memref<336x8xf32, #tpu.memory_space<vmem>>, vector<64x8xf32>
    %81 = tpu.concatenate %78, %79, %80 in 1 : vector<64x8xf32>, vector<64x8xf32>, vector<64x8xf32> -> vector<64x24xf32>
    %cst_87 = arith.constant dense<0.000000e+00> : vector<64x16xf32>
    %82 = tpu.matmul %81, %2, %cst_87 {dimension_numbers = #tpu.dot_dimension_numbers<[1], [0], [0], [1], [0, 0, 1, 1], [], []>} : vector<64x24xf32>, vector<24x16xf32>, vector<64x16xf32> -> vector<64x16xf32>
    %83 = arith.maximumf %77, %82 : vector<64x16xf32>
    %c11_88 = arith.constant 11 : index
    %c0_89 = arith.constant 0 : index
    %84 = tpu.strided_load %arg15[%c11_88, %c0_89] {strides = array<i32: 5, 1>} : memref<336x8xf32, #tpu.memory_space<vmem>>, vector<64x8xf32>
    %c12_90 = arith.constant 12 : index
    %c0_91 = arith.constant 0 : index
    %85 = tpu.strided_load %arg15[%c12_90, %c0_91] {strides = array<i32: 5, 1>} : memref<336x8xf32, #tpu.memory_space<vmem>>, vector<64x8xf32>
    %c13 = arith.constant 13 : index
    %c0_92 = arith.constant 0 : index
    %86 = tpu.strided_load %arg15[%c13, %c0_92] {strides = array<i32: 5, 1>} : memref<336x8xf32, #tpu.memory_space<vmem>>, vector<64x8xf32>
    %87 = tpu.concatenate %84, %85, %86 in 1 : vector<64x8xf32>, vector<64x8xf32>, vector<64x8xf32> -> vector<64x24xf32>
    %cst_93 = arith.constant dense<0.000000e+00> : vector<64x16xf32>
    %88 = tpu.matmul %87, %2, %cst_93 {dimension_numbers = #tpu.dot_dimension_numbers<[1], [0], [0], [1], [0, 0, 1, 1], [], []>} : vector<64x24xf32>, vector<24x16xf32>, vector<64x16xf32> -> vector<64x16xf32>
    %89 = arith.maximumf %83, %88 : vector<64x16xf32>
    %90 = vector.broadcast %3 : vector<1x16xf32> to vector<64x16xf32>
    %91 = arith.addf %89, %90 : vector<64x16xf32>
    %cst_94 = arith.constant 0.000000e+00 : f32
    %92 = vector.broadcast %cst_94 : f32 to vector<64x16xf32>
    %93 = arith.maximumf %91, %92 : vector<64x16xf32>
    %cst_95 = arith.constant 0.000000e+00 : f32
    %94 = vector.broadcast %cst_95 : f32 to vector<8x16xf32>
    %c0_96 = arith.constant 0 : index
    %c0_97 = arith.constant 0 : index
    %95 = vector.load %arg16[%c0_96, %c0_97] : memref<176x16xf32, #tpu.memory_space<vmem>>, vector<8x16xf32>
    tpu.vector_store %arg16[%c0_96, %c0_97], %94 {strides = array<i32>} : memref<176x16xf32, #tpu.memory_space<vmem>>, vector<8x16xf32>,
    %96 = vector.extract_strided_slice %93 {offsets = [0, 0], sizes = [10, 16], strides = [1, 1]} : vector<64x16xf32> to vector<10x16xf32>
    %c8_98 = arith.constant 8 : index
    %c0_99 = arith.constant 0 : index
    %97 = vector.load %arg16[%c8_98, %c0_99] : memref<176x16xf32, #tpu.memory_space<vmem>>, vector<10x16xf32>
    tpu.vector_store %arg16[%c8_98, %c0_99], %96 {strides = array<i32>} : memref<176x16xf32, #tpu.memory_space<vmem>>, vector<10x16xf32>,
    %cst_100 = arith.constant 0.000000e+00 : f32
    %98 = vector.broadcast %cst_100 : f32 to vector<30x16xf32>
    %c18 = arith.constant 18 : index
    %c0_101 = arith.constant 0 : index
    %99 = vector.load %arg16[%c18, %c0_101] : memref<176x16xf32, #tpu.memory_space<vmem>>, vector<30x16xf32>
    tpu.vector_store %arg16[%c18, %c0_101], %98 {strides = array<i32>} : memref<176x16xf32, #tpu.memory_space<vmem>>, vector<30x16xf32>,
    %100 = vector.extract_strided_slice %93 {offsets = [16, 0], sizes = [10, 16], strides = [1, 1]} : vector<64x16xf32> to vector<10x16xf32>
    %c48 = arith.constant 48 : index
    %c0_102 = arith.constant 0 : index
    %101 = vector.load %arg16[%c48, %c0_102] : memref<176x16xf32, #tpu.memory_space<vmem>>, vector<10x16xf32>
    tpu.vector_store %arg16[%c48, %c0_102], %100 {strides = array<i32>} : memref<176x16xf32, #tpu.memory_space<vmem>>, vector<10x16xf32>,
    %cst_103 = arith.constant 0.000000e+00 : f32
    %102 = vector.broadcast %cst_103 : f32 to vector<30x16xf32>
    %c58_104 = arith.constant 58 : index
    %c0_105 = arith.constant 0 : index
    %103 = vector.load %arg16[%c58_104, %c0_105] : memref<176x16xf32, #tpu.memory_space<vmem>>, vector<30x16xf32>
    tpu.vector_store %arg16[%c58_104, %c0_105], %102 {strides = array<i32>} : memref<176x16xf32, #tpu.memory_space<vmem>>, vector<30x16xf32>,
    %104 = vector.extract_strided_slice %93 {offsets = [32, 0], sizes = [10, 16], strides = [1, 1]} : vector<64x16xf32> to vector<10x16xf32>
    %c88_106 = arith.constant 88 : index
    %c0_107 = arith.constant 0 : index
    %105 = vector.load %arg16[%c88_106, %c0_107] : memref<176x16xf32, #tpu.memory_space<vmem>>, vector<10x16xf32>
    tpu.vector_store %arg16[%c88_106, %c0_107], %104 {strides = array<i32>} : memref<176x16xf32, #tpu.memory_space<vmem>>, vector<10x16xf32>,
    %cst_108 = arith.constant 0.000000e+00 : f32
    %106 = vector.broadcast %cst_108 : f32 to vector<30x16xf32>
    %c98 = arith.constant 98 : index
    %c0_109 = arith.constant 0 : index
    %107 = vector.load %arg16[%c98, %c0_109] : memref<176x16xf32, #tpu.memory_space<vmem>>, vector<30x16xf32>
    tpu.vector_store %arg16[%c98, %c0_109], %106 {strides = array<i32>} : memref<176x16xf32, #tpu.memory_space<vmem>>, vector<30x16xf32>,
    %108 = vector.extract_strided_slice %93 {offsets = [48, 0], sizes = [10, 16], strides = [1, 1]} : vector<64x16xf32> to vector<10x16xf32>
    %c128 = arith.constant 128 : index
    %c0_110 = arith.constant 0 : index
    %109 = vector.load %arg16[%c128, %c0_110] : memref<176x16xf32, #tpu.memory_space<vmem>>, vector<10x16xf32>
    tpu.vector_store %arg16[%c128, %c0_110], %108 {strides = array<i32>} : memref<176x16xf32, #tpu.memory_space<vmem>>, vector<10x16xf32>,
    %cst_111 = arith.constant 0.000000e+00 : f32
    %110 = vector.broadcast %cst_111 : f32 to vector<38x16xf32>
    %c138_112 = arith.constant 138 : index
    %c0_113 = arith.constant 0 : index
    %111 = vector.load %arg16[%c138_112, %c0_113] : memref<176x16xf32, #tpu.memory_space<vmem>>, vector<38x16xf32>
    tpu.vector_store %arg16[%c138_112, %c0_113], %110 {strides = array<i32>} : memref<176x16xf32, #tpu.memory_space<vmem>>, vector<38x16xf32>,
    %c7_114 = arith.constant 7 : index
    %c0_115 = arith.constant 0 : index
    %112 = tpu.strided_load %arg16[%c7_114, %c0_115] {strides = array<i32: 5, 1>} : memref<176x16xf32, #tpu.memory_space<vmem>>, vector<32x16xf32>
    %c8_116 = arith.constant 8 : index
    %c0_117 = arith.constant 0 : index
    %113 = tpu.strided_load %arg16[%c8_116, %c0_117] {strides = array<i32: 5, 1>} : memref<176x16xf32, #tpu.memory_space<vmem>>, vector<32x16xf32>
    %c9_118 = arith.constant 9 : index
    %c0_119 = arith.constant 0 : index
    %114 = tpu.strided_load %arg16[%c9_118, %c0_119] {strides = array<i32: 5, 1>} : memref<176x16xf32, #tpu.memory_space<vmem>>, vector<32x16xf32>
    %115 = tpu.concatenate %112, %113, %114 in 1 : vector<32x16xf32>, vector<32x16xf32>, vector<32x16xf32> -> vector<32x48xf32>
    %cst_120 = arith.constant dense<0.000000e+00> : vector<32x32xf32>
    %116 = tpu.matmul %115, %4, %cst_120 {dimension_numbers = #tpu.dot_dimension_numbers<[1], [0], [0], [1], [0, 0, 1, 1], [], []>} : vector<32x48xf32>, vector<48x32xf32>, vector<32x32xf32> -> vector<32x32xf32>
    %c8_121 = arith.constant 8 : index
    %c0_122 = arith.constant 0 : index
    %117 = tpu.strided_load %arg16[%c8_121, %c0_122] {strides = array<i32: 5, 1>} : memref<176x16xf32, #tpu.memory_space<vmem>>, vector<32x16xf32>
    %c9_123 = arith.constant 9 : index
    %c0_124 = arith.constant 0 : index
    %118 = tpu.strided_load %arg16[%c9_123, %c0_124] {strides = array<i32: 5, 1>} : memref<176x16xf32, #tpu.memory_space<vmem>>, vector<32x16xf32>
    %c10_125 = arith.constant 10 : index
    %c0_126 = arith.constant 0 : index
    %119 = tpu.strided_load %arg16[%c10_125, %c0_126] {strides = array<i32: 5, 1>} : memref<176x16xf32, #tpu.memory_space<vmem>>, vector<32x16xf32>
    %120 = tpu.concatenate %117, %118, %119 in 1 : vector<32x16xf32>, vector<32x16xf32>, vector<32x16xf32> -> vector<32x48xf32>
    %cst_127 = arith.constant dense<0.000000e+00> : vector<32x32xf32>
    %121 = tpu.matmul %120, %4, %cst_127 {dimension_numbers = #tpu.dot_dimension_numbers<[1], [0], [0], [1], [0, 0, 1, 1], [], []>} : vector<32x48xf32>, vector<48x32xf32>, vector<32x32xf32> -> vector<32x32xf32>
    %122 = arith.maximumf %116, %121 : vector<32x32xf32>
    %c9_128 = arith.constant 9 : index
    %c0_129 = arith.constant 0 : index
    %123 = tpu.strided_load %arg16[%c9_128, %c0_129] {strides = array<i32: 5, 1>} : memref<176x16xf32, #tpu.memory_space<vmem>>, vector<32x16xf32>
    %c10_130 = arith.constant 10 : index
    %c0_131 = arith.constant 0 : index
    %124 = tpu.strided_load %arg16[%c10_130, %c0_131] {strides = array<i32: 5, 1>} : memref<176x16xf32, #tpu.memory_space<vmem>>, vector<32x16xf32>
    %c11_132 = arith.constant 11 : index
    %c0_133 = arith.constant 0 : index
    %125 = tpu.strided_load %arg16[%c11_132, %c0_133] {strides = array<i32: 5, 1>} : memref<176x16xf32, #tpu.memory_space<vmem>>, vector<32x16xf32>
    %126 = tpu.concatenate %123, %124, %125 in 1 : vector<32x16xf32>, vector<32x16xf32>, vector<32x16xf32> -> vector<32x48xf32>
    %cst_134 = arith.constant dense<0.000000e+00> : vector<32x32xf32>
    %127 = tpu.matmul %126, %4, %cst_134 {dimension_numbers = #tpu.dot_dimension_numbers<[1], [0], [0], [1], [0, 0, 1, 1], [], []>} : vector<32x48xf32>, vector<48x32xf32>, vector<32x32xf32> -> vector<32x32xf32>
    %128 = arith.maximumf %122, %127 : vector<32x32xf32>
    %c10_135 = arith.constant 10 : index
    %c0_136 = arith.constant 0 : index
    %129 = tpu.strided_load %arg16[%c10_135, %c0_136] {strides = array<i32: 5, 1>} : memref<176x16xf32, #tpu.memory_space<vmem>>, vector<32x16xf32>
    %c11_137 = arith.constant 11 : index
    %c0_138 = arith.constant 0 : index
    %130 = tpu.strided_load %arg16[%c11_137, %c0_138] {strides = array<i32: 5, 1>} : memref<176x16xf32, #tpu.memory_space<vmem>>, vector<32x16xf32>
    %c12_139 = arith.constant 12 : index
    %c0_140 = arith.constant 0 : index
    %131 = tpu.strided_load %arg16[%c12_139, %c0_140] {strides = array<i32: 5, 1>} : memref<176x16xf32, #tpu.memory_space<vmem>>, vector<32x16xf32>
    %132 = tpu.concatenate %129, %130, %131 in 1 : vector<32x16xf32>, vector<32x16xf32>, vector<32x16xf32> -> vector<32x48xf32>
    %cst_141 = arith.constant dense<0.000000e+00> : vector<32x32xf32>
    %133 = tpu.matmul %132, %4, %cst_141 {dimension_numbers = #tpu.dot_dimension_numbers<[1], [0], [0], [1], [0, 0, 1, 1], [], []>} : vector<32x48xf32>, vector<48x32xf32>, vector<32x32xf32> -> vector<32x32xf32>
    %134 = arith.maximumf %128, %133 : vector<32x32xf32>
    %c11_142 = arith.constant 11 : index
    %c0_143 = arith.constant 0 : index
    %135 = tpu.strided_load %arg16[%c11_142, %c0_143] {strides = array<i32: 5, 1>} : memref<176x16xf32, #tpu.memory_space<vmem>>, vector<32x16xf32>
    %c12_144 = arith.constant 12 : index
    %c0_145 = arith.constant 0 : index
    %136 = tpu.strided_load %arg16[%c12_144, %c0_145] {strides = array<i32: 5, 1>} : memref<176x16xf32, #tpu.memory_space<vmem>>, vector<32x16xf32>
    %c13_146 = arith.constant 13 : index
    %c0_147 = arith.constant 0 : index
    %137 = tpu.strided_load %arg16[%c13_146, %c0_147] {strides = array<i32: 5, 1>} : memref<176x16xf32, #tpu.memory_space<vmem>>, vector<32x16xf32>
    %138 = tpu.concatenate %135, %136, %137 in 1 : vector<32x16xf32>, vector<32x16xf32>, vector<32x16xf32> -> vector<32x48xf32>
    %cst_148 = arith.constant dense<0.000000e+00> : vector<32x32xf32>
    %139 = tpu.matmul %138, %4, %cst_148 {dimension_numbers = #tpu.dot_dimension_numbers<[1], [0], [0], [1], [0, 0, 1, 1], [], []>} : vector<32x48xf32>, vector<48x32xf32>, vector<32x32xf32> -> vector<32x32xf32>
    %140 = arith.maximumf %134, %139 : vector<32x32xf32>
    %141 = vector.broadcast %5 : vector<1x32xf32> to vector<32x32xf32>
    %142 = arith.addf %140, %141 : vector<32x32xf32>
    %cst_149 = arith.constant 0.000000e+00 : f32
    %143 = vector.broadcast %cst_149 : f32 to vector<32x32xf32>
    %144 = arith.maximumf %142, %143 : vector<32x32xf32>
    %c0_150 = arith.constant 0 : index
    %c0_151 = arith.constant 0 : index
    %145 = vector.load %arg17[%c0_150, %c0_151] : memref<32x32xf32, #tpu.memory_space<vmem>>, vector<32x32xf32>
    tpu.vector_store %arg17[%c0_150, %c0_151], %144 {strides = array<i32>} : memref<32x32xf32, #tpu.memory_space<vmem>>, vector<32x32xf32>,
    %c0_152 = arith.constant 0 : index
    %c0_153 = arith.constant 0 : index
    %146 = tpu.strided_load %arg17[%c0_152, %c0_153] {strides = array<i32: 8, 1>} : memref<32x32xf32, #tpu.memory_space<vmem>>, vector<4x32xf32>
    %c1_154 = arith.constant 1 : index
    %c0_155 = arith.constant 0 : index
    %147 = tpu.strided_load %arg17[%c1_154, %c0_155] {strides = array<i32: 8, 1>} : memref<32x32xf32, #tpu.memory_space<vmem>>, vector<4x32xf32>
    %148 = tpu.concatenate %146, %147 in 1 : vector<4x32xf32>, vector<4x32xf32> -> vector<4x64xf32>
    %c0_156 = arith.constant 0 : index
    %c0_157 = arith.constant 0 : index
    %149 = vector.load %arg7[%c0_156, %c0_157] : memref<64x200xf32, #tpu.memory_space<vmem>>, vector<64x200xf32>
    %cst_158 = arith.constant dense<0.000000e+00> : vector<4x200xf32>
    %150 = tpu.matmul %148, %149, %cst_158 {dimension_numbers = #tpu.dot_dimension_numbers<[1], [0], [0], [1], [0, 0, 1, 1], [], []>} : vector<4x64xf32>, vector<64x200xf32>, vector<4x200xf32> -> vector<4x200xf32>
    %c0_159 = arith.constant 0 : index
    %c0_160 = arith.constant 0 : index
    %151 = vector.load %arg8[%c0_159, %c0_160] : memref<1x200xf32, #tpu.memory_space<vmem>>, vector<1x200xf32>
    %152 = vector.broadcast %151 : vector<1x200xf32> to vector<4x200xf32>
    %153 = arith.addf %150, %152 : vector<4x200xf32>
    %cst_161 = arith.constant 0.000000e+00 : f32
    %154 = vector.broadcast %cst_161 : f32 to vector<4x200xf32>
    %155 = arith.maximumf %153, %154 : vector<4x200xf32>
    %c0_162 = arith.constant 0 : index
    %c0_163 = arith.constant 0 : index
    %156 = vector.load %arg9[%c0_162, %c0_163] : memref<200x200xf32, #tpu.memory_space<vmem>>, vector<200x200xf32>
    %cst_164 = arith.constant dense<0.000000e+00> : vector<4x200xf32>
    %157 = tpu.matmul %155, %156, %cst_164 {dimension_numbers = #tpu.dot_dimension_numbers<[1], [0], [0], [1], [0, 0, 1, 1], [], []>} : vector<4x200xf32>, vector<200x200xf32>, vector<4x200xf32> -> vector<4x200xf32>
    %c0_165 = arith.constant 0 : index
    %c0_166 = arith.constant 0 : index
    %158 = vector.load %arg10[%c0_165, %c0_166] : memref<1x200xf32, #tpu.memory_space<vmem>>, vector<1x200xf32>
    %159 = vector.broadcast %158 : vector<1x200xf32> to vector<4x200xf32>
    %160 = arith.addf %157, %159 : vector<4x200xf32>
    %cst_167 = arith.constant 0.000000e+00 : f32
    %161 = vector.broadcast %cst_167 : f32 to vector<4x200xf32>
    %162 = arith.maximumf %160, %161 : vector<4x200xf32>
    %c0_168 = arith.constant 0 : index
    %c0_169 = arith.constant 0 : index
    %163 = vector.load %arg11[%c0_168, %c0_169] : memref<200x10xf32, #tpu.memory_space<vmem>>, vector<200x10xf32>
    %cst_170 = arith.constant dense<0.000000e+00> : vector<4x10xf32>
    %164 = tpu.matmul %162, %163, %cst_170 {dimension_numbers = #tpu.dot_dimension_numbers<[1], [0], [0], [1], [0, 0, 1, 1], [], []>} : vector<4x200xf32>, vector<200x10xf32>, vector<4x10xf32> -> vector<4x10xf32>
    %c0_171 = arith.constant 0 : index
    %c0_172 = arith.constant 0 : index
    %165 = vector.load %arg12[%c0_171, %c0_172] : memref<1x10xf32, #tpu.memory_space<vmem>>, vector<1x10xf32>
    %166 = vector.broadcast %165 : vector<1x10xf32> to vector<4x10xf32>
    %167 = arith.addf %164, %166 : vector<4x10xf32>
    %c0_173 = arith.constant 0 : index
    %c0_174 = arith.constant 0 : index
    %168 = vector.load %arg13[%c0_173, %c0_174] : memref<4x10xf32, #tpu.memory_space<vmem>>, vector<4x10xf32>
    tpu.vector_store %arg13[%c0_173, %c0_174], %167 {strides = array<i32>} : memref<4x10xf32, #tpu.memory_space<vmem>>, vector<4x10xf32>,
    return
  }
}

</mosaic_0001>

<bundles_post_ra>
// kernel: pallas_forward.1
= control target key start
LH: loop header
LB: loop body
LE: loop exit
PB: predicated region body
PF: predicated region fallthrough
CT: control target
= control target key end

     0   :  { %vm58_vm0 = vcmask 7168   ;;  %vm85_vm1 = vcmask 3072   ;;  %v6897_v9 = vmov 0.0   ;;  %s4811_s24 = smov 2   ;;  %s4812_s25 = smov 1   ;;  %vm711_vm2 = vcmask 1042432   ;;  %s6883_s0 = inlined_call_operand.vmem [shape: f32[4,100,1], index: 0, kind: input, shape index: {}]   ;;  %s6884_s1 = inlined_call_operand.vmem [shape: f32[3,8], index: 1, kind: input, shape index: {}]   ;;  %s6885_s2 = inlined_call_operand.vmem [shape: f32[1,8], index: 2, kind: input, shape index: {}]   ;;  %s6886_s3 = inlined_call_operand.vmem [shape: f32[24,16], index: 3, kind: input, shape index: {}]   ;;  %s6887_s4 = inlined_call_operand.vmem [shape: f32[1,16], index: 4, kind: input, shape index: {}]   ;;  %s6888_s5 = inlined_call_operand.vmem [shape: f32[48,32], index: 5, kind: input, shape index: {}]   ;;  %s6889_s6 = inlined_call_operand.vmem [shape: f32[1,32], index: 6, kind: input, shape index: {}]   ;;  %s6890_s7 = inlined_call_operand.vmem [shape: f32[64,200], index: 7, kind: input, shape index: {}]   ;;  %s6891_s8 = inlined_call_operand.vmem [shape: f32[1,200], index: 8, kind: input, shape index: {}]   ;;  %s6892_s9 = inlined_call_operand.vmem [shape: f32[200,200], index: 9, kind: input, shape index: {}]   ;;  %s6893_s10 = inlined_call_operand.vmem [shape: f32[1,200], index: 10, kind: input, shape index: {}]   ;;  %s6894_s11 = inlined_call_operand.vmem [shape: f32[200,10], index: 11, kind: input, shape index: {}]   ;;  %s6895_s12 = inlined_call_operand.vmem [shape: f32[1,10], index: 12, kind: input, shape index: {}]   ;;  %s6896_s13 = inlined_call_operand.hbm [shape: f32[4,10], index: 13, kind: output, shape index: {}]  }
   0x1   :  { %v60_v0 = vld [vmem:[%s6883_s0] sm:$0xff]  ;;  %v61_v1 = vld [vmem:[%s6883_s0 + $0x8] sm:$0xff]  ;;  %v62_v2 = vld [vmem:[%s6883_s0 + $0x10] sm:$0xff]  ;;  %87 = vst.msk [vmem:[#allocation2 + $0x6c] sm:$0xff] %vm58_vm0, %v6897_v9 }
   0x2   :  { %73 = vst.msk [vmem:[#allocation2 + $0x8] sm:$0xff] %vm58_vm0, %v60_v0  ;;  %74 = vst.msk [vmem:[#allocation2 + $0x10] sm:$0xff] %vm58_vm0, %v61_v1  ;;  %v63_v3 = vld [vmem:[%s6883_s0 + $0x18] sm:$0xff]  ;;  %v66_v4 = vld [vmem:[%s6883_s0 + $0x30] sm:$0xff] }
   0x3   :  { %75 = vst.msk [vmem:[#allocation2 + $0x18] sm:$0xff] %vm58_vm0, %v62_v2  ;;  %v67_v5 = vld [vmem:[%s6883_s0 + $0x38] sm:$0xff]  ;;  %76 = vst.msk [vmem:[#allocation2 + $0x20] sm:$0xff] %vm58_vm0, %v63_v3  ;;  %v64_v6 = vld [vmem:[%s6883_s0 + $0x20] sm:$0xff] }
   0x4   :  { %79 = vst.msk [vmem:[#allocation2 + $0x38] sm:$0xff] %vm58_vm0, %v66_v4  ;;  %80 = vst.msk [vmem:[#allocation2 + $0x40] sm:$0xff] %vm58_vm0, %v67_v5  ;;  %v65_v7 = vld [vmem:[%s6883_s0 + $0x28] sm:$0xff]  ;;  %v70_v8 = vld [vmem:[%s6883_s0 + $0x50] sm:$0xff] }
   0x5   :  { %88 = vst.msk [vmem:[#allocation2 + $0x74] sm:$0xf] %vm85_vm1, %v6897_v9  ;;  %117 = vst.msk [vmem:[#allocation2 + $0xe4] sm:$0xf] %vm85_vm1, %v6897_v9  ;;  %v71_v10 = vld [vmem:[%s6883_s0 + $0x58] sm:$0xff]  ;;  %v68_v11 = vld [vmem:[%s6883_s0 + $0x40] sm:$0xff] }
   0x6   :  { %59 = vst.msk [vmem:[#allocation2] sm:$0xff] %vm58_vm0, %v6897_v9  ;;  %116 = vst.msk [vmem:[#allocation2 + $0xdc] sm:$0xff] %vm58_vm0, %v6897_v9  ;;  %v69_v12 = vld [vmem:[%s6883_s0 + $0x48] sm:$0xff]  ;;  %v4000_v14 = vld [vmem:[%s6883_s0 + $0x70] sm:$0xff] }
   0x7   :  { %145 = vst.msk [vmem:[#allocation2 + $0x14c] sm:$0xff] %vm58_vm0, %v6897_v9  ;;  %174 = vst.msk [vmem:[#allocation2 + $0x1bc] sm:$0xff] %vm58_vm0, %v6897_v9  ;;  %v3999_v13 = vld [vmem:[%s6883_s0 + $0x68] sm:$0xff]  ;;  %v72_v15 = vld [vmem:[%s6883_s0 + $0x60] sm:$0xf] }
   0x8   :  { %146 = vst.msk [vmem:[#allocation2 + $0x154] sm:$0xf] %vm85_vm1, %v6897_v9  ;;  %86 = vst.msk [vmem:[#allocation2 + $0x68] sm:$0xf] %vm85_vm1, %v72_v15  ;;  %v4003_v16 = vld [vmem:[%s6883_s0 + $0x88] sm:$0xff]  ;;  %v4004_v17 = vld [vmem:[%s6883_s0 + $0x90] sm:$0xff] }
   0x9   :  { %175 = vst.msk [vmem:[#allocation2 + $0x1c4] sm:$0xff] %vm58_vm0, %v6897_v9  ;;  %77 = vst.msk [vmem:[#allocation2 + $0x28] sm:$0xff] %vm58_vm0, %v64_v6  ;;  %v4001_v18 = vld [vmem:[%s6883_s0 + $0x78] sm:$0xff]  ;;  %v4002_v19 = vld [vmem:[%s6883_s0 + $0x80] sm:$0xff] }
   0xa   :  { %78 = vst.msk [vmem:[#allocation2 + $0x30] sm:$0xff] %vm58_vm0, %v65_v7  ;;  %83 = vst.msk [vmem:[#allocation2 + $0x58] sm:$0xff] %vm58_vm0, %v70_v8  ;;  %v4007_v20 = vld [vmem:[%s6883_s0 + $0xa8] sm:$0xff]  ;;  %v4008_v21 = vld [vmem:[%s6883_s0 + $0xb0] sm:$0xff] }
   0xb   :  { %84 = vst.msk [vmem:[#allocation2 + $0x60] sm:$0xff] %vm58_vm0, %v71_v10  ;;  %81 = vst.msk [vmem:[#allocation2 + $0x48] sm:$0xff] %vm58_vm0, %v68_v11  ;;  %v4005_v22 = vld [vmem:[%s6883_s0 + $0x98] sm:$0xff]  ;;  %v4006_v23 = vld [vmem:[%s6883_s0 + $0xa0] sm:$0xff] }
   0xc   :  { %82 = vst.msk [vmem:[#allocation2 + $0x50] sm:$0xff] %vm58_vm0, %v69_v12  ;;  %103 = vst.msk [vmem:[#allocation2 + $0x78] sm:$0xff] %vm58_vm0, %v3999_v13  ;;  %v4011_v24 = vld [vmem:[%s6883_s0 + $0xc8] sm:$0xf]  ;;  %v4009_v27 = vld [vmem:[%s6883_s0 + $0xb8] sm:$0xff] }
   0xd   :  { %104 = vst.msk [vmem:[#allocation2 + $0x80] sm:$0xff] %vm58_vm0, %v4000_v14  ;;  %107 = vst.msk [vmem:[#allocation2 + $0x98] sm:$0xff] %vm58_vm0, %v4003_v16  ;;  %v4999_v25 = vld [vmem:[#allocation2 + $0x9] ss:$2 sm:$0xff]  ;;  %v234_v26 = vld [vmem:[#allocation2 + $0x8] ss:$2 sm:$0xff] }
   0xe   :  { %108 = vst.msk [vmem:[#allocation2 + $0xa0] sm:$0xff] %vm58_vm0, %v4004_v17  ;;  %105 = vst.msk [vmem:[#allocation2 + $0x88] sm:$0xff] %vm58_vm0, %v4001_v18  ;;  %485 = vrot.lane.b32.xlu1 %v4999_v25, %s4811_s24  ;;  %373 = vrot.lane.b32.xlu0 %v234_v26, %s4812_s25  ;;  %v5011_v28 = vld [vmem:[#allocation2 + $0x19] ss:$2 sm:$0xff]  ;;  %v236_v29 = vld [vmem:[#allocation2 + $0x18] ss:$2 sm:$0xff] }
   0xf   :  { %106 = vst.msk [vmem:[#allocation2 + $0x90] sm:$0xff] %vm58_vm0, %v4002_v19  ;;  %111 = vst.msk [vmem:[#allocation2 + $0xb8] sm:$0xff] %vm58_vm0, %v4007_v20  ;;  %v5016_v30 = vld [vmem:[#allocation2 + $0x38] ss:$2 sm:$0xff]  ;;  %v5027_v33 = vld [vmem:[#allocation2 + $0x39] ss:$2 sm:$0xff] }
  0x10   :  { %112 = vst.msk [vmem:[#allocation2 + $0xc0] sm:$0xff] %vm58_vm0, %v4008_v21  ;;  %109 = vst.msk [vmem:[#allocation2 + $0xa8] sm:$0xff] %vm58_vm0, %v4005_v22  ;;  %v4010_v32 = vld [vmem:[%s6883_s0 + $0xc0] sm:$0xff]  ;;  %v4015_v36 = vld [vmem:[%s6883_s0 + $0xe8] sm:$0xff] }
  0x11   :  { %110 = vst.msk [vmem:[#allocation2 + $0xb0] sm:$0xff] %vm58_vm0, %v4006_v23  ;;  %113 = vst.msk [vmem:[#allocation2 + $0xc8] sm:$0xff] %vm58_vm0, %v4009_v27  ;;  %v5018_v31 = vld [vmem:[#allocation2 + $0x28] ss:$2 sm:$0xff]  ;;  %v5029_v34 = vld [vmem:[#allocation2 + $0x29] ss:$2 sm:$0xff] }
  0x12   :  { %115 = vst.msk [vmem:[#allocation2 + $0xd8] sm:$0xf] %vm85_vm1, %v4011_v24  ;;  %487 = vrot.lane.b32.xlu1 %v5011_v28, %s4811_s24  ;;  %375 = vrot.lane.b32.xlu0 %v236_v29, %s4812_s25  ;;  %v4014_v35 = vld [vmem:[%s6883_s0 + $0xe0] sm:$0xff]  ;;  %v4012_v37 = vld [vmem:[%s6883_s0 + $0xd0] sm:$0xff] }
  0x13   :  { %114 = vst.msk [vmem:[#allocation2 + $0xd0] sm:$0xff] %vm58_vm0, %v4010_v32  ;;  %134 = vst.msk [vmem:[#allocation2 + $0xf8] sm:$0xff] %vm58_vm0, %v4014_v35  ;;  %v4013_v38 = vld [vmem:[%s6883_s0 + $0xd8] sm:$0xff]  ;;  %v4018_v39 = vld [vmem:[%s6883_s0 + $0x100] sm:$0xff] }
  0x14   :  { %135 = vst.msk [vmem:[#allocation2 + $0x100] sm:$0xff] %vm58_vm0, %v4015_v36  ;;  %132 = vst.msk [vmem:[#allocation2 + $0xe8] sm:$0xff] %vm58_vm0, %v4012_v37  ;;  %v5055_v40 = vld [vmem:[#allocation2 + $0x58] ss:$2 sm:$0xff]  ;;  %v4019_v41 = vld [vmem:[%s6883_s0 + $0x108] sm:$0xff] }
  0x15   :  { %133 = vst.msk [vmem:[#allocation2 + $0xf0] sm:$0xff] %vm58_vm0, %v4013_v38  ;;  %138 = vst.msk [vmem:[#allocation2 + $0x118] sm:$0xff] %vm58_vm0, %v4018_v39  ;;  %v4016_v42 = vld [vmem:[%s6883_s0 + $0xf0] sm:$0xff]  ;;  %v4017_v44 = vld [vmem:[%s6883_s0 + $0xf8] sm:$0xff] }
  0x16   :  { %379 = vrot.lane.b32.xlu1 %v5016_v30, %s4812_s25  ;;  %377 = vrot.lane.b32.xlu0 %v5018_v31, %s4812_s25  ;;  %v5064_v43 = vld [vmem:[#allocation2 + $0x48] ss:$2 sm:$0xff]  ;;  %139 = vst.msk [vmem:[#allocation2 + $0x120] sm:$0xff] %vm58_vm0, %v4019_v41  ;;  %136 = vst.msk [vmem:[#allocation2 + $0x108] sm:$0xff] %vm58_vm0, %v4016_v42  ;;  %v4022_v45 = vld [vmem:[%s6883_s0 + $0x120] sm:$0xff] }
  0x17   :  { %137 = vst.msk [vmem:[#allocation2 + $0x110] sm:$0xff] %vm58_vm0, %v4017_v44  ;;  %v4023_v46 = vld [vmem:[%s6883_s0 + $0x128] sm:$0xff]  ;;  %142 = vst.msk [vmem:[#allocation2 + $0x138] sm:$0xff] %vm58_vm0, %v4022_v45  ;;  %v4020_v47 = vld [vmem:[%s6883_s0 + $0x110] sm:$0xff] }
  0x18   :  { %v4021_v48 = vld [vmem:[%s6883_s0 + $0x118] sm:$0xff]  ;;  %143 = vst.msk [vmem:[#allocation2 + $0x140] sm:$0xff] %vm58_vm0, %v4023_v46  ;;  %140 = vst.msk [vmem:[#allocation2 + $0x128] sm:$0xff] %vm58_vm0, %v4020_v47  ;;  %v5094_v50 = vld [vmem:[#allocation2 + $0x49] ss:$2 sm:$0xff] }
  0x19   :  { %141 = vst.msk [vmem:[#allocation2 + $0x130] sm:$0xff] %vm58_vm0, %v4021_v48  ;;  %v5092_v49 = vld [vmem:[#allocation2 + $0x59] ss:$2 sm:$0xff]  ;;  %v4024_v54 = vld [vmem:[%s6883_s0 + $0x130] sm:$0xf]  ;;  %v4027_v61 = vld [vmem:[%s6883_s0 + $0x148] sm:$0xff] }
  0x1a   :  { %491 = vrot.lane.b32.xlu1 %v5027_v33, %s4811_s24  ;;  %489 = vrot.lane.b32.xlu0 %v5029_v34, %s4811_s24  ;;  %v5099_v51 = vld [vmem:[%s6884_s1] sm:$0x7]  ;;  %v4025_v52 = vld [vmem:[%s6883_s0 + $0x138] sm:$0xff]  ;;  %144 = vst.msk [vmem:[#allocation2 + $0x148] sm:$0xf] %vm85_vm1, %v4024_v54 }
  0x1b   :  { %v4026_v53 = vld [vmem:[%s6883_s0 + $0x140] sm:$0xff]  ;;  %4326 = vmatprep.subr.msk.mxu0 %vm711_vm2, %v5099_v51  ;;  %161 = vst.msk [vmem:[#allocation2 + $0x158] sm:$0xff] %vm58_vm0, %v4025_v52  ;;  %4774 = vmatprep.subr.msk.mxu1 %vm711_vm2, %v5099_v51  ;;  %v5127_v56 = vld [vmem:[#allocation2 + $0x68] ss:$2 sm:$0xff]  ;;  %v4029_v57 = vld [vmem:[%s6883_s0 + $0x158] sm:$0xff] }
  0x1c   :  { %162 = vst.msk [vmem:[#allocation2 + $0x160] sm:$0xff] %vm58_vm0, %v4026_v53  ;;  %4327 = vmatpush3.msk.msra.mxu0 %vm711_vm2, %v5099_v51  ;;  %4775 = vmatpush3.msk.msra.mxu1 %vm711_vm2, %v5099_v51  ;;  %v5125_v55 = vld [vmem:[#allocation2 + $0x78] ss:$2 sm:$0xff]  ;;  %v5141_v59 = vld [vmem:[#allocation2 + $0x79] ss:$2 sm:$0xff]  ;;  %165 = vst.msk [vmem:[#allocation2 + $0x178] sm:$0xff] %vm58_vm0, %v4029_v57 }
  0x1d   :  { %4370 = vmatprep.subr.msk.mxu0 %vm711_vm2, %v5099_v51  ;;  %v4030_v58 = vld [vmem:[%s6883_s0 + $0x160] sm:$0xff]  ;;  %v5143_v60 = vld [vmem:[#allocation2 + $0x69] ss:$2 sm:$0xff]  ;;  %163 = vst.msk [vmem:[#allocation2 + $0x168] sm:$0xff] %vm58_vm0, %v4027_v61  ;;  %v5161_v0 = vld [vmem:[#allocation2 + $0x88] ss:$2 sm:$0xff] }
  0x1e   :  { %383 = vrot.lane.b32.xlu1 %v5055_v40, %s4812_s25  ;;  %381 = vrot.lane.b32.xlu0 %v5064_v43, %s4812_s25  ;;  %166 = vst.msk [vmem:[#allocation2 + $0x180] sm:$0xff] %vm58_vm0, %v4030_v58  ;;  %v4028_v62 = vld [vmem:[%s6883_s0 + $0x150] sm:$0xff]  ;;  %v5159_v63 = vld [vmem:[#allocation2 + $0x98] ss:$2 sm:$0xff]  ;;  %v4031_v3 = vld [vmem:[%s6883_s0 + $0x168] sm:$0xff] }
  0x1f   :  { %164 = vst.msk [vmem:[#allocation2 + $0x170] sm:$0xff] %vm58_vm0, %v4028_v62  ;;  %v4033_v1 = vld [vmem:[%s6883_s0 + $0x178] sm:$0xff]  ;;  %v4034_v2 = vld [vmem:[%s6883_s0 + $0x180] sm:$0xff]  ;;  %v4032_v4 = vld [vmem:[%s6883_s0 + $0x170] sm:$0xff] }
  0x20   :  { %169 = vst.msk [vmem:[#allocation2 + $0x198] sm:$0xff] %vm58_vm0, %v4033_v1  ;;  %170 = vst.msk [vmem:[#allocation2 + $0x1a0] sm:$0xff] %vm58_vm0, %v4034_v2 }
  0x21   :  { %167 = vst.msk [vmem:[#allocation2 + $0x188] sm:$0xff] %vm58_vm0, %v4031_v3  ;;  %168 = vst.msk [vmem:[#allocation2 + $0x190] sm:$0xff] %vm58_vm0, %v4032_v4 }
  0x22   :  { %495 = vrot.lane.b32.xlu1 %v5092_v49, %s4811_s24  ;;  %493 = vrot.lane.b32.xlu0 %v5094_v50, %s4811_s24 }
  0x26   :  { %387 = vrot.lane.b32.xlu1 %v5125_v55, %s4812_s25  ;;  %385 = vrot.lane.b32.xlu0 %v5127_v56, %s4812_s25 }
  0x2a   :  { %499 = vrot.lane.b32.xlu1 %v5141_v59, %s4811_s24  ;;  %497 = vrot.lane.b32.xlu0 %v5143_v60, %s4811_s24 }
  0x2b   :  { %18 = vsyncpa [#allocation7], 0  ;;  %v308_v5 = vld [vmem:[#allocation2 + $0x99] ss:$2 sm:$0xff]  ;;  %v306_v7 = vld [vmem:[#allocation2 + $0x89] ss:$2 sm:$0xff] }
  0x2c   :  { %v4037_v6 = vld [vmem:[%s6883_s0 + $0x198] sm:$0xf]  ;;  %v4035_v8 = vld [vmem:[%s6883_s0 + $0x188] sm:$0xff]  ;;  %v4036_v10 = vld [vmem:[%s6883_s0 + $0x190] sm:$0xff]  ;;  %vm597_vm3 = vcmask 15360   ;;  %vm626_vm4 = vcmask 23552  }
  0x2d   :  { %173 = vst.msk [vmem:[#allocation2 + $0x1b8] sm:$0xf] %vm85_vm1, %v4037_v6  ;;  %v5197_v11 = vld [vmem:[#allocation2 + $0xb8] ss:$2 sm:$0xff]  ;;  %v5199_v12 = vld [vmem:[#allocation2 + $0xa8] ss:$2 sm:$0xff] }
  0x2e   :  { %391 = vrot.lane.b32.xlu1 %v5159_v63, %s4812_s25  ;;  %389 = vrot.lane.b32.xlu0 %v5161_v0, %s4812_s25  ;;  %171 = vst.msk [vmem:[#allocation2 + $0x1a8] sm:$0xff] %vm58_vm0, %v4035_v8  ;;  %172 = vst.msk [vmem:[#allocation2 + $0x1b0] sm:$0xff] %vm58_vm0, %v4036_v10  ;;  %v310_v13 = vld [vmem:[#allocation2 + $0xa9] ss:$2 sm:$0xff]  ;;  %v312_v14 = vld [vmem:[#allocation2 + $0xb9] ss:$2 sm:$0xff] }
  0x2f   :  { %v927_v15 = vld [vmem:[#allocation2 + $0x3a] ss:$2 sm:$0xff]  ;;  %v925_v16 = vld [vmem:[#allocation2 + $0x2a] ss:$2 sm:$0xff]  ;;  %v5221_v19 = vld [vmem:[#allocation2 + $0xc9] ss:$2 sm:$0xff] }
  0x30   :  { %v5213_v17 = vld [vmem:[#allocation2 + $0xd8] ss:$2 sm:$0xff]  ;;  %v5215_v18 = vld [vmem:[#allocation2 + $0xc8] ss:$2 sm:$0xff]  ;;  %v5227_v20 = vld [vmem:[#allocation2 + $0xd9] ss:$2 sm:$0xff] }
  0x31   :  { %v931_v21 = vld [vmem:[#allocation2 + $0x5a] ss:$2 sm:$0xff]  ;;  %v929_v22 = vld [vmem:[#allocation2 + $0x4a] ss:$2 sm:$0xff]  ;;  %v5243_v26 = vld [vmem:[#allocation2 + $0xe9] ss:$2 sm:$0xff] }
  0x32   :  { %503 = vrot.lane.b32.xlu1 %v308_v5, %s4811_s24  ;;  %501 = vrot.lane.b32.xlu0 %v306_v7, %s4811_s24  ;;  %v5235_v23 = vld [vmem:[#allocation2 + $0xf8] ss:$2 sm:$0xff]  ;;  %v5237_v24 = vld [vmem:[#allocation2 + $0xe8] ss:$2 sm:$0xff]  ;;  %v5249_v27 = vld [vmem:[#allocation2 + $0xf9] ss:$2 sm:$0xff] }
  0x33   :  { %v935_v29 = vld [vmem:[#allocation2 + $0x7a] ss:$2 sm:$0xff]  ;;  %v933_v32 = vld [vmem:[#allocation2 + $0x6a] ss:$2 sm:$0xff]  ;;  %v5265_v35 = vld [vmem:[#allocation2 + $0x109] ss:$2 sm:$0xff] }
  0x34   :  { %v5270_v36 = vld [vmem:[#allocation2 + $0x119] ss:$2 sm:$0xff]  ;;  %v939_v37 = vld [vmem:[#allocation2 + $0x9a] ss:$2 sm:$0xff]  ;;  %v937_v38 = vld [vmem:[#allocation2 + $0x8a] ss:$2 sm:$0xff] }
  0x35   :  { %v5277_v39 = vld [vmem:[#allocation2 + $0x138] ss:$2 sm:$0xff]  ;;  %v5279_v41 = vld [vmem:[#allocation2 + $0x128] ss:$2 sm:$0xff]  ;;  %v5285_v42 = vld [vmem:[#allocation2 + $0x129] ss:$2 sm:$0xff] }
  0x36   :  { %395 = vrot.lane.b32.xlu1 %v5197_v11, %s4812_s25  ;;  %393 = vrot.lane.b32.xlu0 %v5199_v12, %s4812_s25  ;;  %v5290_v44 = vld [vmem:[#allocation2 + $0x139] ss:$2 sm:$0xff]  ;;  %v943_v46 = vld [vmem:[#allocation2 + $0xba] ss:$2 sm:$0xff]  ;;  %v941_v47 = vld [vmem:[#allocation2 + $0xaa] ss:$2 sm:$0xff] }
  0x37   :  { %v178_v45 = vld [vmem:[#allocation2 + $0x7] ss:$2 sm:$0xff]  ;;  %v180_v53 = vld [vmem:[#allocation2 + $0x17] ss:$2 sm:$0xff]  ;;  %v5300_v54 = vld [vmem:[#allocation2 + $0x158] ss:$2 sm:$0xff] }
  0x38   :  { %v5302_v57 = vld [vmem:[#allocation2 + $0x148] ss:$2 sm:$0xff]  ;;  %v5311_v62 = vld [vmem:[#allocation2 + $0x149] ss:$2 sm:$0xff]  ;;  %vm1607_vm5 = vcmask 64512   ;;  %vm1620_vm6 = vcmask 62464  }
  0x39   :  { %v184_v3 = vld [vmem:[#allocation2 + $0x37] ss:$2 sm:$0xff]  ;;  %v182_v4 = vld [vmem:[#allocation2 + $0x27] ss:$2 sm:$0xff]  ;;  %1608 = vst.msk [vmem:[#allocation3] sm:$0xff] %vm1607_vm5, %v6897_v9  ;;  %1617 = vst.msk [vmem:[#allocation3 + $0x3a] sm:$0xff] %vm1607_vm5, %v6897_v9 }
  0x3a   :  { %980 = vrot.lane.b32.xlu1 %v5029_v34, %s4812_s25  ;;  %505 = vrot.lane.b32.xlu0 %v310_v13, %s4811_s24  ;;  %v5259_v34 = vld [vmem:[#allocation2 + $0x108] ss:$2 sm:$0xff]  ;;  %1618 = vst.msk [vmem:[#allocation3 + $0x42] sm:$0xff] %vm1607_vm5, %v6897_v9  ;;  %1619 = vst.msk [vmem:[#allocation3 + $0x4a] sm:$0xff] %vm1607_vm5, %v6897_v9  ;;  %vm1776_vm7 = vcmask 130048   ;;  %vm1615_vm8 = vcmask 58368  }
  0x3b   :  { %1629 = vst.msk [vmem:[#allocation3 + $0x8a] sm:$0xff] %vm1607_vm5, %v6897_v9  ;;  %1630 = vst.msk [vmem:[#allocation3 + $0x92] sm:$0xff] %vm1607_vm5, %v6897_v9  ;;  %vm1785_vm9 = vcmask 195584   ;;  %vm2844_vm10 = vcmask 128000   ;;  %vm2839_vm11 = vcmask 123904   ;;  %vm2925_vm12 = vcmask 261120  }
  0x3c   :  { %1631 = vst.msk [vmem:[#allocation3 + $0x9a] sm:$0xff] %vm1607_vm5, %v6897_v9  ;;  %1640 = vst.msk [vmem:[#allocation3 + $0xda] sm:$0xff] %vm1607_vm5, %v6897_v9  ;;  %vm2930_vm13 = vcmask 392192   ;;  %vm3662_vm14 = vcmask 523264   ;;  %vm3801_vm15 = vcmask 588800  }
  0x3d   :  { %1641 = vst.msk [vmem:[#allocation3 + $0xe2] sm:$0xff] %vm1607_vm5, %v6897_v9  ;;  %1642 = vst.msk [vmem:[#allocation3 + $0xea] sm:$0xff] %vm1607_vm5, %v6897_v9 }
  0x3e   :  { %982 = vrot.lane.b32.xlu1 %v5027_v33, %s4812_s25  ;;  %507 = vrot.lane.b32.xlu0 %v312_v14, %s4811_s24  ;;  %v5257_v33 = vld [vmem:[#allocation2 + $0x118] ss:$2 sm:$0xff]  ;;  %1651 = vst.msk [vmem:[#allocation3 + $0x12a] sm:$0xff] %vm1607_vm5, %v6897_v9  ;;  %1652 = vst.msk [vmem:[#allocation3 + $0x132] sm:$0xff] %vm1607_vm5, %v6897_v9 }
  0x3f   :  { %1653 = vst.msk [vmem:[#allocation3 + $0x13a] sm:$0xff] %vm1607_vm5, %v6897_v9  ;;  %1654 = vst.msk [vmem:[#allocation3 + $0x142] sm:$0xff] %vm1607_vm5, %v6897_v9 }
  0x40   :  { %1621 = vst.msk [vmem:[#allocation3 + $0x52] sm:$0x3f] %vm1620_vm6, %v6897_v9  ;;  %1632 = vst.msk [vmem:[#allocation3 + $0xa2] sm:$0x3f] %vm1620_vm6, %v6897_v9 }
  0x41   :  { %1643 = vst.msk [vmem:[#allocation3 + $0xf2] sm:$0x3f] %vm1620_vm6, %v6897_v9 }
  0x42   :  { %1094 = vrot.lane.b32.xlu1 %v927_v15, %s4811_s24  ;;  %1092 = vrot.lane.b32.xlu0 %v925_v16, %s4811_s24  ;;  %v945_v15 = vld [vmem:[#allocation2 + $0xca] ss:$2 sm:$0xff]  ;;  %2837 = vst.msk [vmem:[#allocation4] sm:$0xff] %vm1776_vm7, %v6897_v9  ;;  %2841 = vst.msk [vmem:[#allocation4 + $0x12] sm:$0xff] %vm1776_vm7, %v6897_v9 }
  0x43   :  { %2842 = vst.msk [vmem:[#allocation4 + $0x1a] sm:$0xff] %vm1776_vm7, %v6897_v9  ;;  %2843 = vst.msk [vmem:[#allocation4 + $0x22] sm:$0xff] %vm1776_vm7, %v6897_v9 }
  0x44   :  { %2848 = vst.msk [vmem:[#allocation4 + $0x3a] sm:$0xff] %vm1776_vm7, %v6897_v9  ;;  %2849 = vst.msk [vmem:[#allocation4 + $0x42] sm:$0xff] %vm1776_vm7, %v6897_v9 }
  0x45   :  { %2850 = vst.msk [vmem:[#allocation4 + $0x4a] sm:$0xff] %vm1776_vm7, %v6897_v9  ;;  %2854 = vst.msk [vmem:[#allocation4 + $0x62] sm:$0xff] %vm1776_vm7, %v6897_v9 }
  0x46   :  { %399 = vrot.lane.b32.xlu1 %v5213_v17, %s4812_s25  ;;  %397 = vrot.lane.b32.xlu0 %v5215_v18, %s4812_s25  ;;  %2855 = vst.msk [vmem:[#allocation4 + $0x6a] sm:$0xff] %vm1776_vm7, %v6897_v9  ;;  %2856 = vst.msk [vmem:[#allocation4 + $0x72] sm:$0xff] %vm1776_vm7, %v6897_v9 }
  0x47   :  { %2860 = vst.msk [vmem:[#allocation4 + $0x8a] sm:$0xff] %vm1776_vm7, %v6897_v9  ;;  %2861 = vst.msk [vmem:[#allocation4 + $0x92] sm:$0xff] %vm1776_vm7, %v6897_v9 }
  0x48   :  { %2862 = vst.msk [vmem:[#allocation4 + $0x9a] sm:$0xff] %vm1776_vm7, %v6897_v9  ;;  %2863 = vst.msk [vmem:[#allocation4 + $0xa2] sm:$0xff] %vm1776_vm7, %v6897_v9 }
  0x4a   :  { %984 = vrot.lane.b32.xlu1 %v5094_v50, %s4812_s25  ;;  %509 = vrot.lane.b32.xlu0 %v5221_v19, %s4811_s24 }
  0x4e   :  { %986 = vrot.lane.b32.xlu1 %v5092_v49, %s4812_s25  ;;  %511 = vrot.lane.b32.xlu0 %v5227_v20, %s4811_s24 }
  0x52   :  { %1098 = vrot.lane.b32.xlu1 %v931_v21, %s4811_s24  ;;  %1096 = vrot.lane.b32.xlu0 %v929_v22, %s4811_s24  ;;  %v188_v21 = vld [vmem:[#allocation2 + $0x57] ss:$2 sm:$0xff]  ;;  %v186_v22 = vld [vmem:[#allocation2 + $0x47] ss:$2 sm:$0xff] }
  0x56   :  { %403 = vrot.lane.b32.xlu1 %v5235_v23, %s4812_s25  ;;  %401 = vrot.lane.b32.xlu0 %v5237_v24, %s4812_s25 }
  0x5a   :  { %988 = vrot.lane.b32.xlu1 %v5143_v60, %s4812_s25  ;;  %513 = vrot.lane.b32.xlu0 %v5243_v26, %s4811_s24 }
  0x5e   :  { %990 = vrot.lane.b32.xlu1 %v5141_v59, %s4812_s25  ;;  %515 = vrot.lane.b32.xlu0 %v5249_v27, %s4811_s24 }
  0x62   :  { %1102 = vrot.lane.b32.xlu1 %v935_v29, %s4811_s24  ;;  %1100 = vrot.lane.b32.xlu0 %v933_v32, %s4811_s24  ;;  %v5333_v29 = vld [vmem:[#allocation2 + $0x178] ss:$2 sm:$0xff] }
  0x66   :  { %407 = vrot.lane.b32.xlu1 %v5257_v33, %s4812_s25  ;;  %405 = vrot.lane.b32.xlu0 %v5259_v34, %s4812_s25 }
  0x6a   :  { %992 = vrot.lane.b32.xlu1 %v306_v7, %s4812_s25  ;;  %517 = vrot.lane.b32.xlu0 %v5265_v35, %s4811_s24 }
  0x6e   :  { %994 = vrot.lane.b32.xlu1 %v308_v5, %s4812_s25  ;;  %519 = vrot.lane.b32.xlu0 %v5270_v36, %s4811_s24  ;;  %v5319_v5 = vld [vmem:[#allocation2 + $0x159] ss:$2 sm:$0xff] }
  0x72   :  { %1106 = vrot.lane.b32.xlu1 %v939_v37, %s4811_s24  ;;  %1104 = vrot.lane.b32.xlu0 %v937_v38, %s4811_s24 }
  0x76   :  { %411 = vrot.lane.b32.xlu1 %v5277_v39, %s4812_s25  ;;  %409 = vrot.lane.b32.xlu0 %v5279_v41, %s4812_s25 }
  0x7a   :  { %996 = vrot.lane.b32.xlu1 %v310_v13, %s4812_s25  ;;  %521 = vrot.lane.b32.xlu0 %v5285_v42, %s4811_s24 }
  0x7e   :  { %998 = vrot.lane.b32.xlu1 %v312_v14, %s4812_s25  ;;  %523 = vrot.lane.b32.xlu0 %v5290_v44, %s4811_s24  ;;  %v947_v14 = vld [vmem:[#allocation2 + $0xda] ss:$2 sm:$0xff] }
  0x80   :  { %v486_v48 = vpop.permute.xlu1 %485  ;;  %v374_v49 = vpop.permute.xlu0 %373 }
  0x81   :  { %v569_v50 = vsel %vm58_vm0, %v178_v45, %v374_v49 }
  0x82   :  { %1110 = vrot.lane.b32.xlu1 %v943_v46, %s4811_s24  ;;  %1108 = vrot.lane.b32.xlu0 %v941_v47, %s4811_s24  ;;  %v598_v52 = vsel %vm597_vm3, %v569_v50, %v486_v48  ;;  %v5346_v48 = vld [vmem:[#allocation2 + $0x169] ss:$2 sm:$0xff] }
  0x83   :  { %4328 = vmatprep.mubr.msk.f32.mxu0 %vm626_vm4, %v598_v52  ;;  %v192_v52 = vld [vmem:[#allocation2 + $0x77] ss:$2 sm:$0xff] }
  0x84   :  { %v488_v58 = vpop.permute.xlu1 %487  ;;  %v376_v59 = vpop.permute.xlu0 %375 }
  0x85   :  { %v570_v60 = vsel %vm58_vm0, %v180_v53, %v376_v59  ;;  %v190_v53 = vld [vmem:[#allocation2 + $0x67] ss:$2 sm:$0xff] }
  0x86   :  { %415 = vrot.lane.b32.xlu1 %v5300_v54, %s4812_s25  ;;  %413 = vrot.lane.b32.xlu0 %v5302_v57, %s4812_s25  ;;  %v599_v61 = vsel %vm597_vm3, %v570_v60, %v488_v58  ;;  %v5353_v58 = vld [vmem:[#allocation2 + $0x179] ss:$2 sm:$0xff] }
  0x87   :  { %4329 = vmatmul.mubr.msk.f32.vlgmr.msra.gmra.mrb[0].mxu0 %vm626_vm4, %v599_v61 }
  0x88   :  { %v380_v1 = vpop.permute.xlu1 %379  ;;  %v378_v2 = vpop.permute.xlu0 %377  ;;  %4371 = vmatpush3.msk.msra.mxu0 %vm711_vm2, %v5099_v51 }
  0x89   :  { %v572_v6 = vsel %vm58_vm0, %v184_v3, %v380_v1  ;;  %v571_v7 = vsel %vm58_vm0, %v182_v4, %v378_v2  ;;  %v949_v4 = vld [vmem:[#allocation2 + $0xea] ss:$2 sm:$0xff] }
  0x8a   :  { %1000 = vrot.lane.b32.xlu1 %v5221_v19, %s4812_s25  ;;  %525 = vrot.lane.b32.xlu0 %v5311_v62, %s4811_s24 }
  0x8c   :  { %v492_v8 = vpop.permute.xlu1 %491  ;;  %v490_v10 = vpop.permute.xlu0 %489 }
  0x8d   :  { %v601_v13 = vsel %vm597_vm3, %v572_v6, %v492_v8  ;;  %v600_v51 = vsel %vm597_vm3, %v571_v7, %v490_v10  ;;  %v196_v8 = vld [vmem:[#allocation2 + $0x97] ss:$2 sm:$0xff]  ;;  %v194_v10 = vld [vmem:[#allocation2 + $0x87] ss:$2 sm:$0xff] }
  0x8e   :  { %1002 = vrot.lane.b32.xlu1 %v5227_v20, %s4812_s25  ;;  %527 = vrot.lane.b32.xlu0 %v5319_v5, %s4811_s24  ;;  %v5335_v20 = vld [vmem:[#allocation2 + $0x168] ss:$2 sm:$0xff] }
  0x8f   :  { %4331 = vmatprep.mubr.msk.f32.mxu0 %vm626_vm4, %v600_v51 }
  0x90   :  { %4332 = vmatmul.mubr.msk.f32.gmra.mrb[2].mxu0 %vm626_vm4, %v601_v13  ;;  %v384_v16 = vpop.permute.xlu1 %383  ;;  %v382_v19 = vpop.permute.xlu0 %381  ;;  %v5367_v13 = vld [vmem:[#allocation2 + $0x198] ss:$2 sm:$0xff] }
  0x91   :  { %v574_v32 = vsel %vm58_vm0, %v188_v21, %v384_v16  ;;  %v573_v37 = vsel %vm58_vm0, %v186_v22, %v382_v19  ;;  %v5380_v22 = vld [vmem:[#allocation2 + $0x189] ss:$2 sm:$0xff] }
  0x92   :  { %1114 = vrot.lane.b32.xlu1 %v947_v14, %s4811_s24  ;;  %1112 = vrot.lane.b32.xlu0 %v945_v15, %s4811_s24 }
  0x94   :  { %v496_v38 = vpop.permute.xlu1 %495  ;;  %v494_v45 = vpop.permute.xlu0 %493 }
  0x95   :  { %v603_v46 = vsel %vm597_vm3, %v574_v32, %v496_v38  ;;  %v602_v47 = vsel %vm597_vm3, %v573_v37, %v494_v45  ;;  %v198_v38 = vld [vmem:[#allocation2 + $0xa7] ss:$2 sm:$0xff] }
  0x96   :  { %419 = vrot.lane.b32.xlu1 %v5333_v29, %s4812_s25  ;;  %417 = vrot.lane.b32.xlu0 %v5335_v20, %s4812_s25  ;;  %v5387_v45 = vld [vmem:[#allocation2 + $0x199] ss:$2 sm:$0xff] }
  0x97   :  { %4334 = vmatprep.mubr.msk.f32.mxu0 %vm626_vm4, %v602_v47 }
  0x98   :  { %4335 = vmatmul.mubr.msk.f32.gmra.mrb[4].mxu0 %vm626_vm4, %v603_v46  ;;  %v388_v49 = vpop.permute.xlu1 %387  ;;  %v386_v50 = vpop.permute.xlu0 %385 }
  0x99   :  { %v576_v59 = vsel %vm58_vm0, %v192_v52, %v388_v49  ;;  %v575_v60 = vsel %vm58_vm0, %v190_v53, %v386_v50  ;;  %v200_v50 = vld [vmem:[#allocation2 + $0xb7] ss:$2 sm:$0xff]  ;;  %v953_v53 = vld [vmem:[#allocation2 + $0x10a] ss:$2 sm:$0xff] }
  0x9a   :  { %1004 = vrot.lane.b32.xlu1 %v5243_v26, %s4812_s25  ;;  %529 = vrot.lane.b32.xlu0 %v5346_v48, %s4811_s24  ;;  %v951_v26 = vld [vmem:[#allocation2 + $0xfa] ss:$2 sm:$0xff] }
  0x9c   :  { %v500_v61 = vpop.permute.xlu1 %499  ;;  %v498_v1 = vpop.permute.xlu0 %497 }
  0x9d   :  { %v605_v2 = vsel %vm597_vm3, %v576_v59, %v500_v61  ;;  %v604_v3 = vsel %vm597_vm3, %v575_v60, %v498_v1 }
  0x9e   :  { %1006 = vrot.lane.b32.xlu1 %v5249_v27, %s4812_s25  ;;  %531 = vrot.lane.b32.xlu0 %v5353_v58, %s4811_s24  ;;  %v5369_v27 = vld [vmem:[#allocation2 + $0x188] ss:$2 sm:$0xff] }
  0x9f   :  { %4337 = vmatprep.mubr.msk.f32.mxu0 %vm626_vm4, %v604_v3 }
  0xa0   :  { %4338 = vmatmul.mubr.msk.f32.gmra.mrb[6].mxu0 %vm626_vm4, %v605_v2  ;;  %v392_v6 = vpop.permute.xlu1 %391  ;;  %v390_v7 = vpop.permute.xlu0 %389  ;;  %v5403_v2 = vld [vmem:[#allocation2 + $0x1a8] ss:$2 sm:$0xff] }
  0xa1   :  { %v578_v51 = vsel %vm58_vm0, %v196_v8, %v392_v6  ;;  %v577_v14 = vsel %vm58_vm0, %v194_v10, %v390_v7  ;;  %v5416_v10 = vld [vmem:[#allocation2 + $0x1a9] ss:$2 sm:$0xff] }
  0xa2   :  { %1118 = vrot.lane.b32.xlu1 %v951_v26, %s4811_s24  ;;  %1116 = vrot.lane.b32.xlu0 %v949_v4, %s4811_s24 }
  0xa4   :  { %v504_v15 = vpop.permute.xlu1 %503  ;;  %v502_v16 = vpop.permute.xlu0 %501 }
  0xa5   :  { %v607_v19 = vsel %vm597_vm3, %v578_v51, %v504_v15  ;;  %v606_v21 = vsel %vm597_vm3, %v577_v14, %v502_v16  ;;  %v202_v51 = vld [vmem:[#allocation2 + $0xc7] ss:$2 sm:$0xff] }
  0xa6   :  { %423 = vrot.lane.b32.xlu1 %v5367_v13, %s4812_s25  ;;  %421 = vrot.lane.b32.xlu0 %v5369_v27, %s4812_s25  ;;  %v5423_v14 = vld [vmem:[#allocation2 + $0x1b9] ss:$2 sm:$0xff] }
  0xa7   :  { %4340 = vmatprep.mubr.msk.f32.mxu0 %vm626_vm4, %v606_v21  ;;  %v204_v21 = vld [vmem:[#allocation2 + $0xd7] ss:$2 sm:$0xff] }
  0xa8   :  { %4341 = vmatmul.mubr.msk.f32.gmra.mrb[8].mxu0 %vm626_vm4, %v607_v19  ;;  %v396_v32 = vpop.permute.xlu1 %395  ;;  %v394_v37 = vpop.permute.xlu0 %393 }
  0xa9   :  { %v579_v46 = vsel %vm58_vm0, %v198_v38, %v394_v37  ;;  %v580_v59 = vsel %vm58_vm0, %v200_v50, %v396_v32  ;;  %v957_v37 = vld [vmem:[#allocation2 + $0x12a] ss:$2 sm:$0xff] }
  0xaa   :  { %1008 = vrot.lane.b32.xlu1 %v5265_v35, %s4812_s25  ;;  %533 = vrot.lane.b32.xlu0 %v5380_v22, %s4811_s24  ;;  %v955_v35 = vld [vmem:[#allocation2 + $0x11a] ss:$2 sm:$0xff] }
  0xac   :  { %v981_v47 = vpop.permute.xlu1 %980  ;;  %v506_v49 = vpop.permute.xlu0 %505 }
  0xad   :  { %v608_v52 = vsel %vm597_vm3, %v579_v46, %v506_v49  ;;  %v1174_v3 = vsel %vm58_vm0, %v5018_v31, %v981_v47 }
  0xae   :  { %1010 = vrot.lane.b32.xlu1 %v5270_v36, %s4812_s25  ;;  %535 = vrot.lane.b32.xlu0 %v5387_v45, %s4811_s24  ;;  %v5401_v36 = vld [vmem:[#allocation2 + $0x1b8] ss:$2 sm:$0xff] }
  0xaf   :  { %4343 = vmatprep.mubr.msk.f32.mxu0 %vm626_vm4, %v608_v52 }
  0xb0   :  { %v983_v60 = vpop.permute.xlu1 %982  ;;  %v508_v61 = vpop.permute.xlu0 %507 }
  0xb1   :  { %v609_v1 = vsel %vm597_vm3, %v580_v59, %v508_v61  ;;  %v1175_v26 = vsel %vm58_vm0, %v5016_v30, %v983_v60  ;;  %v921_v60 = vld [vmem:[#allocation2 + $0xa] ss:$2 sm:$0xff] }
  0xb2   :  { %1122 = vrot.lane.b32.xlu1 %v955_v35, %s4811_s24  ;;  %1120 = vrot.lane.b32.xlu0 %v953_v53, %s4811_s24 }
  0xb3   :  { %4344 = vmatmul.mubr.msk.f32.gmra.mrb[10].mxu0 %vm626_vm4, %v609_v1  ;;  %v923_v1 = vld [vmem:[#allocation2 + $0x1a] ss:$2 sm:$0xff] }
  0xb4   :  { %v1095_v4 = vpop.permute.xlu1 %1094  ;;  %v1093_v6 = vpop.permute.xlu0 %1092 }
  0xb5   :  { %v1203_v7 = vsel %vm597_vm3, %v1175_v26, %v1095_v4  ;;  %v1202_v8 = vsel %vm597_vm3, %v1174_v3, %v1093_v6  ;;  %v208_v4 = vld [vmem:[#allocation2 + $0xf7] ss:$2 sm:$0xff]  ;;  %v961_v6 = vld [vmem:[#allocation2 + $0x14a] ss:$2 sm:$0xff] }
  0xb6   :  { %427 = vrot.lane.b32.xlu1 %v5401_v36, %s4812_s25  ;;  %425 = vrot.lane.b32.xlu0 %v5403_v2, %s4812_s25 }
  0xb7   :  { %4375 = vmatprep.mubr.msk.f32.mxu1 %vm626_vm4, %v1202_v8 }
  0xb8   :  { %4376 = vmatmul.mubr.msk.f32.vlgmr.msra.gmra.mrb[0].mxu1 %vm626_vm4, %v1203_v7  ;;  %v400_v31 = vpop.permute.xlu1 %399  ;;  %v398_v30 = vpop.permute.xlu0 %397 }
  0xb9   :  { %v581_v15 = vsel %vm58_vm0, %v202_v51, %v398_v30  ;;  %v582_v38 = vsel %vm58_vm0, %v204_v21, %v400_v31  ;;  %v963_v31 = vld [vmem:[#allocation2 + $0x15a] ss:$2 sm:$0xff] }
  0xba   :  { %1012 = vrot.lane.b32.xlu1 %v5285_v42, %s4812_s25  ;;  %537 = vrot.lane.b32.xlu0 %v5416_v10, %s4811_s24  ;;  %v959_v42 = vld [vmem:[#allocation2 + $0x13a] ss:$2 sm:$0xff] }
  0xbc   :  { %v985_v16 = vpop.permute.xlu1 %984  ;;  %v510_v19 = vpop.permute.xlu0 %509 }
  0xbd   :  { %v610_v32 = vsel %vm597_vm3, %v581_v15, %v510_v19 }
  0xbe   :  { %1014 = vrot.lane.b32.xlu1 %v5290_v44, %s4812_s25  ;;  %539 = vrot.lane.b32.xlu0 %v5423_v14, %s4811_s24  ;;  %v1176_v44 = vsel %vm58_vm0, %v5064_v43, %v985_v16 }
  0xbf   :  { %4346 = vmatprep.mubr.msk.f32.mxu0 %vm626_vm4, %v610_v32 }
  0xc0   :  { %v987_v46 = vpop.permute.xlu1 %986  ;;  %v512_v47 = vpop.permute.xlu0 %511 }
  0xc1   :  { %v611_v49 = vsel %vm597_vm3, %v582_v38, %v512_v47  ;;  %v1177_v50 = vsel %vm58_vm0, %v5055_v40, %v987_v46  ;;  %v206_v40 = vld [vmem:[#allocation2 + $0xe7] ss:$2 sm:$0xff]  ;;  %v212_v47 = vld [vmem:[#allocation2 + $0x117] ss:$2 sm:$0xff] }
  0xc2   :  { %1126 = vrot.lane.b32.xlu1 %v959_v42, %s4811_s24  ;;  %1124 = vrot.lane.b32.xlu0 %v957_v37, %s4811_s24  ;;  %v210_v37 = vld [vmem:[#allocation2 + $0x107] ss:$2 sm:$0xff] }
  0xc3   :  { %4347 = vmatmul.mubr.msk.f32.gmra.mrb[12].mxu0 %vm626_vm4, %v611_v49 }
  0xc4   :  { %v1099_v52 = vpop.permute.xlu1 %1098  ;;  %v1097_v35 = vpop.permute.xlu0 %1096 }
  0xc5   :  { %v1205_v53 = vsel %vm597_vm3, %v1177_v50, %v1099_v52  ;;  %v1204_v59 = vsel %vm597_vm3, %v1176_v44, %v1097_v35  ;;  %v971_v35 = vld [vmem:[#allocation2 + $0x19a] ss:$2 sm:$0xff] }
  0xc6   :  { %978 = vrot.lane.b32.xlu1 %v5011_v28, %s4812_s25  ;;  %976 = vrot.lane.b32.xlu0 %v4999_v25, %s4812_s25 }
  0xc7   :  { %4378 = vmatprep.mubr.msk.f32.mxu1 %vm626_vm4, %v1204_v59 }
  0xc8   :  { %4379 = vmatmul.mubr.msk.f32.gmra.mrb[2].mxu1 %vm626_vm4, %v1205_v53  ;;  %v404_v43 = vpop.permute.xlu1 %403  ;;  %v402_v61 = vpop.permute.xlu0 %401 }
  0xc9   :  { %v583_v3 = vsel %vm58_vm0, %v206_v40, %v402_v61  ;;  %v584_v7 = vsel %vm58_vm0, %v208_v4, %v404_v43  ;;  %v216_v4 = vld [vmem:[#allocation2 + $0x137] ss:$2 sm:$0xff] }
  0xca   :  { %1088 = vrot.lane.b32.xlu1 %v921_v60, %s4811_s24  ;;  %1016 = vrot.lane.b32.xlu0 %v5311_v62, %s4812_s25 }
  0xcc   :  { %v989_v28 = vpop.permute.xlu1 %988  ;;  %v514_v26 = vpop.permute.xlu0 %513 }
  0xcd   :  { %v612_v25 = vsel %vm597_vm3, %v583_v3, %v514_v26  ;;  %v1178_v51 = vsel %vm58_vm0, %v5127_v56, %v989_v28  ;;  %v965_v56 = vld [vmem:[#allocation2 + $0x16a] ss:$2 sm:$0xff]  ;;  %v214_v3 = vld [vmem:[#allocation2 + $0x127] ss:$2 sm:$0xff] }
  0xce   :  { %1090 = vrot.lane.b32.xlu1 %v923_v1, %s4811_s24  ;;  %1018 = vrot.lane.b32.xlu0 %v5319_v5, %s4812_s25 }
  0xcf   :  { %4349 = vmatprep.mubr.msk.f32.mxu0 %vm626_vm4, %v612_v25 }
  0xd0   :  { %v991_v8 = vpop.permute.xlu1 %990  ;;  %v516_v62 = vpop.permute.xlu0 %515 }
  0xd1   :  { %v613_v30 = vsel %vm597_vm3, %v584_v7, %v516_v62  ;;  %v1179_v5 = vsel %vm58_vm0, %v5125_v55, %v991_v8  ;;  %v967_v55 = vld [vmem:[#allocation2 + $0x17a] ss:$2 sm:$0xff] }
  0xd2   :  { %1128 = vrot.lane.b32.xlu0 %v961_v6, %s4811_s24  ;;  %4350 = vmatmul.mubr.msk.f32.gmra.mrb[14].mxu0 %vm626_vm4, %v613_v30 }
  0xd3   :  { %1130 = vrot.lane.b32.xlu1 %v963_v31, %s4811_s24 }
  0xd4   :  { %v1103_v15 = vpop.permute.xlu1 %1102  ;;  %v1101_v16 = vpop.permute.xlu0 %1100 }
  0xd5   :  { %v1207_v19 = vsel %vm597_vm3, %v1179_v5, %v1103_v15  ;;  %v1206_v21 = vsel %vm597_vm3, %v1178_v51, %v1101_v16 }
  0xd6   :  { %1020 = vrot.lane.b32.xlu0 %v5346_v48, %s4812_s25  ;;  %4381 = vmatprep.mubr.msk.f32.mxu1 %vm626_vm4, %v1206_v21  ;;  %v218_v21 = vld [vmem:[#allocation2 + $0x147] ss:$2 sm:$0xff] }
  0xd7   :  { %1022 = vrot.lane.b32.xlu1 %v5353_v58, %s4812_s25  ;;  %4382 = vmatmul.mubr.msk.f32.gmra.mrb[4].mxu1 %vm626_vm4, %v1207_v19  ;;  %v969_v58 = vld [vmem:[#allocation2 + $0x18a] ss:$2 sm:$0xff] }
  0xd8   :  { %v408_v32 = vpop.permute.xlu1 %407  ;;  %v406_v42 = vpop.permute.xlu0 %405 }
  0xd9   :  { %v585_v38 = vsel %vm58_vm0, %v210_v37, %v406_v42  ;;  %v586_v44 = vsel %vm58_vm0, %v212_v47, %v408_v32  ;;  %v220_v42 = vld [vmem:[#allocation2 + $0x157] ss:$2 sm:$0xff] }
  0xda   :  { %1132 = vrot.lane.b32.xlu0 %v965_v56, %s4811_s24 }
  0xdb   :  { %1134 = vrot.lane.b32.xlu1 %v967_v55, %s4811_s24 }
  0xdc   :  { %v993_v46 = vpop.permute.xlu1 %992  ;;  %v518_v48 = vpop.permute.xlu0 %517 }
  0xdd   :  { %v614_v49 = vsel %vm597_vm3, %v585_v38, %v518_v48 }
  0xde   :  { %1024 = vrot.lane.b32.xlu0 %v5380_v22, %s4812_s25  ;;  %4352 = vmatprep.mubr.msk.f32.mxu0 %vm626_vm4, %v614_v49  ;;  %v1180_v22 = vsel %vm58_vm0, %v5161_v0, %v993_v46  ;;  %v973_v0 = vld [vmem:[#allocation2 + $0x1aa] ss:$2 sm:$0xff] }
  0xdf   :  { %1026 = vrot.lane.b32.xlu1 %v5387_v45, %s4812_s25 }
  0xe0   :  { %v995_v50 = vpop.permute.xlu1 %994  ;;  %v520_v52 = vpop.permute.xlu0 %519 }
  0xe1   :  { %v615_v53 = vsel %vm597_vm3, %v586_v44, %v520_v52  ;;  %v1181_v45 = vsel %vm58_vm0, %v5159_v63, %v995_v50  ;;  %v975_v63 = vld [vmem:[#allocation2 + $0x1ba] ss:$2 sm:$0xff] }
  0xe2   :  { %1136 = vrot.lane.b32.xlu0 %v969_v58, %s4811_s24  ;;  %4353 = vmatmul.mubr.msk.f32.gmra.mrb[16].mxu0 %vm626_vm4, %v615_v53  ;;  %v222_v53 = vld [vmem:[#allocation2 + $0x167] ss:$2 sm:$0xff] }
  0xe3   :  { %1138 = vrot.lane.b32.xlu1 %v971_v35, %s4811_s24 }
  0xe4   :  { %v1107_v59 = vpop.permute.xlu1 %1106  ;;  %v1105_v60 = vpop.permute.xlu0 %1104 }
  0xe5   :  { %v1209_v43 = vsel %vm597_vm3, %v1181_v45, %v1107_v59  ;;  %v1208_v61 = vsel %vm597_vm3, %v1180_v22, %v1105_v60  ;;  %v224_v59 = vld [vmem:[#allocation2 + $0x177] ss:$2 sm:$0xff] }
  0xe6   :  { %1028 = vrot.lane.b32.xlu0 %v5416_v10, %s4812_s25  ;;  %4384 = vmatprep.mubr.msk.f32.mxu1 %vm626_vm4, %v1208_v61 }
  0xe7   :  { %1030 = vrot.lane.b32.xlu1 %v5423_v14, %s4812_s25  ;;  %4385 = vmatmul.mubr.msk.f32.gmra.mrb[6].mxu1 %vm626_vm4, %v1209_v43  ;;  %s4814_s25 = smov 16  }
  0xe8   :  { %v412_v40 = vpop.permute.xlu1 %411  ;;  %v410_v1 = vpop.permute.xlu0 %409 }
  0xe9   :  { %v587_v28 = vsel %vm58_vm0, %v214_v3, %v410_v1  ;;  %v588_v14 = vsel %vm58_vm0, %v216_v4, %v412_v40 }
  0xea   :  { %1140 = vrot.lane.b32.xlu0 %v973_v0, %s4811_s24 }
  0xeb   :  { %1142 = vrot.lane.b32.xlu1 %v975_v63, %s4811_s24 }
  0xec   :  { %v997_v26 = vpop.permute.xlu1 %996  ;;  %v522_v10 = vpop.permute.xlu0 %521 }
  0xed   :  { %v616_v25 = vsel %vm597_vm3, %v587_v28, %v522_v10  ;;  %v1182_v62 = vsel %vm58_vm0, %v5199_v12, %v997_v26 }
  0xee   :  { %4355 = vmatprep.mubr.msk.f32.mxu0 %vm626_vm4, %v616_v25  ;;  %v226_v25 = vld [vmem:[#allocation2 + $0x187] ss:$2 sm:$0xff] }
  0xf0   :  { %v999_v6 = vpop.permute.xlu1 %998  ;;  %v524_v7 = vpop.permute.xlu0 %523 }
  0xf1   :  { %v617_v8 = vsel %vm597_vm3, %v588_v14, %v524_v7  ;;  %v1183_v31 = vsel %vm58_vm0, %v5197_v11, %v999_v6  ;;  %v228_v7 = vld [vmem:[#allocation2 + $0x197] ss:$2 sm:$0xff] }
  0xf2   :  { %4356 = vmatmul.mubr.msk.f32.gmra.mrb[18].mxu0 %vm626_vm4, %v617_v8 }
  0xf4   :  { %v1111_v30 = vpop.permute.xlu1 %1110  ;;  %v1109_v51 = vpop.permute.xlu0 %1108 }
  0xf5   :  { %v1211_v5 = vsel %vm597_vm3, %v1183_v31, %v1111_v30  ;;  %v1210_v15 = vsel %vm597_vm3, %v1182_v62, %v1109_v51 }
  0xf6   :  { %4387 = vmatprep.mubr.msk.f32.mxu1 %vm626_vm4, %v1210_v15 }
  0xf7   :  { %4388 = vmatmul.mubr.msk.f32.gmra.mrb[8].mxu1 %vm626_vm4, %v1211_v5 }
  0xf8   :  { %v416_v16 = vpop.permute.xlu1 %415  ;;  %v414_v19 = vpop.permute.xlu0 %413 }
  0xf9   :  { %v589_v56 = vsel %vm58_vm0, %v218_v21, %v414_v19  ;;  %v590_v55 = vsel %vm58_vm0, %v220_v42, %v416_v16 }
  0xfc   :  { %v1001_v32 = vpop.permute.xlu1 %1000  ;;  %v526_v12 = vpop.permute.xlu0 %525 }
  0xfd   :  { %v618_v11 = vsel %vm597_vm3, %v589_v56, %v526_v12  ;;  %v1184_v48 = vsel %vm58_vm0, %v5215_v18, %v1001_v32  ;;  %v230_v12 = vld [vmem:[#allocation2 + $0x1a7] ss:$2 sm:$0xff] }
  0xfe   :  { %4358 = vmatprep.mubr.msk.f32.mxu0 %vm626_vm4, %v618_v11 }
 0x100   :  { %v1003_v37 = vpop.permute.xlu1 %1002  ;;  %v528_v38 = vpop.permute.xlu0 %527 }
 0x101   :  { %v619_v46 = vsel %vm597_vm3, %v590_v55, %v528_v38  ;;  %v1185_v47 = vsel %vm58_vm0, %v5213_v17, %v1003_v37  ;;  %v232_v55 = vld [vmem:[#allocation2 + $0x1b7] ss:$2 sm:$0xff] }
 0x102   :  { %4359 = vmatmul.mubr.msk.f32.gmra.mrb[20].mxu0 %vm626_vm4, %v619_v46 }
 0x104   :  { %v1115_v49 = vpop.permute.xlu1 %1114  ;;  %v1113_v58 = vpop.permute.xlu0 %1112 }
 0x105   :  { %v1213_v44 = vsel %vm597_vm3, %v1185_v47, %v1115_v49  ;;  %v1212_v50 = vsel %vm597_vm3, %v1184_v48, %v1113_v58 }
 0x106   :  { %4390 = vmatprep.mubr.msk.f32.mxu1 %vm626_vm4, %v1212_v50 }
 0x107   :  { %4391 = vmatmul.mubr.msk.f32.gmra.mrb[10].mxu1 %vm626_vm4, %v1213_v44 }
 0x108   :  { %v420_v52 = vpop.permute.xlu1 %419  ;;  %v418_v35 = vpop.permute.xlu0 %417 }
 0x109   :  { %v591_v22 = vsel %vm58_vm0, %v222_v53, %v418_v35  ;;  %v592_v60 = vsel %vm58_vm0, %v224_v59, %v420_v52 }
 0x10c   :  { %v1005_v45 = vpop.permute.xlu1 %1004  ;;  %v530_v18 = vpop.permute.xlu0 %529 }
 0x10d   :  { %v620_v17 = vsel %vm597_vm3, %v591_v22, %v530_v18  ;;  %v1186_v40 = vsel %vm58_vm0, %v5237_v24, %v1005_v45  ;;  %v4784_v22 = vld [vmem:[#allocation2 + $0x8] ss:$2 sm:$0xff] }
 0x10e   :  { %4361 = vmatprep.mubr.msk.f32.mxu0 %vm626_vm4, %v620_v17 }
 0x110   :  { %v1007_v43 = vpop.permute.xlu1 %1006  ;;  %v532_v61 = vpop.permute.xlu0 %531 }
 0x111   :  { %v621_v0 = vsel %vm597_vm3, %v592_v60, %v532_v61  ;;  %v1187_v1 = vsel %vm58_vm0, %v5235_v23, %v1007_v43 }
 0x112   :  { %4362 = vmatmul.mubr.msk.f32.gmra.mrb[22].mxu0 %vm626_vm4, %v621_v0 }
 0x114   :  { %v1119_v63 = vpop.permute.xlu1 %1118  ;;  %v1117_v3 = vpop.permute.xlu0 %1116 }
 0x115   :  { %v1215_v28 = vsel %vm597_vm3, %v1187_v1, %v1119_v63  ;;  %v1214_v26 = vsel %vm597_vm3, %v1186_v40, %v1117_v3 }
 0x116   :  { %4393 = vmatprep.mubr.msk.f32.mxu1 %vm626_vm4, %v1214_v26 }
 0x117   :  { %4394 = vmatmul.mubr.msk.f32.gmra.mrb[12].mxu1 %vm626_vm4, %v1215_v28 }
 0x118   :  { %v424_v10 = vpop.permute.xlu1 %423  ;;  %v422_v4 = vpop.permute.xlu0 %421 }
 0x119   :  { %v593_v14 = vsel %vm58_vm0, %v226_v25, %v422_v4  ;;  %v594_v8 = vsel %vm58_vm0, %v228_v7, %v424_v10 }
 0x11c   :  { %v1009_v6 = vpop.permute.xlu1 %1008  ;;  %v534_v24 = vpop.permute.xlu0 %533 }
 0x11d   :  { %v622_v23 = vsel %vm597_vm3, %v593_v14, %v534_v24  ;;  %v1188_v51 = vsel %vm58_vm0, %v5259_v34, %v1009_v6 }
 0x11e   :  { %4364 = vmatprep.mubr.msk.f32.mxu0 %vm626_vm4, %v622_v23 }
 0x120   :  { %v1011_v62 = vpop.permute.xlu1 %1010  ;;  %v536_v31 = vpop.permute.xlu0 %535 }
 0x121   :  { %v623_v30 = vsel %vm597_vm3, %v594_v8, %v536_v31  ;;  %v1189_v5 = vsel %vm58_vm0, %v5257_v33, %v1011_v62 }
 0x122   :  { %4365 = vmatmul.mubr.msk.f32.gmra.mrb[24].mxu0 %vm626_vm4, %v623_v30 }
 0x124   :  { %v1123_v15 = vpop.permute.xlu1 %1122  ;;  %v1121_v16 = vpop.permute.xlu0 %1120 }
 0x125   :  { %v1217_v19 = vsel %vm597_vm3, %v1189_v5, %v1123_v15  ;;  %v1216_v21 = vsel %vm597_vm3, %v1188_v51, %v1121_v16 }
 0x126   :  { %4396 = vmatprep.mubr.msk.f32.mxu1 %vm626_vm4, %v1216_v21 }
 0x127   :  { %4397 = vmatmul.mubr.msk.f32.gmra.mrb[14].mxu1 %vm626_vm4, %v1217_v19 }
 0x128   :  { %v428_v56 = vpop.permute.xlu1 %427  ;;  %v426_v32 = vpop.permute.xlu0 %425 }
 0x129   :  { %v595_v42 = vsel %vm58_vm0, %v230_v12, %v426_v32  ;;  %v596_v37 = vsel %vm58_vm0, %v232_v55, %v428_v56 }
 0x12c   :  { %v1013_v11 = vpop.permute.xlu1 %1012  ;;  %v538_v34 = vpop.permute.xlu0 %537 }
 0x12d   :  { %v624_v33 = vsel %vm597_vm3, %v595_v42, %v538_v34  ;;  %v1190_v47 = vsel %vm58_vm0, %v5279_v41, %v1013_v11 }
 0x12e   :  { %4367 = vmatprep.mubr.msk.f32.mxu0 %vm626_vm4, %v624_v33 }
 0x130   :  { %v1015_v38 = vpop.permute.xlu1 %1014  ;;  %v540_v46 = vpop.permute.xlu0 %539 }
 0x131   :  { %v625_v48 = vsel %vm597_vm3, %v596_v37, %v540_v46  ;;  %v1191_v49 = vsel %vm58_vm0, %v5277_v39, %v1015_v38  ;;  %v4785_v39 = vld [vmem:[#allocation2 + $0x18] ss:$2 sm:$0xff] }
 0x132   :  { %4368 = vmatmul.mubr.msk.f32.gmra.mrb[26].mxu0 %vm626_vm4, %v625_v48  ;;  %v5657_v38 = vld [vmem:[%s6885_s2] ss:$0 sm:$0xff]  ;;  %s4813_s2 = smov 8  }
 0x134   :  { %v1127_v58 = vpop.permute.xlu1 %1126  ;;  %v1125_v44 = vpop.permute.xlu0 %1124 }
 0x135   :  { %v1219_v50 = vsel %vm597_vm3, %v1191_v49, %v1127_v58  ;;  %v1218_v52 = vsel %vm597_vm3, %v1190_v47, %v1125_v44 }
 0x136   :  { %4399 = vmatprep.mubr.msk.f32.mxu1 %vm626_vm4, %v1218_v52 }
 0x137   :  { %4400 = vmatmul.mubr.msk.f32.gmra.mrb[16].mxu1 %vm626_vm4, %v1219_v50 }
 0x138   :  { %v979_v35 = vpop.permute.xlu1 %978  ;;  %v977_v53 = vpop.permute.xlu0 %976 }
 0x139   :  { %v1172_v45 = vsel %vm58_vm0, %v4784_v22, %v977_v53  ;;  %v1173_v17 = vsel %vm58_vm0, %v4785_v39, %v979_v35 }
 0x13c   :  { %v1089_v18 = vpop.permute.xlu1 %1088  ;;  %v1017_v41 = vpop.permute.xlu0 %1016 }
 0x13d   :  { %v1200_v59 = vsel %vm597_vm3, %v1172_v45, %v1089_v18  ;;  %v1192_v0 = vsel %vm58_vm0, %v5302_v57, %v1017_v41 }
 0x13e   :  { %4372 = vmatprep.mubr.msk.f32.mxu0 %vm626_vm4, %v1200_v59 }
 0x140   :  { %v1091_v60 = vpop.permute.xlu1 %1090  ;;  %v1019_v43 = vpop.permute.xlu0 %1018 }
 0x141   :  { %v1201_v61 = vsel %vm597_vm3, %v1173_v17, %v1091_v60  ;;  %v1193_v40 = vsel %vm58_vm0, %v5300_v54, %v1019_v43 }
 0x142   :  { %4373 = vmatmul.mubr.msk.f32.vlgmr.msra.gmra.mrb[28].mxu0 %vm626_vm4, %v1201_v61 }
 0x144   :  { %v1129_v1 = vpop.permute.xlu0 %1128 }
 0x145   :  { %v1220_v63 = vsel %vm597_vm3, %v1192_v0, %v1129_v1  ;;  %v1131_v3 = vpop.permute.xlu1 %1130 }
 0x146   :  { %v1221_v28 = vsel %vm597_vm3, %v1193_v40, %v1131_v3  ;;  %4402 = vmatprep.mubr.msk.f32.mxu1 %vm626_vm4, %v1220_v63 }
 0x147   :  { %4403 = vmatmul.mubr.msk.f32.gmra.mrb[18].mxu1 %vm626_vm4, %v1221_v28 }
 0x148   :  { %v1021_v26 = vpop.permute.xlu0 %1020 }
 0x149   :  { %v1023_v10 = vpop.permute.xlu1 %1022  ;;  %v1194_v57 = vsel %vm58_vm0, %v5335_v20, %v1021_v26 }
 0x14a   :  { %v1195_v4 = vsel %vm58_vm0, %v5333_v29, %v1023_v10 }
 0x14c   :  { %v1133_v25 = vpop.permute.xlu0 %1132 }
 0x14d   :  { %v1222_v54 = vsel %vm597_vm3, %v1194_v57, %v1133_v25  ;;  %v1135_v14 = vpop.permute.xlu1 %1134 }
 0x14e   :  { %v1223_v6 = vsel %vm597_vm3, %v1195_v4, %v1135_v14  ;;  %4405 = vmatprep.mubr.msk.f32.mxu1 %vm626_vm4, %v1222_v54 }
 0x14f   :  { %4406 = vmatmul.mubr.msk.f32.gmra.mrb[20].mxu1 %vm626_vm4, %v1223_v6 }
 0x150   :  { %v1025_v24 = vpop.permute.xlu0 %1024 }
 0x151   :  { %v1027_v7 = vpop.permute.xlu1 %1026  ;;  %v1196_v23 = vsel %vm58_vm0, %v5369_v27, %v1025_v24 }
 0x152   :  { %v1197_v20 = vsel %vm58_vm0, %v5367_v13, %v1027_v7 }
 0x154   :  { %v1137_v8 = vpop.permute.xlu0 %1136 }
 0x155   :  { %v1224_v29 = vsel %vm597_vm3, %v1196_v23, %v1137_v8  ;;  %v1139_v62 = vpop.permute.xlu1 %1138 }
 0x156   :  { %v1225_v31 = vsel %vm597_vm3, %v1197_v20, %v1139_v62  ;;  %4408 = vmatprep.mubr.msk.f32.mxu1 %vm626_vm4, %v1224_v29 }
 0x157   :  { %4409 = vmatmul.mubr.msk.f32.gmra.mrb[22].mxu1 %vm626_vm4, %v1225_v31 }
 0x158   :  { %v1029_v30 = vpop.permute.xlu0 %1028 }
 0x159   :  { %v1031_v51 = vpop.permute.xlu1 %1030  ;;  %v1198_v5 = vsel %vm58_vm0, %v5403_v2, %v1029_v30 }
 0x15a   :  { %v5636_v15 = vpop.f32.mrb[0].mxu0  ;;  %v1199_v13 = vsel %vm58_vm0, %v5401_v36, %v1031_v51  ;;  %vm3983_vm0 = vcmask 76800  }
 0x15b   :  { %v5640_v27 = vpop.f32.mrb[1].mxu0 }
 0x15c   :  { %v1141_v16 = vpop.permute.xlu0 %1140 }
 0x15d   :  { %v1226_v19 = vsel %vm597_vm3, %v1198_v5, %v1141_v16  ;;  %v1143_v21 = vpop.permute.xlu1 %1142 }
 0x15e   :  { %v1227_v56 = vsel %vm597_vm3, %v1199_v13, %v1143_v21  ;;  %4411 = vmatprep.mubr.msk.f32.mxu1 %vm626_vm4, %v1226_v19 }
 0x15f   :  { %4412 = vmatmul.mubr.msk.f32.gmra.mrb[24].mxu1 %vm626_vm4, %v1227_v56 }
 0x163   :  { %v4333_v32 = vpop.f32.mrb[2].mxu0 }
 0x164   :  { %v791_v12 = vpop.f32.mrb[3].mxu0 }
 0x16b   :  { %v4336_v2 = vpop.f32.mrb[4].mxu0 }
 0x16c   :  { %v801_v42 = vpop.f32.mrb[5].mxu0 }
 0x173   :  { %v4339_v11 = vpop.f32.mrb[6].mxu0 }
 0x174   :  { %v811_v34 = vpop.f32.mrb[7].mxu0 }
 0x17b   :  { %v5646_v55 = vpop.f32.mrb[8].mxu0 }
 0x17c   :  { %v5648_v36 = vpop.f32.mrb[9].mxu0 }
 0x186   :  { %v5650_v33 = vpop.f32.mrb[10].mxu0 }
 0x187   :  { %v5652_v37 = vpop.f32.mrb[11].mxu0 }
 0x18b   :  { %v4377_v46 = vpop.f32.mrb[0].mxu1 }
 0x18c   :  { %v1520_v48 = vmax.f32 %v4333_v32, %v4377_v46  ;;  %v1388_v47 = vpop.f32.mrb[1].mxu1 }
 0x18d   :  { %v1519_v49 = vmax.f32 %v791_v12, %v1388_v47 }
 0x18e   :  { %v1554_v58 = vadd.f32 %v5657_v38, %v1520_v48 }
 0x18f   :  { %v1553_v44 = vadd.f32 %v5657_v38, %v1519_v49 }
 0x190   :  { %v1582_v50 = vmax.f32 %v1554_v58, 0.0 }
 0x191   :  { %v1581_v52 = vmax.f32 %v1553_v44, 0.0 }
 0x192   :  { %1612 = vst.msk [vmem:[#allocation3 + $0x20] sm:$0xff] %vm1607_vm5, %v1582_v50 }
 0x193   :  { %1611 = vst.msk [vmem:[#allocation3 + $0x18] sm:$0xff] %vm1607_vm5, %v1581_v52 }
 0x196   :  { %v5663_v35 = vpop.f32.mrb[12].mxu0 }
 0x197   :  { %v5665_v53 = vpop.f32.mrb[13].mxu0 }
 0x19b   :  { %v4380_v22 = vpop.f32.mrb[2].mxu1 }
 0x19c   :  { %v1522_v45 = vmax.f32 %v4336_v2, %v4380_v22  ;;  %v1398_v18 = vpop.f32.mrb[3].mxu1 }
 0x19d   :  { %v1521_v41 = vmax.f32 %v801_v42, %v1398_v18 }
 0x19e   :  { %v1556_v59 = vadd.f32 %v5657_v38, %v1522_v45 }
 0x19f   :  { %v1555_v39 = vadd.f32 %v5657_v38, %v1521_v41 }
 0x1a0   :  { %v1584_v17 = vmax.f32 %v1556_v59, 0.0 }
 0x1a1   :  { %v1583_v60 = vmax.f32 %v1555_v39, 0.0 }
 0x1a2   :  { %1614 = vst.msk [vmem:[#allocation3 + $0x30] sm:$0xff] %vm1607_vm5, %v1584_v17 }
 0x1a3   :  { %1613 = vst.msk [vmem:[#allocation3 + $0x28] sm:$0xff] %vm1607_vm5, %v1583_v60 }
 0x1a5   :  { %v5699_v43 = vpop.f32.mrb[14].mxu0 }
 0x1a6   :  { %v5701_v61 = vpop.f32.mrb[15].mxu0 }
 0x1a9   :  { %v5703_v0 = vld [vmem:[#allocation3 + $0x30] ss:$5 sm:$0xff]  ;;  %v5708_v26 = vld [vmem:[#allocation3 + $0x31] ss:$5 sm:$0xff] }
 0x1aa   :  { %1714 = vrot.lane.b32.xlu1 %v5703_v0, %s4813_s2  ;;  %v4383_v40 = vpop.f32.mrb[4].mxu1  ;;  %v5717_v25 = vld [vmem:[#allocation3 + $0x32] ss:$5 sm:$0xff] }
 0x1ab   :  { %v1524_v1 = vmax.f32 %v4339_v11, %v4383_v40  ;;  %v1408_v63 = vpop.f32.mrb[5].mxu1 }
 0x1ac   :  { %v1523_v3 = vmax.f32 %v811_v34, %v1408_v63 }
 0x1ad   :  { %v1558_v28 = vadd.f32 %v5657_v38, %v1524_v1 }
 0x1ae   :  { %v1557_v10 = vadd.f32 %v5657_v38, %v1523_v3  ;;  %1746 = vrot.lane.b32.xlu1 %v5708_v26, %s4814_s25 }
 0x1af   :  { %v1586_v57 = vmax.f32 %v1558_v28, 0.0 }
 0x1b0   :  { %v1585_v4 = vmax.f32 %v1557_v10, 0.0 }
 0x1b1   :  { %1622 = vst.msk [vmem:[#allocation3 + $0x58] sm:$0xff] %vm1607_vm5, %v1586_v57 }
 0x1b2   :  { %1616 = vst.msk [vmem:[#allocation3 + $0x38] sm:$0x3] %vm1615_vm8, %v1585_v4  ;;  %1933 = vrot.lane.b32.xlu1 %v5708_v26, %s4813_s2 }
 0x1b5   :  { %v5719_v54 = vpop.f32.mrb[16].mxu0 }
 0x1b6   :  { %1965 = vrot.lane.b32.xlu1 %v5717_v25, %s4814_s25  ;;  %v5723_v14 = vpop.f32.mrb[17].mxu0 }
 0x1b8   :  { %v2593_v6 = vld [vmem:[#allocation3 + $0x35] ss:$5 sm:$0xff] }
 0x1b9   :  { %2640 = vrot.lane.b32.xlu0 %v2593_v6, %s4814_s25  ;;  %v5730_v8 = vld [vmem:[#allocation3 + $0x33] ss:$5 sm:$0xff]  ;;  %v2368_v51 = vld [vmem:[#allocation3 + $0x34] ss:$5 sm:$0xff] }
 0x1ba   :  { %2158 = vrot.lane.b32.xlu1 %v5717_v25, %s4813_s2  ;;  %v4386_v24 = vpop.f32.mrb[6].mxu1  ;;  %6912 = vst [vmem:[#allocation9_spill] sm:$0xff] %v5730_v8 }
 0x1bb   :  { %v1526_v7 = vmax.f32 %v5646_v55, %v4386_v24  ;;  %v1418_v23 = vpop.f32.mrb[7].mxu1 }
 0x1bc   :  { %v1525_v20 = vmax.f32 %v5648_v36, %v1418_v23 }
 0x1bd   :  { %v1560_v29 = vadd.f32 %v5657_v38, %v1526_v7  ;;  %2190 = vrot.lane.b32.xlu0 %v5730_v8, %s4814_s25 }
 0x1be   :  { %v1559_v62 = vadd.f32 %v5657_v38, %v1525_v20  ;;  %2383 = vrot.lane.b32.xlu1 %v5730_v8, %s4813_s2 }
 0x1bf   :  { %v1588_v31 = vmax.f32 %v1560_v29, 0.0 }
 0x1c0   :  { %v1587_v30 = vmax.f32 %v1559_v62, 0.0 }
 0x1c1   :  { %1624 = vst.msk [vmem:[#allocation3 + $0x68] sm:$0xff] %vm1607_vm5, %v1588_v31 }
 0x1c2   :  { %1623 = vst.msk [vmem:[#allocation3 + $0x60] sm:$0xff] %vm1607_vm5, %v1587_v30  ;;  %2415 = vrot.lane.b32.xlu1 %v2368_v51, %s4814_s25 }
 0x1c5   :  { %v5741_v5 = vpop.f32.mrb[18].mxu0 }
 0x1c6   :  { %2608 = vrot.lane.b32.xlu1 %v2368_v51, %s4813_s2  ;;  %v5744_v13 = vpop.f32.mrb[19].mxu0 }
 0x1ca   :  { %v4389_v16 = vpop.f32.mrb[8].mxu1 }
 0x1cb   :  { %v1528_v19 = vmax.f32 %v5650_v33, %v4389_v16  ;;  %v1428_v21 = vpop.f32.mrb[9].mxu1 }
 0x1cc   :  { %v1527_v56 = vmax.f32 %v5652_v37, %v1428_v21 }
 0x1cd   :  { %v1562_v32 = vadd.f32 %v5657_v38, %v1528_v19 }
 0x1ce   :  { %v1561_v12 = vadd.f32 %v5657_v38, %v1527_v56 }
 0x1cf   :  { %v1590_v2 = vmax.f32 %v1562_v32, 0.0 }
 0x1d0   :  { %v1589_v42 = vmax.f32 %v1561_v12, 0.0 }
 0x1d1   :  { %1626 = vst.msk [vmem:[#allocation3 + $0x78] sm:$0xff] %vm1607_vm5, %v1590_v2 }
 0x1d2   :  { %1625 = vst.msk [vmem:[#allocation3 + $0x70] sm:$0xff] %vm1607_vm5, %v1589_v42 }
 0x1d5   :  { %v5752_v11 = vpop.f32.mrb[20].mxu0 }
 0x1d6   :  { %v5754_v34 = vpop.f32.mrb[21].mxu0 }
 0x1d9   :  { %v5756_v55 = vld [vmem:[#allocation3 + $0x59] ss:$5 sm:$0xff]  ;;  %v5758_v36 = vld [vmem:[#allocation3 + $0x58] ss:$5 sm:$0xff] }
 0x1da   :  { %v4392_v33 = vpop.f32.mrb[10].mxu1  ;;  %1935 = vrot.lane.b32.xlu1 %v5756_v55, %s4813_s2  ;;  %1716 = vrot.lane.b32.xlu0 %v5758_v36, %s4813_s2  ;;  %v5767_v49 = vld [vmem:[#allocation3 + $0x5b] ss:$5 sm:$0xff]  ;;  %v5775_v52 = vld [vmem:[#allocation3 + $0x5a] ss:$5 sm:$0xff] }
 0x1db   :  { %v1530_v37 = vmax.f32 %v5663_v35, %v4392_v33  ;;  %v1438_v46 = vpop.f32.mrb[11].mxu1  ;;  %6913 = vst [vmem:[#allocation10_spill] sm:$0xff] %v5767_v49  ;;  %v2370_v17 = vld [vmem:[#allocation3 + $0x5c] ss:$5 sm:$0xff] }
 0x1dc   :  { %v1529_v48 = vmax.f32 %v5665_v53, %v1438_v46 }
 0x1dd   :  { %v1564_v47 = vadd.f32 %v5657_v38, %v1530_v37 }
 0x1de   :  { %v1563_v58 = vadd.f32 %v5657_v38, %v1529_v48  ;;  %2385 = vrot.lane.b32.xlu1 %v5767_v49, %s4813_s2  ;;  %1748 = vrot.lane.b32.xlu0 %v5756_v55, %s4814_s25 }
 0x1df   :  { %v1592_v44 = vmax.f32 %v1564_v47, 0.0 }
 0x1e0   :  { %v1591_v50 = vmax.f32 %v1563_v58, 0.0 }
 0x1e1   :  { %1628 = vst.msk [vmem:[#allocation3 + $0x88] sm:$0x3] %vm1615_vm8, %v1592_v44 }
 0x1e2   :  { %1627 = vst.msk [vmem:[#allocation3 + $0x80] sm:$0xff] %vm1607_vm5, %v1591_v50  ;;  %1967 = vrot.lane.b32.xlu0 %v5775_v52, %s4814_s25 }
 0x1e5   :  { %v5780_v35 = vpop.f32.mrb[22].mxu0 }
 0x1e6   :  { %2160 = vrot.lane.b32.xlu0 %v5775_v52, %s4813_s2  ;;  %v5784_v53 = vpop.f32.mrb[23].mxu0 }
 0x1e9   :  { %v5786_v22 = vld [vmem:[#allocation3 + $0x80] ss:$5 sm:$0xff]  ;;  %v5795_v60 = vld [vmem:[#allocation3 + $0x81] ss:$5 sm:$0xff] }
 0x1ea   :  { %v4395_v45 = vpop.f32.mrb[12].mxu1  ;;  %2192 = vrot.lane.b32.xlu0 %v5767_v49, %s4814_s25  ;;  %1718 = vrot.lane.b32.xlu1 %v5786_v22, %s4813_s2  ;;  %v5810_v3 = vld [vmem:[#allocation3 + $0x82] ss:$5 sm:$0xff] }
 0x1eb   :  { %v1532_v18 = vmax.f32 %v5699_v43, %v4395_v45  ;;  %v1448_v41 = vpop.f32.mrb[13].mxu1  ;;  %v2595_v10 = vld [vmem:[#allocation3 + $0x5d] ss:$5 sm:$0xff] }
 0x1ec   :  { %v1531_v59 = vmax.f32 %v5701_v61, %v1448_v41  ;;  %v5808_v61 = vld [vmem:[#allocation3 + $0x83] ss:$5 sm:$0xff]  ;;  %v2372_v31 = vld [vmem:[#allocation3 + $0x84] ss:$5 sm:$0xff] }
 0x1ed   :  { %v1566_v39 = vadd.f32 %v5657_v38, %v1532_v18  ;;  %6914 = vst [vmem:[#allocation11_spill] sm:$0xff] %v5808_v61 }
 0x1ee   :  { %v1565_v40 = vadd.f32 %v5657_v38, %v1531_v59  ;;  %2417 = vrot.lane.b32.xlu0 %v2370_v17, %s4814_s25  ;;  %1750 = vrot.lane.b32.xlu1 %v5795_v60, %s4814_s25 }
 0x1ef   :  { %v1594_v1 = vmax.f32 %v1566_v39, 0.0 }
 0x1f0   :  { %v1593_v63 = vmax.f32 %v1565_v40, 0.0 }
 0x1f1   :  { %1634 = vst.msk [vmem:[#allocation3 + $0xb0] sm:$0xff] %vm1607_vm5, %v1594_v1 }
 0x1f2   :  { %1633 = vst.msk [vmem:[#allocation3 + $0xa8] sm:$0xff] %vm1607_vm5, %v1593_v63  ;;  %2610 = vrot.lane.b32.xlu0 %v2370_v17, %s4813_s2  ;;  %1937 = vrot.lane.b32.xlu1 %v5795_v60, %s4813_s2 }
 0x1f5   :  { %v5806_v43 = vpop.f32.mrb[24].mxu0 }
 0x1f6   :  { %2194 = vrot.lane.b32.xlu0 %v5808_v61, %s4814_s25  ;;  %1969 = vrot.lane.b32.xlu1 %v5810_v3, %s4814_s25  ;;  %v5816_v28 = vpop.f32.mrb[25].mxu0 }
 0x1f9   :  { %v2597_v23 = vld [vmem:[#allocation3 + $0x85] ss:$5 sm:$0xff] }
 0x1fa   :  { %v4398_v57 = vpop.f32.mrb[14].mxu1  ;;  %2642 = vrot.lane.b32.xlu0 %v2595_v10, %s4814_s25  ;;  %2162 = vrot.lane.b32.xlu1 %v5810_v3, %s4813_s2 }
 0x1fb   :  { %v1534_v4 = vmax.f32 %v5719_v54, %v4398_v57  ;;  %v1458_v6 = vpop.f32.mrb[15].mxu1 }
 0x1fc   :  { %v1533_v24 = vmax.f32 %v5723_v14, %v1458_v6 }
 0x1fd   :  { %v1568_v7 = vadd.f32 %v5657_v38, %v1534_v4 }
 0x1fe   :  { %v1567_v20 = vadd.f32 %v5657_v38, %v1533_v24  ;;  %2387 = vrot.lane.b32.xlu1 %v5808_v61, %s4813_s2  ;;  %2644 = vrot.lane.b32.xlu0 %v2597_v23, %s4814_s25 }
 0x1ff   :  { %v1596_v29 = vmax.f32 %v1568_v7, 0.0 }
 0x200   :  { %v1595_v62 = vmax.f32 %v1567_v20, 0.0 }
 0x201   :  { %1636 = vst.msk [vmem:[#allocation3 + $0xc0] sm:$0xff] %vm1607_vm5, %v1596_v29 }
 0x202   :  { %1635 = vst.msk [vmem:[#allocation3 + $0xb8] sm:$0xff] %vm1607_vm5, %v1595_v62  ;;  %2419 = vrot.lane.b32.xlu1 %v2372_v31, %s4814_s25 }
 0x205   :  { %v5831_v54 = vpop.f32.mrb[26].mxu0 }
 0x206   :  { %2612 = vrot.lane.b32.xlu1 %v2372_v31, %s4813_s2  ;;  %v5834_v14 = vpop.f32.mrb[27].mxu0 }
 0x20a   :  { %v4401_v30 = vpop.f32.mrb[16].mxu1 }
 0x20b   :  { %v1536_v51 = vmax.f32 %v5741_v5, %v4401_v30  ;;  %v1468_v16 = vpop.f32.mrb[17].mxu1 }
 0x20c   :  { %v1535_v19 = vmax.f32 %v5744_v13, %v1468_v16 }
 0x20d   :  { %v1570_v21 = vadd.f32 %v5657_v38, %v1536_v51 }
 0x20e   :  { %v1569_v56 = vadd.f32 %v5657_v38, %v1535_v19 }
 0x20f   :  { %v1598_v32 = vmax.f32 %v1570_v21, 0.0 }
 0x210   :  { %v1597_v12 = vmax.f32 %v1569_v56, 0.0 }
 0x211   :  { %1638 = vst.msk [vmem:[#allocation3 + $0xd0] sm:$0xff] %vm1607_vm5, %v1598_v32 }
 0x212   :  { %1637 = vst.msk [vmem:[#allocation3 + $0xc8] sm:$0xff] %vm1607_vm5, %v1597_v12 }
 0x215   :  { %v4374_v2 = vpop.f32.mrb[28].mxu0 }
 0x216   :  { %v1518_v42 = vmax.f32 %v5636_v15, %v4374_v2  ;;  %v1378_v33 = vpop.f32.mrb[29].mxu0 }
 0x217   :  { %v1517_v37 = vmax.f32 %v5640_v27, %v1378_v33 }
 0x218   :  { %v1552_v5 = vadd.f32 %v5657_v38, %v1518_v42  ;;  %v5845_v46 = vld [vmem:[#allocation3 + $0xd0] ss:$5 sm:$0xff]  ;;  %v5857_v45 = vld [vmem:[#allocation3 + $0xd1] ss:$5 sm:$0xff] }
 0x219   :  { %v1551_v13 = vadd.f32 %v5657_v38, %v1517_v37  ;;  %1722 = vrot.lane.b32.xlu1 %v5845_v46, %s4813_s2  ;;  %v5850_v48 = vld [vmem:[#allocation3 + $0xa8] ss:$5 sm:$0xff]  ;;  %v5863_v41 = vld [vmem:[#allocation3 + $0xa9] ss:$5 sm:$0xff] }
 0x21a   :  { %v1580_v47 = vmax.f32 %v1552_v5, 0.0  ;;  %v4404_v58 = vpop.f32.mrb[18].mxu1  ;;  %1720 = vrot.lane.b32.xlu0 %v5850_v48, %s4813_s2  ;;  %v5880_v57 = vld [vmem:[#allocation3 + $0xd2] ss:$5 sm:$0xff]  ;;  %v2374_v19 = vld [vmem:[#allocation3 + $0xac] ss:$5 sm:$0xff] }
 0x21b   :  { %v1579_v15 = vmax.f32 %v1551_v13, 0.0  ;;  %v1538_v44 = vmax.f32 %v5752_v11, %v4404_v58  ;;  %v1478_v27 = vpop.f32.mrb[19].mxu1  ;;  %6916 = vst [vmem:[#allocation13_spill] sm:$0xff] %v5880_v57  ;;  %v5897_v23 = vld [vmem:[#allocation3 + $0xab] ss:$5 sm:$0xff] }
 0x21c   :  { %1610 = vst.msk [vmem:[#allocation3 + $0x10] sm:$0xff] %vm1607_vm5, %v1580_v47  ;;  %v1537_v50 = vmax.f32 %v5754_v34, %v1478_v27  ;;  %v5871_v34 = vld [vmem:[#allocation3 + $0xaa] ss:$5 sm:$0xff]  ;;  %v5877_v63 = vpop.permute.xlu1 %1714 }
 0x21d   :  { %1609 = vst.msk [vmem:[#allocation3 + $0x8] sm:$0xff] %vm1607_vm5, %v1579_v15  ;;  %v1572_v18 = vadd.f32 %v5657_v38, %v1538_v44  ;;  %1754 = vrot.lane.b32.xlu1 %v5857_v45, %s4814_s25  ;;  %6915 = vst [vmem:[#allocation12_spill] sm:$0xff] %v5871_v34  ;;  %v2599_v5 = vld [vmem:[#allocation3 + $0xad] ss:$5 sm:$0xff] }
 0x21e   :  { %v1571_v59 = vadd.f32 %v5657_v38, %v1537_v50  ;;  %1752 = vrot.lane.b32.xlu0 %v5863_v41, %s4814_s25 }
 0x21f   :  { %v1600_v11 = vmax.f32 %v1572_v18, 0.0  ;;  %v5957_v18 = vld [vmem:[%s6886_s3 + $0x10] sm:$0xff] }
 0x220   :  { %v1599_v39 = vmax.f32 %v1571_v59, 0.0  ;;  %v5901_v29 = vpop.permute.xlu1 %1746 }
 0x221   :  { %1644 = vst.msk [vmem:[#allocation3 + $0xf8] sm:$0xff] %vm1607_vm5, %v1600_v11  ;;  %1941 = vrot.lane.b32.xlu1 %v5857_v45, %s4813_s2 }
 0x222   :  { %1639 = vst.msk [vmem:[#allocation3 + $0xd8] sm:$0x3] %vm1615_vm8, %v1599_v39  ;;  %v4407_v17 = vpop.f32.mrb[20].mxu1  ;;  %1971 = vrot.lane.b32.xlu0 %v5871_v34, %s4814_s25 }
 0x223   :  { %v1540_v40 = vmax.f32 %v5780_v35, %v4407_v17  ;;  %v1488_v1 = vpop.f32.mrb[21].mxu1  ;;  %v47_v35 = vld [vmem:[%s6886_s3] sm:$0xff] }
 0x224   :  { %v1539_v10 = vmax.f32 %v5784_v53, %v1488_v1  ;;  %v48_v53 = vld [vmem:[%s6886_s3 + $0x8] sm:$0xff]  ;;  %v5917_v56 = vpop.permute.xlu1 %1933 }
 0x225   :  { %v1574_v4 = vadd.f32 %v5657_v38, %v1540_v40  ;;  %1973 = vrot.lane.b32.xlu1 %v5880_v57, %s4814_s25  ;;  %v5899_v20 = vpack.c.bf16 %v48_v53, %v47_v35  ;;  %v6005_v35 = vld [vmem:[#allocation3 + $0x8] ss:$5 sm:$0xff] }
 0x226   :  { %v1573_v6 = vadd.f32 %v5657_v38, %v1539_v10  ;;  %2164 = vrot.lane.b32.xlu0 %v5871_v34, %s4813_s2 }
 0x227   :  { %v1602_v24 = vmax.f32 %v1574_v4, 0.0  ;;  %4599 = vmatprep.subr.bf16.mxu1 %v5899_v20  ;;  %4595 = vmatprep.subr.bf16.mxu0 %v5899_v20 }
 0x228   :  { %v1601_v7 = vmax.f32 %v1573_v6, 0.0  ;;  %4601 = vmatpush3.bf16.msra.mxu1 %v5899_v20  ;;  %4597 = vmatpush3.bf16.msra.mxu0 %v5899_v20  ;;  %v5931_v13 = vpop.permute.xlu1 %1965 }
 0x229   :  { %1646 = vst.msk [vmem:[#allocation3 + $0x108] sm:$0xff] %vm1607_vm5, %v1602_v24  ;;  %2166 = vrot.lane.b32.xlu1 %v5880_v57, %s4813_s2  ;;  %v5926_v33 = vld [vmem:[#allocation3 + $0xd3] ss:$5 sm:$0xff]  ;;  %4436 = vmatprep.subr.mxu1 %v5957_v18 }
 0x22a   :  { %1645 = vst.msk [vmem:[#allocation3 + $0x100] sm:$0xff] %vm1607_vm5, %v1601_v7  ;;  %v4410_v62 = vpop.f32.mrb[22].mxu1  ;;  %2196 = vrot.lane.b32.xlu0 %v5897_v23, %s4814_s25  ;;  %6917 = vst [vmem:[#allocation14_spill] sm:$0xff] %v5926_v33  ;;  %4418 = vmatprep.subr.mxu0 %v5957_v18 }
 0x22b   :  { %v1542_v31 = vmax.f32 %v5806_v43, %v4410_v62  ;;  %v1498_v30 = vpop.f32.mrb[23].mxu1  ;;  %v5971_v11 = vpop.permute.xlu0 %2640 }
 0x22c   :  { %v1541_v51 = vmax.f32 %v5816_v28, %v1498_v30  ;;  %v5939_v44 = vpop.permute.xlu1 %2158  ;;  %4437 = vmatpush3.msra.mxu1 %v5957_v18  ;;  %4419 = vmatpush3.msra.mxu0 %v5957_v18  ;;  %6920 = vst [vmem:[#allocation17_spill] sm:$0xff] %v5971_v11 }
 0x22d   :  { %v1576_v16 = vadd.f32 %v5657_v38, %v1542_v31  ;;  %1939 = vrot.lane.b32.xlu1 %v5863_v41, %s4813_s2  ;;  %4603 = vmatprep.subr.bf16.mxu0 %v5899_v20  ;;  %v6015_v31 = vld [vmem:[#allocation3 + $0x9] ss:$5 sm:$0xff] }
 0x22e   :  { %v1575_v21 = vadd.f32 %v5657_v38, %v1541_v51  ;;  %2421 = vrot.lane.b32.xlu0 %v2374_v19, %s4814_s25  ;;  %4607 = vmatprep.subr.bf16.mxu1 %v5899_v20 }
 0x22f   :  { %v1604_v43 = vmax.f32 %v1576_v16, 0.0  ;;  %v5987_v10 = vpop.permute.xlu0 %2190 }
 0x230   :  { %v1603_v32 = vmax.f32 %v1575_v21, 0.0  ;;  %v5950_v50 = vpop.permute.xlu1 %2383  ;;  %v6033_v21 = vld [vmem:[#allocation3 + $0xa] ss:$5 sm:$0xff] }
 0x231   :  { %1648 = vst.msk [vmem:[#allocation3 + $0x118] sm:$0xff] %vm1607_vm5, %v1604_v43  ;;  %2389 = vrot.lane.b32.xlu1 %v5897_v23, %s4813_s2 }
 0x232   :  { %1647 = vst.msk [vmem:[#allocation3 + $0x110] sm:$0xff] %vm1607_vm5, %v1603_v32  ;;  %v4413_v28 = vpop.f32.mrb[24].mxu1  ;;  %2614 = vrot.lane.b32.xlu0 %v2374_v19, %s4813_s2 }
 0x233   :  { %v1544_v12 = vmax.f32 %v5831_v54, %v4413_v28  ;;  %v1508_v2 = vpop.f32.mrb[25].mxu1  ;;  %v2376_v54 = vld [vmem:[#allocation3 + $0xd4] ss:$5 sm:$0xff] }
 0x234   :  { %v1543_v42 = vmax.f32 %v5834_v14, %v1508_v2  ;;  %v2601_v14 = vld [vmem:[#allocation3 + $0xd5] ss:$5 sm:$0xff]  ;;  %v5973_v39 = vpop.permute.xlu1 %2415 }
 0x235   :  { %v1578_v37 = vadd.f32 %v5657_v38, %v1544_v12  ;;  %2391 = vrot.lane.b32.xlu1 %v5926_v33, %s4813_s2 }
 0x236   :  { %v1577_v47 = vadd.f32 %v5657_v38, %v1543_v42  ;;  %2646 = vrot.lane.b32.xlu0 %v2599_v5, %s4814_s25 }
 0x237   :  { %v1606_v58 = vmax.f32 %v1578_v37, 0.0  ;;  %v6048_v37 = vld [vmem:[#allocation3 + $0xb] ss:$5 sm:$0xff] }
 0x238   :  { %v1605_v15 = vmax.f32 %v1577_v47, 0.0  ;;  %v5989_v4 = vpop.permute.xlu1 %2608  ;;  %6926 = vst [vmem:[#allocation23_spill] sm:$0xff] %v6048_v37 }
 0x239   :  { %1650 = vst.msk [vmem:[#allocation3 + $0x128] sm:$0x3] %vm1615_vm8, %v1606_v58  ;;  %2423 = vrot.lane.b32.xlu1 %v2376_v54, %s4814_s25  ;;  %v5944_v38 = vld [vmem:[#allocation3 + $0xf9] ss:$5 sm:$0xff]  ;;  %v5948_v27 = vld [vmem:[#allocation3 + $0xf8] ss:$5 sm:$0xff] }
 0x23a   :  { %1649 = vst.msk [vmem:[#allocation3 + $0x120] sm:$0xff] %vm1607_vm5, %v1605_v15  ;;  %2648 = vrot.lane.b32.xlu0 %v2601_v14, %s4814_s25  ;;  %6918 = vst [vmem:[#allocation15_spill] sm:$0xff] %v5944_v38  ;;  %v5959_v59 = vld [vmem:[#allocation3 + $0xfb] ss:$5 sm:$0xff]  ;;  %v5979_v40 = vld [vmem:[#allocation3 + $0xfa] ss:$5 sm:$0xff] }
 0x23b   :  { %6919 = vst [vmem:[#allocation16_spill] sm:$0xff] %v5959_v59  ;;  %6921 = vst [vmem:[#allocation18_spill] sm:$0xff] %v5979_v40  ;;  %v2378_v9 = vld [vmem:[#allocation3 + $0xfc] ss:$5 sm:$0xff] }
 0x23c   :  { %6923 = vst [vmem:[#allocation20_spill] sm:$0xff] %v5989_v4 }
 0x23d   :  { %2616 = vrot.lane.b32.xlu1 %v2376_v54, %s4813_s2  ;;  %v2366_v54 = vld [vmem:[#allocation3 + $0xc] ss:$5 sm:$0xff] }
 0x23e   :  { %2198 = vrot.lane.b32.xlu0 %v5926_v33, %s4814_s25 }
 0x241   :  { %1943 = vrot.lane.b32.xlu1 %v5944_v38, %s4813_s2  ;;  %v5975_v17 = vld [vmem:[#allocation3 + $0x120] ss:$5 sm:$0xff]  ;;  %v5983_v1 = vld [vmem:[#allocation3 + $0x121] ss:$5 sm:$0xff] }
 0x242   :  { %1724 = vrot.lane.b32.xlu0 %v5948_v27, %s4813_s2  ;;  %6922 = vst [vmem:[#allocation19_spill] sm:$0xff] %v5983_v1  ;;  %v6001_v7 = vld [vmem:[#allocation3 + $0x122] ss:$5 sm:$0xff]  ;;  %v6021_v51 = vld [vmem:[#allocation3 + $0x123] ss:$5 sm:$0xff] }
 0x243   :  { %6924 = vst [vmem:[#allocation21_spill] sm:$0xff] %v6001_v7  ;;  %6925 = vst [vmem:[#allocation22_spill] sm:$0xff] %v6021_v51  ;;  %v2380_v28 = vld [vmem:[#allocation3 + $0x124] ss:$5 sm:$0xff]  ;;  %v2605_v58 = vld [vmem:[#allocation3 + $0x125] ss:$5 sm:$0xff] }
 0x245   :  { %2393 = vrot.lane.b32.xlu1 %v5959_v59, %s4813_s2 }
 0x246   :  { %1756 = vrot.lane.b32.xlu0 %v5944_v38, %s4814_s25 }
 0x249   :  { %1726 = vrot.lane.b32.xlu1 %v5975_v17, %s4813_s2 }
 0x24a   :  { %1975 = vrot.lane.b32.xlu0 %v5979_v40, %s4814_s25 }
 0x24c   :  { %v5995_v6 = vpop.permute.xlu1 %1935  ;;  %v5997_v24 = vpop.permute.xlu0 %1716 }
 0x24d   :  { %1758 = vrot.lane.b32.xlu1 %v5983_v1, %s4814_s25 }
 0x24e   :  { %2168 = vrot.lane.b32.xlu0 %v5979_v40, %s4813_s2 }
 0x250   :  { %v6009_v53 = vpop.permute.xlu1 %2385  ;;  %v6011_v62 = vpop.permute.xlu0 %1748 }
 0x251   :  { %1945 = vrot.lane.b32.xlu1 %v5983_v1, %s4813_s2 }
 0x252   :  { %2200 = vrot.lane.b32.xlu0 %v5959_v59, %s4814_s25 }
 0x254   :  { %v6025_v16 = vpop.permute.xlu0 %1967 }
 0x255   :  { %1977 = vrot.lane.b32.xlu1 %v6001_v7, %s4814_s25 }
 0x256   :  { %1712 = vrot.lane.b32.xlu0 %v6005_v35, %s4813_s2 }
 0x258   :  { %v6037_v43 = vpop.permute.xlu0 %2160 }
 0x259   :  { %2170 = vrot.lane.b32.xlu1 %v6001_v7, %s4813_s2 }
 0x25a   :  { %1744 = vrot.lane.b32.xlu0 %v6015_v31, %s4814_s25 }
 0x25c   :  { %v6019_v30 = vpop.permute.xlu1 %1718  ;;  %v6050_v5 = vpop.permute.xlu0 %2192 }
 0x25d   :  { %2202 = vrot.lane.b32.xlu1 %v6021_v51, %s4814_s25 }
 0x25e   :  { %1931 = vrot.lane.b32.xlu0 %v6015_v31, %s4813_s2 }
 0x260   :  { %v6029_v19 = vpop.permute.xlu1 %1750 }
 0x261   :  { %2395 = vrot.lane.b32.xlu1 %v6021_v51, %s4813_s2 }
 0x262   :  { %1963 = vrot.lane.b32.xlu0 %v6033_v21, %s4814_s25 }
 0x264   :  { %v1938_v32 = vpop.permute.xlu1 %1937 }
 0x265   :  { %2427 = vrot.lane.b32.xlu1 %v2380_v28, %s4814_s25  ;;  %v1990_v12 = vsel %vm1607_vm5, %v5786_v22, %v1938_v32  ;;  %v6059_v22 = vpop.permute.xlu0 %2417 }
 0x266   :  { %2156 = vrot.lane.b32.xlu0 %v6033_v21, %s4813_s2  ;;  %6927 = vst [vmem:[#allocation24_spill] sm:$0xff] %v6059_v22  ;;  %v1661_v22 = vld [vmem:[#allocation3 + $0x57] ss:$5 sm:$0xff] }
 0x268   :  { %v1970_v2 = vpop.permute.xlu1 %1969 }
 0x269   :  { %v6045_v42 = vsel %vm1776_vm7, %v1990_v12, %v1970_v2  ;;  %2620 = vrot.lane.b32.xlu1 %v2380_v28, %s4813_s2  ;;  %v6067_v12 = vpop.permute.xlu0 %2610  ;;  %v2591_v2 = vld [vmem:[#allocation3 + $0xd] ss:$5 sm:$0xff] }
 0x26a   :  { %2188 = vrot.lane.b32.xlu0 %v6048_v37, %s4814_s25  ;;  %6929 = vst [vmem:[#allocation26_spill] sm:$0xff] %v6067_v12 }
 0x26c   :  { %v6054_v47 = vpop.permute.xlu1 %2162 }
 0x26d   :  { %2652 = vrot.lane.b32.xlu1 %v2605_v58, %s4814_s25  ;;  %v6071_v58 = vpop.permute.xlu0 %2194 }
 0x26e   :  { %2381 = vrot.lane.b32.xlu0 %v6048_v37, %s4813_s2 }
 0x270   :  { %v2388_v15 = vpop.permute.xlu1 %2387 }
 0x271   :  { %v2440_v14 = vsel %vm1607_vm5, %v5810_v3, %v2388_v15  ;;  %v6074_v51 = vpop.permute.xlu0 %2642  ;;  %v2603_v3 = vld [vmem:[#allocation3 + $0xfd] ss:$5 sm:$0xff] }
 0x272   :  { %2413 = vrot.lane.b32.xlu0 %v2366_v54, %s4814_s25  ;;  %6930 = vst [vmem:[#allocation27_spill] sm:$0xff] %v6074_v51 }
 0x274   :  { %v2420_v32 = vpop.permute.xlu1 %2419 }
 0x275   :  { %v6065_v28 = vsel %vm1776_vm7, %v2440_v14, %v2420_v32  ;;  %v6080_v14 = vpop.permute.xlu0 %2644 }
 0x276   :  { %6928 = vst [vmem:[#allocation25_spill] sm:$0xff] %v6065_v28  ;;  %2606 = vrot.lane.b32.xlu0 %v2366_v54, %s4813_s2  ;;  %6932 = vst [vmem:[#allocation29_spill] sm:$0xff] %v6080_v14 }
 0x278   :  { %v6078_v15 = vpop.permute.xlu1 %2612 }
 0x279   :  { %6931 = vst [vmem:[#allocation28_spill] sm:$0xff] %v6078_v15 }
 0x27a   :  { %2638 = vrot.lane.b32.xlu0 %v2591_v2, %s4814_s25  ;;  %v1665_v2 = vld [vmem:[#allocation3 + $0xa7] ss:$5 sm:$0xff] }
 0x27e   :  { %2425 = vrot.lane.b32.xlu0 %v2378_v9, %s4814_s25 }
 0x282   :  { %2618 = vrot.lane.b32.xlu0 %v2378_v9, %s4813_s2 }
 0x286   :  { %2650 = vrot.lane.b32.xlu0 %v2603_v3, %s4814_s25 }
 0x28b   :  { %v6082_v54 = vpop.permute.xlu1 %1722 }
 0x28c   :  { %v1721_v32 = vpop.permute.xlu0 %1720 }
 0x28d   :  { %v1772_v33 = vsel %vm1607_vm5, %v1665_v2, %v1721_v32 }
 0x28f   :  { %v6084_v59 = vpop.permute.xlu1 %1754 }
 0x290   :  { %v1753_v7 = vpop.permute.xlu0 %1752 }
 0x291   :  { %v1781_v40 = vsel %vm1776_vm7, %v1772_v33, %v1753_v7 }
 0x293   :  { %v6088_v61 = vpop.permute.xlu1 %1941 }
 0x294   :  { %v6090_v9 = vpop.permute.xlu0 %1971 }
 0x297   :  { %v6092_v3 = vpop.permute.xlu1 %1973 }
 0x298   :  { %v2165_v15 = vpop.permute.xlu0 %2164 }
 0x299   :  { %v2216_v14 = vsel %vm1607_vm5, %v5863_v41, %v2165_v15 }
 0x29b   :  { %v6094_v51 = vpop.permute.xlu1 %2166 }
 0x29c   :  { %v2197_v49 = vpop.permute.xlu0 %2196 }
 0x29d   :  { %v6099_v12 = vsel %vm1776_vm7, %v2216_v14, %v2197_v49 }
 0x29f   :  { %v6101_v32 = vpop.permute.xlu1 %1939 }
 0x2a0   :  { %v6103_v2 = vpop.permute.xlu0 %2421 }
 0x2a1   :  { %6933 = vst [vmem:[#allocation30_spill] sm:$0xff] %v6103_v2 }
 0x2a3   :  { %v6105_v33 = vpop.permute.xlu1 %2389 }
 0x2a4   :  { %6934 = vst [vmem:[#allocation31_spill] sm:$0xff] %v6105_v33  ;;  %v2615_v7 = vpop.permute.xlu0 %2614 }
 0x2a5   :  { %v2666_v57 = vsel %vm1607_vm5, %v5897_v23, %v2615_v7 }
 0x2a7   :  { %v6107_v11 = vpop.permute.xlu1 %2391 }
 0x2a8   :  { %6935 = vst [vmem:[#allocation32_spill] sm:$0xff] %v6107_v11  ;;  %v2647_v37 = vpop.permute.xlu0 %2646 }
 0x2a9   :  { %v6112_v28 = vsel %vm1776_vm7, %v2666_v57, %v2647_v37 }
 0x2aa   :  { %6936 = vst [vmem:[#allocation33_spill] sm:$0xff] %v6112_v28 }
 0x2ab   :  { %v6114_v41 = vpop.permute.xlu1 %2423 }
 0x2ac   :  { %6937 = vst [vmem:[#allocation34_spill] sm:$0xff] %v6114_v41  ;;  %v6116_v49 = vpop.permute.xlu0 %2648 }
 0x2ad   :  { %6938 = vst [vmem:[#allocation35_spill] sm:$0xff] %v6116_v49  ;;  %v1657_v49 = vld [vmem:[#allocation3 + $0x7] ss:$5 sm:$0xff] }
 0x2af   :  { %v6118_v15 = vpop.permute.xlu1 %2616 }
 0x2b0   :  { %6939 = vst [vmem:[#allocation36_spill] sm:$0xff] %v6118_v15  ;;  %v6120_v14 = vpop.permute.xlu0 %2198  ;;  %v1659_v15 = vld [vmem:[#allocation3 + $0x2f] ss:$5 sm:$0xff] }
 0x2b1   :  { %v1769_v33 = vsel %vm1607_vm5, %v1659_v15, %v5877_v63 }
 0x2b3   :  { %v6122_v8 = vpop.permute.xlu1 %1943 }
 0x2b4   :  { %v1725_v2 = vpop.permute.xlu0 %1724 }
 0x2b7   :  { %v6124_v11 = vpop.permute.xlu1 %2393 }
 0x2b8   :  { %v1757_v4 = vpop.permute.xlu0 %1756  ;;  %6940 = vst [vmem:[#allocation37_spill] sm:$0xff] %v6124_v11 }
 0x2bb   :  { %v1727_v57 = vpop.permute.xlu1 %1726 }
 0x2bc   :  { %v6126_v1 = vpop.permute.xlu0 %1975 }
 0x2bf   :  { %v1759_v7 = vpop.permute.xlu1 %1758 }
 0x2c0   :  { %v6128_v23 = vpop.permute.xlu0 %2168 }
 0x2c1   :  { %6941 = vst [vmem:[#allocation38_spill] sm:$0xff] %v6128_v23  ;;  %v1778_v23 = vsel %vm1776_vm7, %v1769_v33, %v5901_v29 }
 0x2c3   :  { %v6135_v11 = vpop.permute.xlu1 %1945 }
 0x2c4   :  { %v6130_v37 = vpop.permute.xlu0 %2200 }
 0x2c5   :  { %6942 = vst [vmem:[#allocation39_spill] sm:$0xff] %v6130_v37  ;;  %v1770_v37 = vsel %vm1607_vm5, %v1661_v22, %v5997_v24  ;;  %v1667_v24 = vld [vmem:[#allocation3 + $0xcf] ss:$5 sm:$0xff] }
 0x2c6   :  { %v1773_v33 = vsel %vm1607_vm5, %v1667_v24, %v6082_v54  ;;  %v6952_v24 = vld [vmem:[#allocation25_spill] sm:$0xff] }
 0x2c7   :  { %v1782_v15 = vsel %vm1776_vm7, %v1773_v33, %v6084_v59 }
 0x2c8   :  { %v1713_v28 = vpop.permute.xlu0 %1712 }
 0x2c9   :  { %v1768_v41 = vsel %vm1607_vm5, %v1657_v49, %v1713_v28  ;;  %v1779_v28 = vsel %vm1776_vm7, %v1770_v37, %v6011_v62  ;;  %v1663_v49 = vld [vmem:[#allocation3 + $0x7f] ss:$5 sm:$0xff] }
 0x2cc   :  { %v1745_v34 = vpop.permute.xlu0 %1744 }
 0x2cd   :  { %v1777_v38 = vsel %vm1776_vm7, %v1768_v41, %v1745_v34  ;;  %v1771_v34 = vsel %vm1607_vm5, %v1663_v49, %v6019_v30  ;;  %v1988_v30 = vsel %vm1607_vm5, %v5703_v0, %v5917_v56 }
 0x2ce   :  { %4420 = vmatprep.mubr.msk.f32.mxu0 %vm1785_vm9, %v1777_v38  ;;  %v1780_v29 = vsel %vm1776_vm7, %v1771_v34, %v6029_v19  ;;  %v1978_v38 = vpop.permute.xlu1 %1977  ;;  %v1669_v19 = vld [vmem:[#allocation3 + $0xf7] ss:$5 sm:$0xff] }
 0x2cf   :  { %4421 = vmatmul.mubr.msk.f32.vlgmr.msra.gmra.mrb[30].mxu0 %vm1785_vm9, %v1778_v23  ;;  %v1774_v0 = vsel %vm1607_vm5, %v1669_v19, %v1725_v2  ;;  %v2213_v23 = vsel %vm1607_vm5, %v5708_v26, %v5939_v44  ;;  %v2214_v26 = vsel %vm1607_vm5, %v5756_v55, %v6037_v43  ;;  %v6951_v34 = vld [vmem:[#allocation9_spill] sm:$0xff] }
 0x2d0   :  { %4605 = vmatpush3.bf16.msra.mxu0 %v5899_v20  ;;  %v1932_v63 = vpop.permute.xlu0 %1931  ;;  %4423 = vmatprep.mubr.msk.f32.mxu0 %vm1785_vm9, %v1779_v28  ;;  %v1783_v54 = vsel %vm1776_vm7, %v1774_v0, %v1757_v4  ;;  %v6957_v0 = vld [vmem:[#allocation17_spill] sm:$0xff] }
 0x2d1   :  { %4454 = vmatprep.subr.mxu0 %v5957_v18  ;;  %v1987_v62 = vsel %vm1607_vm5, %v6005_v35, %v1932_v63  ;;  %v1996_v35 = vsel %vm1776_vm7, %v1988_v30, %v5931_v13  ;;  %v1671_v13 = vld [vmem:[#allocation3 + $0x11f] ss:$5 sm:$0xff] }
 0x2d2   :  { %v2171_v2 = vpop.permute.xlu1 %2170  ;;  %v6950_v63 = vld [vmem:[#allocation20_spill] sm:$0xff]  ;;  %v6954_v30 = vld [vmem:[#allocation23_spill] sm:$0xff] }
 0x2d3   :  { %4424 = vmatmul.mubr.msk.f32.gmra.mrb[32].mxu0 %vm1785_vm9, %v1780_v29  ;;  %v2663_v29 = vsel %vm1607_vm5, %v6951_v34, %v6950_v63 }
 0x2d4   :  { %v1964_v22 = vpop.permute.xlu0 %1963  ;;  %4426 = vmatprep.mubr.msk.f32.mxu0 %vm1785_vm9, %v1781_v40  ;;  %4455 = vmatpush3.msra.mxu0 %v5957_v18  ;;  %v1989_v40 = vsel %vm1607_vm5, %v5758_v36, %v5995_v6  ;;  %v1991_v36 = vsel %vm1607_vm5, %v5850_v48, %v6101_v32  ;;  %v1775_v6 = vsel %vm1607_vm5, %v1671_v13, %v1727_v57 }
 0x2d5   :  { %v1995_v41 = vsel %vm1776_vm7, %v1987_v62, %v1964_v22  ;;  %4611 = vmatprep.subr.bf16.mxu0 %v5899_v20  ;;  %v1997_v56 = vsel %vm1776_vm7, %v1989_v40, %v6025_v16  ;;  %v1784_v4 = vsel %vm1776_vm7, %v1775_v6, %v1759_v7  ;;  %v1999_v48 = vsel %vm1776_vm7, %v1991_v36, %v6090_v9  ;;  %v6949_v7 = vld [vmem:[#allocation19_spill] sm:$0xff]  ;;  %v6953_v62 = vld [vmem:[#allocation30_spill] sm:$0xff] }
 0x2d6   :  { %4438 = vmatprep.mubr.msk.f32.mxu1 %vm1785_vm9, %v1995_v41  ;;  %v1992_v57 = vsel %vm1607_vm5, %v5845_v46, %v6088_v61  ;;  %v1993_v9 = vsel %vm1607_vm5, %v5948_v27, %v6122_v8  ;;  %v2215_v61 = vsel %vm1607_vm5, %v5795_v60, %v6054_v47  ;;  %v2203_v44 = vpop.permute.xlu1 %2202  ;;  %v2222_v8 = vsel %vm1776_vm7, %v2214_v26, %v6050_v5  ;;  %v6955_v41 = vld [vmem:[#allocation32_spill] sm:$0xff]  ;;  %v6959_v36 = vld [vmem:[#allocation10_spill] sm:$0xff] }
 0x2d7   :  { %4427 = vmatmul.mubr.msk.f32.gmra.mrb[34].mxu0 %vm1785_vm9, %v1782_v15  ;;  %4439 = vmatmul.mubr.msk.f32.vlgmr.msra.gmra.mrb[26].mxu1 %vm1785_vm9, %v1996_v35  ;;  %v2001_v46 = vsel %vm1776_vm7, %v1993_v9, %v6126_v1  ;;  %v1994_v60 = vsel %vm1607_vm5, %v5975_v17, %v6135_v11  ;;  %v2223_v1 = vsel %vm1776_vm7, %v2215_v61, %v6071_v58  ;;  %v6944_v58 = vld [vmem:[#allocation15_spill] sm:$0xff]  ;;  %v6956_v35 = vld [vmem:[#allocation13_spill] sm:$0xff] }
 0x2d8   :  { %4441 = vmatprep.mubr.msk.f32.mxu1 %vm1785_vm9, %v1997_v56  ;;  %v2157_v59 = vpop.permute.xlu0 %2156  ;;  %4429 = vmatprep.mubr.msk.f32.mxu0 %vm1785_vm9, %v1783_v54  ;;  %v2002_v27 = vsel %vm1776_vm7, %v1994_v60, %v1978_v38  ;;  %v2438_v11 = vsel %vm1607_vm5, %v5717_v25, %v5950_v50  ;;  %v2217_v17 = vsel %vm1607_vm5, %v5857_v45, %v6094_v51  ;;  %v6945_v45 = vld [vmem:[#allocation24_spill] sm:$0xff]  ;;  %v6946_v51 = vld [vmem:[#allocation39_spill] sm:$0xff]  ;;  %v6958_v54 = vld [vmem:[#allocation26_spill] sm:$0xff] }
 0x2d9   :  { %4609 = vmatpush3.bf16.msra.mxu1 %v5899_v20  ;;  %v2212_v16 = vsel %vm1607_vm5, %v6015_v31, %v2157_v59  ;;  %v2000_v31 = vsel %vm1776_vm7, %v1992_v57, %v6092_v3  ;;  %v2439_v47 = vsel %vm1607_vm5, %v5775_v52, %v6009_v53  ;;  %v6947_v52 = vld [vmem:[#allocation31_spill] sm:$0xff]  ;;  %v2219_v28 = vsel %vm1607_vm5, %v6949_v7, %v2171_v2  ;;  %v6960_v59 = vld [vmem:[#allocation34_spill] sm:$0xff] }
 0x2da   :  { %4472 = vmatprep.subr.mxu1 %v5957_v18  ;;  %v2396_v43 = vpop.permute.xlu1 %2395  ;;  %v2447_v50 = vsel %vm1776_vm7, %v2439_v47, %v6945_v45  ;;  %v2227_v49 = vsel %vm1776_vm7, %v2219_v28, %v2203_v44  ;;  %v2442_v40 = vsel %vm1607_vm5, %v6956_v35, %v6955_v41  ;;  %v2671_v56 = vsel %vm1776_vm7, %v2663_v29, %v6957_v0  ;;  %v6961_v2 = vld [vmem:[#allocation27_spill] sm:$0xff]  ;;  %v6965_v57 = vld [vmem:[#allocation18_spill] sm:$0xff]  ;;  %v6967_v44 = vld [vmem:[#allocation29_spill] sm:$0xff] }
 0x2db   :  { %4430 = vmatmul.mubr.msk.f32.gmra.mrb[36].mxu0 %vm1785_vm9, %v1784_v4  ;;  %4442 = vmatmul.mubr.msk.f32.gmra.mrb[28].mxu1 %vm1785_vm9, %v6045_v42  ;;  %v2221_v42 = vsel %vm1776_vm7, %v2213_v23, %v5987_v10  ;;  %v2664_v13 = vsel %vm1607_vm5, %v6959_v36, %v6958_v54  ;;  %v2450_v6 = vsel %vm1776_vm7, %v2442_v40, %v6960_v59  ;;  %v6964_v23 = vld [vmem:[#allocation37_spill] sm:$0xff]  ;;  %v6969_v60 = vld [vmem:[#allocation14_spill] sm:$0xff] }
 0x2dc   :  { %4444 = vmatprep.mubr.msk.f32.mxu1 %vm1785_vm9, %v1999_v48  ;;  %v2189_v32 = vpop.permute.xlu0 %2188  ;;  %v2672_v4 = vsel %vm1776_vm7, %v2664_v13, %v6961_v2  ;;  %v6962_v48 = vld [vmem:[#allocation28_spill] sm:$0xff]  ;;  %v6973_v47 = vld [vmem:[#allocation22_spill] sm:$0xff] }
 0x2dd   :  { %v2220_v37 = vsel %vm1776_vm7, %v2212_v16, %v2189_v32  ;;  %4473 = vmatpush3.msra.mxu1 %v5957_v18  ;;  %v6963_v16 = vld [vmem:[#allocation11_spill] sm:$0xff] }
 0x2de   :  { %4456 = vmatprep.mubr.msk.f32.mxu0 %vm1785_vm9, %v2220_v37  ;;  %v2428_v38 = vpop.permute.xlu1 %2427  ;;  %v2665_v32 = vsel %vm1607_vm5, %v6963_v16, %v6962_v48  ;;  %v2443_v37 = vsel %vm1607_vm5, %v6965_v57, %v6964_v23 }
 0x2df   :  { %4445 = vmatmul.mubr.msk.f32.gmra.mrb[30].mxu1 %vm1785_vm9, %v2000_v31  ;;  %4457 = vmatmul.mubr.msk.f32.vlgmr.msra.gmra.mrb[38].mxu0 %vm1785_vm9, %v2221_v42  ;;  %v6966_v31 = vld [vmem:[#allocation21_spill] sm:$0xff] }
 0x2e0   :  { %4613 = vmatpush3.bf16.msra.mxu0 %v5899_v20  ;;  %4447 = vmatprep.mubr.msk.f32.mxu1 %vm1785_vm9, %v2001_v46  ;;  %v2382_v55 = vpop.permute.xlu0 %2381  ;;  %v2444_v9 = vsel %vm1607_vm5, %v6966_v31, %v2396_v43  ;;  %v6972_v43 = vld [vmem:[#allocation16_spill] sm:$0xff] }
 0x2e1   :  { %4459 = vmatprep.mubr.msk.f32.mxu0 %vm1785_vm9, %v2222_v8  ;;  %4490 = vmatprep.subr.mxu0 %v5957_v18  ;;  %v2437_v20 = vsel %vm1607_vm5, %v6033_v21, %v2382_v55  ;;  %v2446_v21 = vsel %vm1776_vm7, %v2438_v11, %v5973_v39  ;;  %v6948_v39 = vld [vmem:[#allocation12_spill] sm:$0xff]  ;;  %v2452_v46 = vsel %vm1776_vm7, %v2444_v9, %v2428_v38 }
 0x2e2   :  { %v2441_v53 = vsel %vm1607_vm5, %v6948_v39, %v6947_v52  ;;  %v2621_v26 = vpop.permute.xlu1 %2620  ;;  %v2673_v8 = vsel %vm1776_vm7, %v2665_v32, %v6967_v44  ;;  %v6968_v55 = vld [vmem:[#allocation36_spill] sm:$0xff] }
 0x2e3   :  { %4448 = vmatmul.mubr.msk.f32.gmra.mrb[32].mxu1 %vm1785_vm9, %v2002_v27  ;;  %4460 = vmatmul.mubr.msk.f32.gmra.mrb[40].mxu0 %vm1785_vm9, %v2223_v1  ;;  %v2449_v22 = vsel %vm1776_vm7, %v2441_v53, %v6953_v62  ;;  %v2667_v27 = vsel %vm1607_vm5, %v6969_v60, %v6968_v55 }
 0x2e4   :  { %v2414_v10 = vpop.permute.xlu0 %2413  ;;  %4462 = vmatprep.mubr.msk.f32.mxu0 %vm1785_vm9, %v6099_v12  ;;  %4491 = vmatpush3.msra.mxu0 %v5957_v18  ;;  %v2225_v18 = vsel %vm1776_vm7, %v2217_v17, %v6120_v14  ;;  %v6943_v12 = vld [vmem:[#allocation38_spill] sm:$0xff] }
 0x2e5   :  { %v2445_v5 = vsel %vm1776_vm7, %v2437_v20, %v2414_v10  ;;  %v2218_v25 = vsel %vm1607_vm5, %v6944_v58, %v6943_v12  ;;  %v6970_v20 = vld [vmem:[#allocation33_spill] sm:$0xff]  ;;  %v6971_v10 = vld [vmem:[#allocation35_spill] sm:$0xff] }
 0x2e6   :  { %4474 = vmatprep.mubr.msk.f32.mxu1 %vm1785_vm9, %v2445_v5  ;;  %v2226_v3 = vsel %vm1776_vm7, %v2218_v25, %v6946_v51  ;;  %v2675_v11 = vsel %vm1776_vm7, %v2667_v27, %v6971_v10  ;;  %v2653_v17 = vpop.permute.xlu1 %2652  ;;  %v6974_v25 = vmov 0.0   ;;  %v52_v51 = vld [vmem:[%s6888_s5 + $0x8] sm:$0xff] }
 0x2e7   :  { %4463 = vmatmul.mubr.msk.f32.gmra.mrb[42].mxu0 %vm1785_vm9, %v2225_v18  ;;  %4475 = vmatmul.mubr.msk.f32.vlgmr.msra.gmra.mrb[34].mxu1 %vm1785_vm9, %v2446_v21  ;;  %v2669_v18 = vsel %vm1607_vm5, %v6973_v47, %v2621_v26  ;;  %2845 = vst.msk [vmem:[#allocation4 + $0x2a] sm:$0x3f] %vm2844_vm10, %v6974_v25  ;;  %2851 = vst.msk [vmem:[#allocation4 + $0x52] sm:$0x3f] %vm2844_vm10, %v6974_v25 }
 0x2e8   :  { %4477 = vmatprep.mubr.msk.f32.mxu1 %vm1785_vm9, %v2447_v50  ;;  %v2607_v14 = vpop.permute.xlu0 %2606  ;;  %4465 = vmatprep.mubr.msk.f32.mxu0 %vm1785_vm9, %v2226_v3  ;;  %v2677_v58 = vsel %vm1776_vm7, %v2669_v18, %v2653_v17  ;;  %2857 = vst.msk [vmem:[#allocation4 + $0x7a] sm:$0x3f] %vm2844_vm10, %v6974_v25  ;;  %v51_v50 = vld [vmem:[%s6888_s5] sm:$0xff] }
 0x2e9   :  { %v2662_v33 = vsel %vm1607_vm5, %v6954_v30, %v2607_v14  ;;  %v6341_v52 = vpack.c.bf16 %v52_v51, %v51_v50 }
 0x2eb   :  { %4466 = vmatmul.mubr.msk.f32.gmra.mrb[44].mxu0 %vm1785_vm9, %v2227_v49  ;;  %4478 = vmatmul.mubr.msk.f32.gmra.mrb[36].mxu1 %vm1785_vm9, %v6952_v24 }
 0x2ec   :  { %4480 = vmatprep.mubr.msk.f32.mxu1 %vm1785_vm9, %v2449_v22  ;;  %v2639_v19 = vpop.permute.xlu0 %2638  ;;  %4615 = vmatprep.subr.bf16.mxu1 %v6341_v52 }
 0x2ed   :  { %v2670_v15 = vsel %vm1776_vm7, %v2662_v33, %v2639_v19  ;;  %4639 = vmatprep.subr.bf16.mxu0 %v6341_v52  ;;  %4617 = vmatpush3.bf16.msra.mxu1 %v6341_v52 }
 0x2ee   :  { %4492 = vmatprep.mubr.msk.f32.mxu0 %vm1785_vm9, %v2670_v15 }
 0x2ef   :  { %4481 = vmatmul.mubr.msk.f32.gmra.mrb[38].mxu1 %vm1785_vm9, %v2450_v6  ;;  %4493 = vmatmul.mubr.msk.f32.vlgmr.msra.gmra.mrb[46].mxu0 %vm1785_vm9, %v2671_v56 }
 0x2f0   :  { %v2426_v42 = vpop.permute.xlu0 %2425  ;;  %4495 = vmatprep.mubr.msk.f32.mxu0 %vm1785_vm9, %v2672_v4  ;;  %4641 = vmatpush3.bf16.msra.mxu0 %v6341_v52 }
 0x2f1   :  { %v2451_v61 = vsel %vm1776_vm7, %v2443_v37, %v2426_v42 }
 0x2f2   :  { %4483 = vmatprep.mubr.msk.f32.mxu1 %vm1785_vm9, %v2451_v61 }
 0x2f3   :  { %4484 = vmatmul.mubr.msk.f32.gmra.mrb[40].mxu1 %vm1785_vm9, %v2452_v46  ;;  %4496 = vmatmul.mubr.msk.f32.gmra.mrb[48].mxu0 %vm1785_vm9, %v2673_v8 }
 0x2f4   :  { %v2619_v1 = vpop.permute.xlu0 %2618  ;;  %4498 = vmatprep.mubr.msk.f32.mxu0 %vm1785_vm9, %v6970_v20  ;;  %v4137_v20 = vld [vmem:[%s6887_s4] ss:$0 sm:$0xff] }
 0x2f5   :  { %v2668_v5 = vsel %vm1607_vm5, %v6972_v43, %v2619_v1 }
 0x2f7   :  { %4499 = vmatmul.mubr.msk.f32.gmra.mrb[50].mxu0 %vm1785_vm9, %v2675_v11 }
 0x2f8   :  { %v2651_v21 = vpop.permute.xlu0 %2650 }
 0x2f9   :  { %v2676_v12 = vsel %vm1776_vm7, %v2668_v5, %v2651_v21 }
 0x2fa   :  { %4501 = vmatprep.mubr.msk.f32.mxu0 %vm1785_vm9, %v2676_v12  ;;  %v53_v12 = vld [vmem:[%s6888_s5 + $0x10] sm:$0xff] }
 0x2fb   :  { %4502 = vmatmul.mubr.msk.f32.gmra.mrb[52].mxu0 %vm1785_vm9, %v2677_v58  ;;  %v54_v58 = vld [vmem:[%s6888_s5 + $0x18] sm:$0xff] }
 0x3a2   :  { %v4422_v45 = vpop.f32.mrb[30].mxu0 }
 0x3a3   :  { %v1876_v3 = vpop.f32.mrb[31].mxu0 }
 0x3a6   :  { %v4425_v39 = vpop.f32.mrb[32].mxu0 }
 0x3a7   :  { %v1886_v53 = vpop.f32.mrb[33].mxu0 }
 0x3aa   :  { %v4428_v14 = vpop.f32.mrb[34].mxu0  ;;  %v4440_v7 = vpop.f32.mrb[26].mxu1 }
 0x3ab   :  { %v2133_v28 = vmax.f32 %v4422_v45, %v4440_v7  ;;  %v1896_v49 = vpop.f32.mrb[35].mxu0  ;;  %v2093_v63 = vpop.f32.mrb[27].mxu1 }
 0x3ac   :  { %v2132_v34 = vmax.f32 %v1876_v3, %v2093_v63  ;;  %v6356_v3 = vpack.c.bf16 %v54_v58, %v53_v12 }
 0x3ae   :  { %v4431_v29 = vpop.f32.mrb[36].mxu0  ;;  %v4443_v38 = vpop.f32.mrb[28].mxu1  ;;  %4619 = vmatprep.subr.bf16.mxu1 %v6356_v3  ;;  %4643 = vmatprep.subr.bf16.mxu0 %v6356_v3 }
 0x3af   :  { %v2135_v24 = vmax.f32 %v4425_v39, %v4443_v38  ;;  %v1906_v62 = vpop.f32.mrb[37].mxu0  ;;  %v2103_v22 = vpop.f32.mrb[29].mxu1  ;;  %4621 = vmatpush3.bf16.msra.mxu1 %v6356_v3  ;;  %v55_v38 = vld [vmem:[%s6888_s5 + $0x20] sm:$0xff]  ;;  %4645 = vmatpush3.bf16.msra.mxu0 %v6356_v3 }
 0x3b0   :  { %v2134_v30 = vmax.f32 %v1886_v53, %v2103_v22 }
 0x3b2   :  { %v4446_v33 = vpop.f32.mrb[30].mxu1  ;;  %v4458_v19 = vpop.f32.mrb[38].mxu0 }
 0x3b3   :  { %v2137_v41 = vmax.f32 %v4428_v14, %v4446_v33  ;;  %v2358_v35 = vmax.f32 %v2133_v28, %v4458_v19  ;;  %v2113_v40 = vpop.f32.mrb[31].mxu1  ;;  %v2318_v15 = vpop.f32.mrb[39].mxu0 }
 0x3b4   :  { %v2136_v0 = vmax.f32 %v1896_v49, %v2113_v40  ;;  %v2357_v56 = vmax.f32 %v2132_v34, %v2318_v15 }
 0x3b6   :  { %v4449_v54 = vpop.f32.mrb[32].mxu1  ;;  %v4461_v36 = vpop.f32.mrb[40].mxu0 }
 0x3b7   :  { %v2139_v13 = vmax.f32 %v4431_v29, %v4449_v54  ;;  %v2360_v59 = vmax.f32 %v2135_v24, %v4461_v36  ;;  %v2123_v6 = vpop.f32.mrb[33].mxu1  ;;  %v2328_v2 = vpop.f32.mrb[41].mxu0  ;;  %v56_v24 = vld [vmem:[%s6888_s5 + $0x28] sm:$0xff]  ;;  %s4815_s5 = smov 32  }
 0x3b8   :  { %v2138_v4 = vmax.f32 %v1906_v62, %v2123_v6  ;;  %v2359_v48 = vmax.f32 %v2134_v30, %v2328_v2  ;;  %v6370_v30 = vpack.c.bf16 %v56_v24, %v55_v38 }
 0x3ba   :  { %v4464_v16 = vpop.f32.mrb[42].mxu0  ;;  %v4476_v32 = vpop.f32.mrb[34].mxu1  ;;  %4623 = vmatprep.subr.bf16.mxu1 %v6370_v30  ;;  %4647 = vmatprep.subr.bf16.mxu0 %v6370_v30 }
 0x3bb   :  { %v2362_v23 = vmax.f32 %v2137_v41, %v4464_v16  ;;  %v2583_v57 = vmax.f32 %v2358_v35, %v4476_v32  ;;  %v2338_v37 = vpop.f32.mrb[43].mxu0  ;;  %v2543_v42 = vpop.f32.mrb[35].mxu1  ;;  %4625 = vmatpush3.bf16.msra.mxu1 %v6370_v30  ;;  %4649 = vmatpush3.bf16.msra.mxu0 %v6370_v30 }
 0x3bc   :  { %v2361_v31 = vmax.f32 %v2136_v0, %v2338_v37  ;;  %v2582_v9 = vmax.f32 %v2357_v56, %v2543_v42  ;;  %4627 = vmatprep.subr.bf16.mxu1 %v6341_v52  ;;  %4663 = vmatprep.subr.bf16.mxu0 %v6341_v52 }
 0x3be   :  { %v4467_v26 = vpop.f32.mrb[44].mxu0  ;;  %v4479_v61 = vpop.f32.mrb[36].mxu1 }
 0x3bf   :  { %v2364_v46 = vmax.f32 %v2139_v13, %v4467_v26  ;;  %v2585_v44 = vmax.f32 %v2360_v59, %v4479_v61  ;;  %v2348_v8 = vpop.f32.mrb[45].mxu0  ;;  %v2553_v55 = vpop.f32.mrb[37].mxu1 }
 0x3c0   :  { %v2363_v60 = vmax.f32 %v2138_v4, %v2348_v8  ;;  %v2584_v27 = vmax.f32 %v2359_v48, %v2553_v55 }
 0x3c2   :  { %v4482_v1 = vpop.f32.mrb[38].mxu1  ;;  %v4494_v10 = vpop.f32.mrb[46].mxu0 }
 0x3c3   :  { %v2587_v11 = vmax.f32 %v2362_v23, %v4482_v1  ;;  %v2808_v17 = vmax.f32 %v2583_v57, %v4494_v10  ;;  %v2563_v43 = vpop.f32.mrb[39].mxu1  ;;  %v2768_v5 = vpop.f32.mrb[47].mxu0 }
 0x3c4   :  { %v2586_v21 = vmax.f32 %v2361_v31, %v2563_v43  ;;  %v2807_v47 = vmax.f32 %v2582_v9, %v2768_v5 }
 0x3c5   :  { %v2822_v18 = vadd.f32 %v4137_v20, %v2808_v17 }
 0x3c6   :  { %v2821_v45 = vadd.f32 %v4137_v20, %v2807_v47  ;;  %v4485_v50 = vpop.f32.mrb[40].mxu1  ;;  %v4497_v51 = vpop.f32.mrb[48].mxu0 }
 0x3c7   :  { %v2830_v39 = vmax.f32 %v2822_v18, 0.0  ;;  %v2589_v53 = vmax.f32 %v2364_v46, %v4485_v50  ;;  %v2810_v14 = vmax.f32 %v2585_v44, %v4497_v51  ;;  %v2573_v7 = vpop.f32.mrb[41].mxu1  ;;  %v2778_v28 = vpop.f32.mrb[49].mxu0 }
 0x3c8   :  { %v2829_v49 = vmax.f32 %v2821_v45, 0.0  ;;  %v2588_v63 = vmax.f32 %v2363_v60, %v2573_v7  ;;  %v2809_v34 = vmax.f32 %v2584_v27, %v2778_v28 }
 0x3c9   :  { %2840 = vst.msk [vmem:[#allocation4 + $0x10] sm:$0x3] %vm2839_vm11, %v2830_v39  ;;  %v2824_v29 = vadd.f32 %v4137_v20, %v2810_v14 }
 0x3ca   :  { %2838 = vst.msk [vmem:[#allocation4 + $0x8] sm:$0xff] %vm1776_vm7, %v2829_v49  ;;  %v2823_v62 = vadd.f32 %v4137_v20, %v2809_v34  ;;  %v4500_v22 = vpop.f32.mrb[50].mxu0 }
 0x3cb   :  { %v2832_v33 = vmax.f32 %v2824_v29, 0.0  ;;  %v2812_v19 = vmax.f32 %v2587_v11, %v4500_v22  ;;  %v2788_v41 = vpop.f32.mrb[51].mxu0 }
 0x3cc   :  { %v2831_v35 = vmax.f32 %v2823_v62, 0.0  ;;  %v2811_v40 = vmax.f32 %v2586_v21, %v2788_v41 }
 0x3cd   :  { %2847 = vst.msk [vmem:[#allocation4 + $0x38] sm:$0x3] %vm2839_vm11, %v2832_v33  ;;  %v2826_v15 = vadd.f32 %v4137_v20, %v2812_v19 }
 0x3ce   :  { %2846 = vst.msk [vmem:[#allocation4 + $0x30] sm:$0xff] %vm1776_vm7, %v2831_v35  ;;  %v2825_v0 = vadd.f32 %v4137_v20, %v2811_v40  ;;  %v4503_v56 = vpop.f32.mrb[52].mxu0 }
 0x3cf   :  { %v2834_v54 = vmax.f32 %v2826_v15, 0.0  ;;  %v2814_v36 = vmax.f32 %v2589_v53, %v4503_v56  ;;  %v2798_v13 = vpop.f32.mrb[53].mxu0 }
 0x3d0   :  { %v2833_v59 = vmax.f32 %v2825_v0, 0.0  ;;  %v2813_v6 = vmax.f32 %v2588_v63, %v2798_v13 }
 0x3d1   :  { %2853 = vst.msk [vmem:[#allocation4 + $0x60] sm:$0x3] %vm2839_vm11, %v2834_v54  ;;  %v2828_v2 = vadd.f32 %v4137_v20, %v2814_v36  ;;  %v6381_v4 = vld [vmem:[#allocation4 + $0x8] ss:$5 sm:$0xff]  ;;  %v6387_v23 = vld [vmem:[#allocation4 + $0x9] ss:$5 sm:$0xff] }
 0x3d2   :  { %2852 = vst.msk [vmem:[#allocation4 + $0x58] sm:$0xff] %vm1776_vm7, %v2833_v59  ;;  %v2827_v48 = vadd.f32 %v4137_v20, %v2813_v6  ;;  %2893 = vrot.lane.b32.xlu0 %v6381_v4, %s4814_s25  ;;  %v6402_v42 = vld [vmem:[#allocation4 + $0xa] ss:$5 sm:$0xff]  ;;  %v6414_v9 = vld [vmem:[#allocation4 + $0xb] ss:$5 sm:$0xff] }
 0x3d3   :  { %v2836_v16 = vmax.f32 %v2828_v2, 0.0  ;;  %v3319_v61 = vld [vmem:[#allocation4 + $0xc] ss:$5 sm:$0xff] }
 0x3d4   :  { %v2835_v32 = vmax.f32 %v2827_v48, 0.0  ;;  %v2866_v12 = vld [vmem:[#allocation4 + $0x7] ss:$5 sm:$0xff] }
 0x3d5   :  { %2859 = vst.msk [vmem:[#allocation4 + $0x88] sm:$0x3] %vm2839_vm11, %v2836_v16  ;;  %v6389_v57 = vld [vmem:[#allocation4 + $0x30] ss:$5 sm:$0xff]  ;;  %v6396_v37 = vld [vmem:[#allocation4 + $0x31] ss:$5 sm:$0xff] }
 0x3d6   :  { %2858 = vst.msk [vmem:[#allocation4 + $0x80] sm:$0xff] %vm1776_vm7, %v2835_v32  ;;  %2909 = vrot.lane.b32.xlu0 %v6387_v23, %s4815_s5  ;;  %2895 = vrot.lane.b32.xlu1 %v6389_v57, %s4814_s25  ;;  %v6408_v31 = vld [vmem:[#allocation4 + $0x32] ss:$5 sm:$0xff]  ;;  %v6420_v26 = vld [vmem:[#allocation4 + $0x33] ss:$5 sm:$0xff] }
 0x3d7   :  { %v3321_v46 = vld [vmem:[#allocation4 + $0x34] ss:$5 sm:$0xff] }
 0x3d8   :  { %v3464_v44 = vld [vmem:[#allocation4 + $0xd] ss:$5 sm:$0xff] }
 0x3d9   :  { %v6433_v8 = vld [vmem:[#allocation4 + $0x5b] ss:$5 sm:$0xff]  ;;  %v6455_v20 = vld [vmem:[#allocation4 + $0x5a] ss:$5 sm:$0xff] }
 0x3da   :  { %3036 = vrot.lane.b32.xlu0 %v6387_v23, %s4814_s25  ;;  %2911 = vrot.lane.b32.xlu1 %v6396_v37, %s4815_s5  ;;  %v6435_v55 = vld [vmem:[#allocation4 + $0x58] ss:$5 sm:$0xff]  ;;  %v6441_v60 = vld [vmem:[#allocation4 + $0x59] ss:$5 sm:$0xff] }
 0x3db   :  { %v3466_v11 = vld [vmem:[#allocation4 + $0x35] ss:$5 sm:$0xff]  ;;  %v2868_v39 = vld [vmem:[#allocation4 + $0x2f] ss:$5 sm:$0xff] }
 0x3dc   :  { %v3323_v43 = vld [vmem:[#allocation4 + $0x5c] ss:$5 sm:$0xff] }
 0x3dd   :  { %v6443_v27 = vld [vmem:[#allocation4 + $0x80] ss:$5 sm:$0xff]  ;;  %v6449_v1 = vld [vmem:[#allocation4 + $0x81] ss:$5 sm:$0xff] }
 0x3de   :  { %3052 = vrot.lane.b32.xlu0 %v6402_v42, %s4815_s5  ;;  %3038 = vrot.lane.b32.xlu1 %v6396_v37, %s4814_s25  ;;  %v6461_v10 = vld [vmem:[#allocation4 + $0x82] ss:$5 sm:$0xff]  ;;  %v6471_v17 = vld [vmem:[#allocation4 + $0x83] ss:$5 sm:$0xff] }
 0x3df   :  { %v3325_v5 = vld [vmem:[#allocation4 + $0x84] ss:$5 sm:$0xff]  ;;  %v3470_v47 = vld [vmem:[#allocation4 + $0x85] ss:$5 sm:$0xff]  ;;  %v2870_v6 = vld [vmem:[#allocation4 + $0x57] ss:$5 sm:$0xff] }
 0x3e0   :  { %v3468_v21 = vld [vmem:[#allocation4 + $0x5d] ss:$5 sm:$0xff] }
 0x3e2   :  { %3181 = vrot.lane.b32.xlu0 %v6402_v42, %s4814_s25  ;;  %3054 = vrot.lane.b32.xlu1 %v6408_v31, %s4815_s5 }
 0x3e6   :  { %3197 = vrot.lane.b32.xlu0 %v6414_v9, %s4815_s5  ;;  %3183 = vrot.lane.b32.xlu1 %v6408_v31, %s4814_s25 }
 0x3ea   :  { %3326 = vrot.lane.b32.xlu0 %v6414_v9, %s4814_s25  ;;  %3199 = vrot.lane.b32.xlu1 %v6420_v26, %s4815_s5 }
 0x3ee   :  { %3342 = vrot.lane.b32.xlu0 %v3319_v61, %s4815_s5  ;;  %3328 = vrot.lane.b32.xlu1 %v6420_v26, %s4814_s25 }
 0x3f2   :  { %3471 = vrot.lane.b32.xlu0 %v3319_v61, %s4814_s25  ;;  %3344 = vrot.lane.b32.xlu1 %v3321_v46, %s4815_s5 }
 0x3f6   :  { %3487 = vrot.lane.b32.xlu0 %v3464_v44, %s4815_s5  ;;  %3473 = vrot.lane.b32.xlu1 %v3321_v46, %s4814_s25 }
 0x3fa   :  { %3330 = vrot.lane.b32.xlu1 %v6433_v8, %s4814_s25  ;;  %2897 = vrot.lane.b32.xlu0 %v6435_v55, %s4814_s25 }
 0x3fe   :  { %2913 = vrot.lane.b32.xlu0 %v6441_v60, %s4815_s5  ;;  %2899 = vrot.lane.b32.xlu1 %v6443_v27, %s4814_s25 }
 0x402   :  { %3040 = vrot.lane.b32.xlu0 %v6441_v60, %s4814_s25  ;;  %2915 = vrot.lane.b32.xlu1 %v6449_v1, %s4815_s5 }
 0x406   :  { %3056 = vrot.lane.b32.xlu0 %v6455_v20, %s4815_s5  ;;  %3042 = vrot.lane.b32.xlu1 %v6449_v1, %s4814_s25 }
 0x40a   :  { %3185 = vrot.lane.b32.xlu0 %v6455_v20, %s4814_s25  ;;  %3058 = vrot.lane.b32.xlu1 %v6461_v10, %s4815_s5 }
 0x40e   :  { %3201 = vrot.lane.b32.xlu0 %v6433_v8, %s4815_s5  ;;  %3187 = vrot.lane.b32.xlu1 %v6461_v10, %s4814_s25 }
 0x412   :  { %3489 = vrot.lane.b32.xlu0 %v3466_v11, %s4815_s5  ;;  %3203 = vrot.lane.b32.xlu1 %v6471_v17, %s4815_s5 }
 0x416   :  { %3346 = vrot.lane.b32.xlu0 %v3323_v43, %s4815_s5  ;;  %3332 = vrot.lane.b32.xlu1 %v6471_v17, %s4814_s25 }
 0x41a   :  { %3475 = vrot.lane.b32.xlu0 %v3323_v43, %s4814_s25  ;;  %3348 = vrot.lane.b32.xlu1 %v3325_v5, %s4815_s5 }
 0x41e   :  { %3491 = vrot.lane.b32.xlu0 %v3468_v21, %s4815_s5  ;;  %3477 = vrot.lane.b32.xlu1 %v3325_v5, %s4814_s25 }
 0x422   :  { %3493 = vrot.lane.b32.xlu1 %v3470_v47, %s4815_s5 }
 0x444   :  { %v2894_v18 = vpop.permute.xlu0 %2893 }
 0x445   :  { %v2921_v58 = vsel %vm1776_vm7, %v2866_v12, %v2894_v18 }
 0x448   :  { %v2910_v45 = vpop.permute.xlu0 %2909  ;;  %v2896_v50 = vpop.permute.xlu1 %2895 }
 0x449   :  { %v2926_v51 = vsel %vm2925_vm12, %v2921_v58, %v2910_v45  ;;  %v2922_v53 = vsel %vm1776_vm7, %v2868_v39, %v2896_v50 }
 0x44a   :  { %4516 = vmatprep.mubr.msk.f32.mxu1 %vm2930_vm13, %v2926_v51 }
 0x44c   :  { %v3037_v14 = vpop.permute.xlu0 %3036  ;;  %v2912_v7 = vpop.permute.xlu1 %2911 }
 0x44d   :  { %v2927_v28 = vsel %vm2925_vm12, %v2922_v53, %v2912_v7  ;;  %v3064_v44 = vsel %vm1776_vm7, %v6381_v4, %v3037_v14 }
 0x44e   :  { %4517 = vmatmul.mubr.msk.f32.vlgmr.msra.gmra.mrb[42].mxu1 %vm2930_vm13, %v2927_v28 }
 0x44f   :  { %4629 = vmatpush3.bf16.msra.mxu1 %v6341_v52 }
 0x450   :  { %v3053_v49 = vpop.permute.xlu0 %3052  ;;  %v3039_v63 = vpop.permute.xlu1 %3038  ;;  %4631 = vmatprep.subr.bf16.mxu1 %v6356_v3 }
 0x451   :  { %v3068_v43 = vsel %vm2925_vm12, %v3064_v44, %v3053_v49  ;;  %v3065_v5 = vsel %vm1776_vm7, %v6389_v57, %v3039_v63 }
 0x453   :  { %4633 = vmatpush3.bf16.msra.mxu1 %v6356_v3 }
 0x454   :  { %v3182_v34 = vpop.permute.xlu0 %3181  ;;  %v3055_v29 = vpop.permute.xlu1 %3054  ;;  %4635 = vmatprep.subr.bf16.mxu1 %v6370_v30 }
 0x455   :  { %v3209_v38 = vsel %vm1776_vm7, %v6387_v23, %v3182_v34  ;;  %v2872_v23 = vld [vmem:[#allocation4 + $0x7f] ss:$5 sm:$0xff]  ;;  %v3069_v12 = vsel %vm2925_vm12, %v3065_v5, %v3055_v29 }
 0x456   :  { %v3648_v5 = vld [vmem:[%s6890_s7 + $0x70] sm:$0xff] }
 0x457   :  { %4637 = vmatpush3.bf16.msra.mxu1 %v6370_v30 }
 0x458   :  { %v3198_v24 = vpop.permute.xlu0 %3197  ;;  %v3184_v62 = vpop.permute.xlu1 %3183  ;;  %4651 = vmatprep.subr.bf16.mxu1 %v6341_v52 }
 0x459   :  { %v3213_v22 = vsel %vm2925_vm12, %v3209_v38, %v3198_v24  ;;  %v3210_v33 = vsel %vm1776_vm7, %v6396_v37, %v3184_v62 }
 0x45a   :  { %4552 = vmatprep.mubr.msk.f32.mxu0 %vm2930_vm13, %v3213_v22 }
 0x45c   :  { %v3327_v19 = vpop.permute.xlu0 %3326  ;;  %v3200_v41 = vpop.permute.xlu1 %3199 }
 0x45d   :  { %v3214_v35 = vsel %vm2925_vm12, %v3210_v33, %v3200_v41 }
 0x45e   :  { %4553 = vmatmul.mubr.msk.f32.vlgmr.msra.gmra.mrb[54].mxu0 %vm2930_vm13, %v3214_v35 }
 0x45f   :  { %4665 = vmatpush3.bf16.msra.mxu0 %v6341_v52 }
 0x460   :  { %v3343_v40 = vpop.permute.xlu0 %3342  ;;  %v3329_v15 = vpop.permute.xlu1 %3328  ;;  %4667 = vmatprep.subr.bf16.mxu0 %v6356_v3 }
 0x463   :  { %4669 = vmatpush3.bf16.msra.mxu0 %v6356_v3 }
 0x464   :  { %v3472_v0 = vpop.permute.xlu0 %3471  ;;  %v3345_v56 = vpop.permute.xlu1 %3344  ;;  %4671 = vmatprep.subr.bf16.mxu0 %v6370_v30 }
 0x467   :  { %4673 = vmatpush3.bf16.msra.mxu0 %v6370_v30 }
 0x468   :  { %v3488_v54 = vpop.permute.xlu0 %3487  ;;  %v3474_v36 = vpop.permute.xlu1 %3473 }
 0x46c   :  { %v3331_v13 = vpop.permute.xlu1 %3330  ;;  %v2898_v59 = vpop.permute.xlu0 %2897 }
 0x46d   :  { %v2923_v2 = vsel %vm1776_vm7, %v2870_v6, %v2898_v59  ;;  %v3638_v59 = vld [vmem:[%s6890_s7 + $0x20] sm:$0xff]  ;;  %v3640_v6 = vld [vmem:[%s6890_s7 + $0x30] sm:$0xff] }
 0x470   :  { %v2914_v48 = vpop.permute.xlu0 %2913  ;;  %v2900_v16 = vpop.permute.xlu1 %2899 }
 0x471   :  { %v2928_v32 = vsel %vm2925_vm12, %v2923_v2, %v2914_v48  ;;  %v2924_v37 = vsel %vm1776_vm7, %v2872_v23, %v2900_v16  ;;  %v3643_v2 = vld [vmem:[%s6890_s7 + $0x48] sm:$0xff]  ;;  %v3645_v48 = vld [vmem:[%s6890_s7 + $0x58] sm:$0xff]  ;;  %v4680_v16 = vpack.c.bf16 %v3640_v6, %v3638_v59  ;;  %v3642_v23 = vld [vmem:[%s6890_s7 + $0x40] sm:$0xff] }
 0x472   :  { %4519 = vmatprep.mubr.msk.f32.mxu1 %vm2930_vm13, %v2928_v32  ;;  %v4682_v32 = vpack.c.bf16 %v3645_v48, %v3643_v2  ;;  %v3741_v59 = vld [vmem:[%s6892_s9 + $0x10] sm:$0xff]  ;;  %v3744_v6 = vld [vmem:[%s6892_s9 + $0x28] sm:$0xff]  ;;  %v3746_v2 = vld [vmem:[%s6892_s9 + $0x38] sm:$0xff] }
 0x474   :  { %v3041_v61 = vpop.permute.xlu0 %3040  ;;  %v2916_v46 = vpop.permute.xlu1 %2915 }
 0x475   :  { %v2929_v11 = vsel %vm2925_vm12, %v2924_v37, %v2916_v46  ;;  %v3066_v21 = vsel %vm1776_vm7, %v6435_v55, %v3041_v61  ;;  %v3354_v55 = vsel %vm1776_vm7, %v6402_v42, %v3327_v19  ;;  %v3355_v42 = vsel %vm1776_vm7, %v6408_v31, %v3329_v15  ;;  %v3634_v15 = vld [vmem:[%s6890_s7] sm:$0xff]  ;;  %v3644_v37 = vld [vmem:[%s6890_s7 + $0x50] sm:$0xff]  ;;  %v3647_v61 = vld [vmem:[%s6890_s7 + $0x68] sm:$0xff] }
 0x476   :  { %4520 = vmatmul.mubr.msk.f32.gmra.mrb[44].mxu1 %vm2930_vm13, %v2929_v11  ;;  %v3358_v51 = vsel %vm2925_vm12, %v3354_v55, %v3343_v40  ;;  %v3359_v28 = vsel %vm2925_vm12, %v3355_v42, %v3345_v56  ;;  %v3356_v31 = vsel %vm1776_vm7, %v6455_v20, %v3331_v13  ;;  %v3635_v40 = vld [vmem:[%s6890_s7 + $0x8] sm:$0xff]  ;;  %v3649_v46 = vld [vmem:[%s6890_s7 + $0x78] sm:$0xff]  ;;  %v4684_v44 = vpack.c.bf16 %v3644_v37, %v3642_v23  ;;  %v3743_v23 = vld [vmem:[%s6892_s9 + $0x20] sm:$0xff] }
 0x477   :  { %4534 = vmatprep.mubr.msk.f32.mxu1 %vm2930_vm13, %v3068_v43  ;;  %v3639_v56 = vld [vmem:[%s6890_s7 + $0x28] sm:$0xff]  ;;  %v4686_v11 = vpack.c.bf16 %v3649_v46, %v3647_v61  ;;  %v3646_v43 = vld [vmem:[%s6890_s7 + $0x60] sm:$0xff]  ;;  %v3745_v37 = vld [vmem:[%s6892_s9 + $0x30] sm:$0xff] }
 0x478   :  { %v3057_v47 = vpop.permute.xlu0 %3056  ;;  %v3043_v18 = vpop.permute.xlu1 %3042  ;;  %v3748_v61 = vld [vmem:[%s6892_s9 + $0x48] sm:$0xff]  ;;  %v3750_v46 = vld [vmem:[%s6892_s9 + $0x58] sm:$0xff] }
 0x479   :  { %v3070_v4 = vsel %vm2925_vm12, %v3066_v21, %v3057_v47  ;;  %v3067_v58 = vsel %vm1776_vm7, %v6443_v27, %v3043_v18  ;;  %v4688_v21 = vpack.c.bf16 %v3648_v5, %v3646_v43  ;;  %v3747_v43 = vld [vmem:[%s6892_s9 + $0x40] sm:$0xff]  ;;  %v3749_v5 = vld [vmem:[%s6892_s9 + $0x50] sm:$0xff] }
 0x47a   :  { %4535 = vmatmul.mubr.msk.f32.vlgmr.msra.gmra.mrb[46].mxu1 %vm2930_vm13, %v3069_v12 }
 0x47b   :  { %4653 = vmatpush3.bf16.msra.mxu1 %v6341_v52  ;;  %4537 = vmatprep.mubr.msk.f32.mxu1 %vm2930_vm13, %v3070_v4 }
 0x47c   :  { %v3186_v45 = vpop.permute.xlu0 %3185  ;;  %v3059_v57 = vpop.permute.xlu1 %3058  ;;  %4655 = vmatprep.subr.bf16.mxu1 %v6356_v3 }
 0x47d   :  { %v3071_v50 = vsel %vm2925_vm12, %v3067_v58, %v3059_v57  ;;  %v3211_v52 = vsel %vm1776_vm7, %v6441_v60, %v3186_v45  ;;  %v3499_v60 = vsel %vm1776_vm7, %v6414_v9, %v3472_v0 }
 0x47e   :  { %4538 = vmatmul.mubr.msk.f32.gmra.mrb[48].mxu1 %vm2930_vm13, %v3071_v50  ;;  %v3503_v63 = vsel %vm2925_vm12, %v3499_v60, %v3488_v54  ;;  %v3641_v54 = vld [vmem:[%s6890_s7 + $0x38] sm:$0xff] }
 0x47f   :  { %4657 = vmatpush3.bf16.msra.mxu1 %v6356_v3  ;;  %4570 = vmatprep.mubr.msk.f32.mxu1 %vm2930_vm13, %v3358_v51  ;;  %v4678_v13 = vpack.c.bf16 %v3641_v54, %v3639_v56  ;;  %v3742_v56 = vld [vmem:[%s6892_s9 + $0x18] sm:$0xff]  ;;  %v3739_v54 = vld [vmem:[%s6892_s9] sm:$0xff] }
 0x480   :  { %v3202_v27 = vpop.permute.xlu0 %3201  ;;  %v3188_v39 = vpop.permute.xlu1 %3187  ;;  %4659 = vmatprep.subr.bf16.mxu1 %v6370_v30 }
 0x481   :  { %v3215_v53 = vsel %vm2925_vm12, %v3211_v52, %v3202_v27  ;;  %v3212_v3 = vsel %vm1776_vm7, %v6449_v1, %v3188_v39 }
 0x482   :  { %4555 = vmatprep.mubr.msk.f32.mxu0 %vm2930_vm13, %v3215_v53 }
 0x483   :  { %4661 = vmatpush3.bf16.msra.mxu1 %v6370_v30  ;;  %v3500_v30 = vsel %vm1776_vm7, %v6420_v26, %v3474_v36 }
 0x484   :  { %v3490_v14 = vpop.permute.xlu0 %3489  ;;  %v3204_v7 = vpop.permute.xlu1 %3203 }
 0x485   :  { %v3216_v49 = vsel %vm2925_vm12, %v3212_v3, %v3204_v7  ;;  %v3504_v34 = vsel %vm2925_vm12, %v3500_v30, %v3490_v14 }
 0x486   :  { %4571 = vmatmul.mubr.msk.f32.vlgmr.msra.gmra.mrb[50].mxu1 %vm2930_vm13, %v3359_v28  ;;  %4556 = vmatmul.mubr.msk.f32.gmra.mrb[56].mxu0 %vm2930_vm13, %v3216_v49 }
 0x487   :  { %4588 = vmatprep.mubr.msk.f32.mxu0 %vm2930_vm13, %v3503_v63 }
 0x488   :  { %v3347_v1 = vpop.permute.xlu0 %3346  ;;  %v3333_v9 = vpop.permute.xlu1 %3332 }
 0x489   :  { %v3360_v29 = vsel %vm2925_vm12, %v3356_v31, %v3347_v1  ;;  %v3357_v38 = vsel %vm1776_vm7, %v6461_v10, %v3333_v9  ;;  %v4158_v1 = vld [vmem:[%s6889_s6] ss:$0 sm:$0xff] }
 0x48a   :  { %4573 = vmatprep.mubr.msk.f32.mxu1 %vm2930_vm13, %v3360_v29  ;;  %4589 = vmatmul.mubr.msk.f32.vlgmr.msra.gmra.mrb[58].mxu0 %vm2930_vm13, %v3504_v34 }
 0x48c   :  { %v3476_v24 = vpop.permute.xlu0 %3475  ;;  %v3349_v62 = vpop.permute.xlu1 %3348 }
 0x48d   :  { %v3361_v26 = vsel %vm2925_vm12, %v3357_v38, %v3349_v62  ;;  %v3501_v20 = vsel %vm1776_vm7, %v6433_v8, %v3476_v24  ;;  %v3637_v8 = vld [vmem:[%s6890_s7 + $0x18] sm:$0xff] }
 0x48e   :  { %4574 = vmatmul.mubr.msk.f32.gmra.mrb[52].mxu1 %vm2930_vm13, %v3361_v26  ;;  %v4674_v0 = vpack.c.bf16 %v3637_v8, %v3635_v40 }
 0x48f   :  { %3730 = vmatprep.mubr.f32.mxu1 %v6974_v25 }
 0x490   :  { %v3492_v22 = vpop.permute.xlu0 %3491  ;;  %v3478_v33 = vpop.permute.xlu1 %3477  ;;  %4675 = vmatprep.subr.bf16.mxu1 %v4674_v0 }
 0x491   :  { %v3505_v19 = vsel %vm2925_vm12, %v3501_v20, %v3492_v22  ;;  %v3502_v10 = vsel %vm1776_vm7, %v6471_v17, %v3478_v33  ;;  %v3636_v17 = vld [vmem:[%s6890_s7 + $0x10] sm:$0xff] }
 0x492   :  { %4591 = vmatprep.mubr.msk.f32.mxu0 %vm2930_vm13, %v3505_v19  ;;  %v4676_v36 = vpack.c.bf16 %v3636_v17, %v3634_v15  ;;  %v3740_v17 = vld [vmem:[%s6892_s9 + $0x8] sm:$0xff] }
 0x494   :  { %v3494_v41 = vpop.permute.xlu1 %3493  ;;  %4677 = vmatpush1.bf16.msra.mxu1 %v4676_v36 }
 0x495   :  { %v3506_v35 = vsel %vm2925_vm12, %v3502_v10, %v3494_v41  ;;  %4679 = vmatprep.subr.bf16.mxu1 %v4678_v13  ;;  %v4690_v13 = vpack.c.bf16 %v3742_v56, %v3740_v17  ;;  %v3782_v17 = vld [vmem:[%s6892_s9 + $0x158] sm:$0xff] }
 0x496   :  { %4592 = vmatmul.mubr.msk.f32.gmra.mrb[60].mxu0 %vm2930_vm13, %v3506_v35 }
 0x497   :  { %4691 = vmatprep.subr.bf16.mxu0 %v4690_v13  ;;  %v3781_v13 = vld [vmem:[%s6892_s9 + $0x150] sm:$0xff] }
 0x498   :  { %4681 = vmatpush1.bf16.msra.mxu1 %v4680_v16  ;;  %v4692_v16 = vpack.c.bf16 %v3741_v59, %v3739_v54 }
 0x499   :  { %4683 = vmatprep.subr.bf16.mxu1 %v4682_v32  ;;  %v4694_v32 = vpack.c.bf16 %v3746_v2, %v3744_v6 }
 0x49a   :  { %4693 = vmatpush1.bf16.msra.mxu0 %v4692_v16  ;;  %v3784_v16 = vld [vmem:[%s6892_s9 + $0x168] sm:$0xff] }
 0x49b   :  { %4695 = vmatprep.subr.bf16.mxu0 %v4694_v32  ;;  %v3786_v32 = vld [vmem:[%s6892_s9 + $0x178] sm:$0xff] }
 0x49c   :  { %4685 = vmatpush1.bf16.msra.mxu1 %v4684_v44  ;;  %v4696_v44 = vpack.c.bf16 %v3745_v37, %v3743_v23  ;;  %v4734_v23 = vpack.c.bf16 %v3786_v32, %v3784_v16  ;;  %v3783_v37 = vld [vmem:[%s6892_s9 + $0x160] sm:$0xff] }
 0x49d   :  { %4687 = vmatprep.subr.bf16.mxu1 %v4686_v11  ;;  %v4698_v11 = vpack.c.bf16 %v3750_v46, %v3748_v61  ;;  %v3785_v61 = vld [vmem:[%s6892_s9 + $0x170] sm:$0xff] }
 0x49e   :  { %4697 = vmatpush1.bf16.msra.mxu0 %v4696_v44  ;;  %v4736_v46 = vpack.c.bf16 %v3785_v61, %v3783_v37  ;;  %v3788_v44 = vld [vmem:[%s6892_s9 + $0x188] sm:$0xff] }
 0x49f   :  { %4699 = vmatprep.subr.bf16.mxu0 %v4698_v11  ;;  %v3787_v11 = vld [vmem:[%s6892_s9 + $0x180] sm:$0xff] }
 0x4a0   :  { %4689 = vmatpush1.bf16.msra.mxu1 %v4688_v21  ;;  %v3752_v21 = vld [vmem:[%s6892_s9 + $0x68] sm:$0xff] }
 0x521   :  { %v4518_v47 = vpop.f32.mrb[42].mxu1 }
 0x522   :  { %v3009_v18 = vpop.f32.mrb[43].mxu1 }
 0x531   :  { %v4554_v12 = vpop.f32.mrb[54].mxu0 }
 0x532   :  { %v3295_v4 = vpop.f32.mrb[55].mxu0 }
 0x549   :  { %v4521_v58 = vpop.f32.mrb[44].mxu1 }
 0x54a   :  { %v3019_v45 = vpop.f32.mrb[45].mxu1 }
 0x54d   :  { %v4536_v57 = vpop.f32.mrb[46].mxu1 }
 0x54e   :  { %v3170_v55 = vmax.f32 %v4518_v47, %v4536_v57  ;;  %v3150_v50 = vpop.f32.mrb[47].mxu1  ;;  %v3754_v47 = vld [vmem:[%s6892_s9 + $0x78] sm:$0xff] }
 0x54f   :  { %v3169_v51 = vmax.f32 %v3009_v18, %v3150_v50  ;;  %v4700_v18 = vpack.c.bf16 %v3749_v5, %v3747_v43  ;;  %v3758_v57 = vld [vmem:[%s6892_s9 + $0x98] sm:$0xff]  ;;  %v3878_v43 = vld [vmem:[%s6894_s11] sm:$0xff]  ;;  %v3879_v5 = vld [vmem:[%s6894_s11 + $0x8] sm:$0xff] }
 0x550   :  { %v3315_v52 = vmax.f32 %v3170_v55, %v4554_v12  ;;  %v4702_v12 = vpack.c.bf16 %v3754_v47, %v3752_v21  ;;  %v3880_v21 = vld [vmem:[%s6894_s11 + $0x10] sm:$0xff]  ;;  %v4816_v47 = vmov 0.0|0.0  }
 0x551   :  { %v4539_v27 = vpop.f32.mrb[48].mxu1  ;;  %v3314_v39 = vmax.f32 %v3169_v51, %v3295_v4  ;;  %v3751_v4 = vld [vmem:[%s6892_s9 + $0x60] sm:$0xff]  ;;  %4701 = vmatpush1.bf16.msra.mxu0 %v4700_v18  ;;  %4738 = vmatprep.subr.bf16.mxu1 %v4816_v47  ;;  %v4739_v18 = vpack.c.bf16 %v3879_v5, %v3878_v43 }
 0x552   :  { %v3172_v53 = vmax.f32 %v4521_v58, %v4539_v27  ;;  %v3160_v42 = vpop.f32.mrb[49].mxu1  ;;  %v3753_v58 = vld [vmem:[%s6892_s9 + $0x70] sm:$0xff]  ;;  %4703 = vmatprep.subr.bf16.mxu0 %v4702_v12  ;;  %v3881_v12 = vld [vmem:[%s6894_s11 + $0x18] sm:$0xff] }
 0x553   :  { %v3171_v3 = vmax.f32 %v3019_v45, %v3160_v42  ;;  %v3756_v45 = vld [vmem:[%s6892_s9 + $0x88] sm:$0xff]  ;;  %v4704_v50 = vpack.c.bf16 %v3753_v58, %v3751_v4  ;;  %v3757_v27 = vld [vmem:[%s6892_s9 + $0x90] sm:$0xff]  ;;  %v4742_v4 = vpack.c.bf16 %v3881_v12, %v3880_v21  ;;  %v3882_v58 = vld [vmem:[%s6894_s11 + $0x20] sm:$0xff] }
 0x554   :  { %v4706_v51 = vpack.c.bf16 %v3758_v57, %v3756_v45  ;;  %v3883_v45 = vld [vmem:[%s6894_s11 + $0x28] sm:$0xff] }
 0x555   :  { %4705 = vmatpush1.bf16.msra.mxu0 %v4704_v50  ;;  %v4745_v57 = vpack.c.bf16 %v3883_v45, %v3882_v58  ;;  %v3885_v50 = vld [vmem:[%s6894_s11 + $0x38] sm:$0xff] }
 0x556   :  { %4707 = vmatprep.subr.bf16.mxu0 %v4706_v51 }
 0x559   :  { %v4572_v14 = vpop.f32.mrb[50].mxu1  ;;  %v4557_v7 = vpop.f32.mrb[56].mxu0 }
 0x55a   :  { %v3460_v60 = vmax.f32 %v3315_v52, %v4572_v14  ;;  %v3317_v28 = vmax.f32 %v3172_v53, %v4557_v7  ;;  %v3440_v49 = vpop.f32.mrb[51].mxu1  ;;  %v3305_v63 = vpop.f32.mrb[57].mxu0  ;;  %v3755_v52 = vld [vmem:[%s6892_s9 + $0x80] sm:$0xff]  ;;  %v3762_v53 = vld [vmem:[%s6892_s9 + $0xb8] sm:$0xff]  ;;  %v3761_v7 = vld [vmem:[%s6892_s9 + $0xb0] sm:$0xff] }
 0x55b   :  { %v3459_v30 = vmax.f32 %v3314_v39, %v3440_v49  ;;  %v3316_v31 = vmax.f32 %v3171_v3, %v3305_v63  ;;  %v3760_v39 = vld [vmem:[%s6892_s9 + $0xa8] sm:$0xff]  ;;  %v4708_v42 = vpack.c.bf16 %v3757_v27, %v3755_v52  ;;  %v3759_v14 = vld [vmem:[%s6892_s9 + $0xa0] sm:$0xff] }
 0x55c   :  { %v4710_v3 = vpack.c.bf16 %v3762_v53, %v3760_v39  ;;  %v4712_v49 = vpack.c.bf16 %v3761_v7, %v3759_v14  ;;  %v3886_v52 = vld [vmem:[%s6894_s11 + $0x40] sm:$0xff]  ;;  %v3887_v27 = vld [vmem:[%s6894_s11 + $0x48] sm:$0xff]  ;;  %v3888_v53 = vld [vmem:[%s6894_s11 + $0x50] sm:$0xff] }
 0x55d   :  { %v4590_v9 = vpop.f32.mrb[58].mxu0  ;;  %4709 = vmatpush1.bf16.msra.mxu0 %v4708_v42  ;;  %v4751_v39 = vpack.c.bf16 %v3887_v27, %v3886_v52  ;;  %v3889_v42 = vld [vmem:[%s6894_s11 + $0x58] sm:$0xff]  ;;  %v3890_v14 = vld [vmem:[%s6894_s11 + $0x60] sm:$0xff]  ;;  %v3891_v7 = vld [vmem:[%s6894_s11 + $0x68] sm:$0xff] }
 0x55e   :  { %v3605_v34 = vmax.f32 %v3460_v60, %v4590_v9  ;;  %v3585_v29 = vpop.f32.mrb[59].mxu0  ;;  %v3764_v60 = vld [vmem:[%s6892_s9 + $0xc8] sm:$0xff]  ;;  %4711 = vmatprep.subr.bf16.mxu0 %v4710_v3  ;;  %v3770_v9 = vld [vmem:[%s6892_s9 + $0xf8] sm:$0xff]  ;;  %v4754_v3 = vpack.c.bf16 %v3889_v42, %v3888_v53 }
 0x55f   :  { %v3604_v38 = vmax.f32 %v3459_v30, %v3585_v29  ;;  %v3763_v30 = vld [vmem:[%s6892_s9 + $0xc0] sm:$0xff] }
 0x560   :  { %v3615_v24 = vadd.f32 %v4158_v1, %v3605_v34 }
 0x561   :  { %v3614_v62 = vadd.f32 %v4158_v1, %v3604_v38  ;;  %v4575_v26 = vpop.f32.mrb[52].mxu1  ;;  %4713 = vmatpush1.bf16.msra.mxu0 %v4712_v49  ;;  %v3767_v38 = vld [vmem:[%s6892_s9 + $0xe0] sm:$0xff]  ;;  %v3893_v49 = vld [vmem:[%s6894_s11 + $0x78] sm:$0xff] }
 0x562   :  { %v3619_v20 = vmax.f32 %v3615_v24, 0.0  ;;  %v3462_v22 = vmax.f32 %v3317_v28, %v4575_v26  ;;  %v3450_v33 = vpop.f32.mrb[53].mxu1  ;;  %v3766_v28 = vld [vmem:[%s6892_s9 + $0xd8] sm:$0xff]  ;;  %v3769_v24 = vld [vmem:[%s6892_s9 + $0xf0] sm:$0xff] }
 0x563   :  { %v3618_v19 = vmax.f32 %v3614_v62, 0.0  ;;  %v3461_v10 = vmax.f32 %v3316_v31, %v3450_v33  ;;  %v4714_v63 = vpack.c.bf16 %v3766_v28, %v3764_v60  ;;  %v3765_v31 = vld [vmem:[%s6892_s9 + $0xd0] sm:$0xff]  ;;  %v3772_v62 = vld [vmem:[%s6892_s9 + $0x108] sm:$0xff]  ;;  %v3774_v26 = vld [vmem:[%s6892_s9 + $0x118] sm:$0xff]  ;;  %v4757_v60 = vpack.c.bf16 %v3891_v7, %v3890_v14 }
 0x564   :  { %3623 = vst.msk [vmem:[#allocation5 + $0x8] sm:$0xff] %vm2925_vm12, %v3619_v20  ;;  %v4716_v34 = vpack.c.bf16 %v3765_v31, %v3763_v30  ;;  %v4720_v20 = vpack.c.bf16 %v3769_v24, %v3767_v38  ;;  %v3771_v33 = vld [vmem:[%s6892_s9 + $0x100] sm:$0xff]  ;;  %v3892_v28 = vld [vmem:[%s6894_s11 + $0x70] sm:$0xff]  ;;  %v3895_v31 = vld [vmem:[%s6894_s11 + $0x88] sm:$0xff] }
 0x565   :  { %3622 = vst.msk [vmem:[#allocation5] sm:$0xff] %vm2925_vm12, %v3618_v19  ;;  %4715 = vmatprep.subr.bf16.mxu0 %v4714_v63  ;;  %v3773_v19 = vld [vmem:[%s6892_s9 + $0x110] sm:$0xff]  ;;  %v4760_v63 = vpack.c.bf16 %v3893_v49, %v3892_v28  ;;  %v3894_v30 = vld [vmem:[%s6894_s11 + $0x80] sm:$0xff]  ;;  %v3899_v24 = vld [vmem:[%s6894_s11 + $0xa8] sm:$0xff] }
 0x566   :  { %4717 = vmatpush1.bf16.msra.mxu0 %v4716_v34  ;;  %v3897_v34 = vld [vmem:[%s6894_s11 + $0x98] sm:$0xff]  ;;  %v3898_v38 = vld [vmem:[%s6894_s11 + $0xa0] sm:$0xff] }
 0x569   :  { %v4593_v41 = vpop.f32.mrb[60].mxu0 }
 0x56a   :  { %v3607_v35 = vmax.f32 %v3462_v22, %v4593_v41  ;;  %v3595_v40 = vpop.f32.mrb[61].mxu0  ;;  %v4722_v22 = vpack.c.bf16 %v3774_v26, %v3772_v62  ;;  %v3778_v41 = vld [vmem:[%s6892_s9 + $0x138] sm:$0xff]  ;;  %v4769_v62 = vpack.c.bf16 %v3899_v24, %v3898_v38  ;;  %v3652_v26 = vlaneseq }
 0x56b   :  { %v3606_v8 = vmax.f32 %v3461_v10, %v3595_v40  ;;  %v3776_v10 = vld [vmem:[%s6892_s9 + $0x128] sm:$0xff] }
 0x56c   :  { %v3617_v15 = vadd.f32 %v4158_v1, %v3607_v35  ;;  %v4724_v35 = vpack.c.bf16 %v3773_v19, %v3771_v33  ;;  %v4726_v40 = vpack.c.bf16 %v3778_v41, %v3776_v10  ;;  %v3650_v33 = vld [vmem:[%s6891_s8] sm:$0x3] }
 0x56d   :  { %v3616_v0 = vadd.f32 %v4158_v1, %v3606_v8  ;;  %v3768_v1 = vld [vmem:[%s6892_s9 + $0xe8] sm:$0xff]  ;;  %v3775_v8 = vld [vmem:[%s6892_s9 + $0x120] sm:$0xff] }
 0x56e   :  { %v3621_v36 = vmax.f32 %v3617_v15, 0.0  ;;  %v4718_v29 = vpack.c.bf16 %v3770_v9, %v3768_v1  ;;  %v3777_v15 = vld [vmem:[%s6892_s9 + $0x130] sm:$0xff]  ;;  %v4763_v1 = vpack.c.bf16 %v3895_v31, %v3894_v30 }
 0x56f   :  { %v3620_v48 = vmax.f32 %v3616_v0, 0.0  ;;  %v3780_v0 = vld [vmem:[%s6892_s9 + $0x148] sm:$0xff]  ;;  %v4728_v56 = vpack.c.bf16 %v3777_v15, %v3775_v8  ;;  %v3896_v9 = vld [vmem:[%s6894_s11 + $0x90] sm:$0xff] }
 0x570   :  { %3625 = vst.msk [vmem:[#allocation5 + $0x18] sm:$0xff] %vm2925_vm12, %v3621_v36  ;;  %4719 = vmatprep.subr.bf16.mxu0 %v4718_v29  ;;  %v4730_v54 = vpack.c.bf16 %v3782_v17, %v3780_v0  ;;  %v3779_v36 = vld [vmem:[%s6892_s9 + $0x140] sm:$0xff]  ;;  %v4766_v29 = vpack.c.bf16 %v3897_v34, %v3896_v9 }
 0x571   :  { %3624 = vst.msk [vmem:[#allocation5 + $0x10] sm:$0xff] %vm2925_vm12, %v3620_v48  ;;  %4721 = vmatpush1.bf16.msra.mxu0 %v4720_v20  ;;  %v4732_v59 = vpack.c.bf16 %v3781_v13, %v3779_v36  ;;  %v3653_v20 = vshrl.u32 %v3652_v26, 7  ;;  %v3902_v13 = vld [vmem:[%s6894_s11 + $0xc0] sm:$0xff] }
 0x572   :  { %4723 = vmatprep.subr.bf16.mxu0 %v4722_v22 }
 0x573   :  { %v3654_v22 = vsub.s32 0, %v3653_v20  ;;  %v3658_v19 = vsub.s32 1, %v3653_v20 }
 0x575   :  { %4725 = vmatpush1.bf16.msra.mxu0 %v4724_v35  ;;  %v3655_v10 = vrot.slane %v3650_v33, %v3654_v22  ;;  %v3659_v41 = vrot.slane %v3650_v33, %v3658_v19 }
 0x576   :  { %4727 = vmatprep.subr.bf16.mxu0 %v4726_v40 }
 0x578   :  { %v3628_v55 = vld [vmem:[#allocation5 + $0x1] ss:$8 sm:$0xf]  ;;  %v3626_v2 = vld [vmem:[#allocation5] ss:$8 sm:$0xf] }
 0x579   :  { %3630 = vrot.lane.b32.xlu0 %v3628_v55, %s4815_s5  ;;  %4729 = vmatpush1.bf16.msra.mxu0 %v4728_v56  ;;  %v3884_v55 = vld [vmem:[%s6894_s11 + $0x30] sm:$0xff] }
 0x57a   :  { %4731 = vmatprep.subr.bf16.mxu0 %v4730_v54  ;;  %v4748_v51 = vpack.c.bf16 %v3885_v50, %v3884_v55  ;;  %v3900_v56 = vld [vmem:[%s6894_s11 + $0xb0] sm:$0xff]  ;;  %v3901_v54 = vld [vmem:[%s6894_s11 + $0xb8] sm:$0xff]  ;;  %s4817_s11 = smov [#allocation6]  }
 0x57b   :  { %v4772_v36 = vpack.c.bf16 %v3901_v54, %v3900_v56  ;;  %s3991_s30 = sshll.u32 %s4817_s11, 4  ;;  %s3992_s30 = int_to_ptr.vmem [resolvable:$true] %s3991_s30 }
 0x57c   :  { %p4791_p1 = scmp.lt.s32.totalorder %s3992_s30, %s3992_s30 }
 0x57d   :  { %4733 = vmatpush1.bf16.msra.mxu0 %v4732_v59  ;;  %v3789_v59 = vld [vmem:[%s6893_s10] sm:$0x3]  ;;  %s4786_s10 = scalar_lea.vmem %s3992_s30, 64 }
 0x57e   :  { %4735 = vmatprep.subr.bf16.mxu0 %v4734_v23  ;;  %p4787_p0 = scmp.ne.s32.totalorder %s3992_s30, %s4786_s10  ;;  %p4792_p2 = scmp.lt.s32.totalorder %s4786_s10, %s4786_s10 }
 0x580   :  { %p4793_p3 = por %p4792_p2, %p4791_p1 }
 0x581   :  { %4737 = vmatpush1.bf16.msra.mxu0 %v4736_v46 }
 0x582   :  { %3853 = vmatprep.subr.mxu0 %v3788_v44  ;;  %p4794_p4 = pnand %p4793_p3, %p4787_p0 }
 0x585   :  { %3854 = vmatpush1.msra.mxu0 %v3787_v11 }
 0x5eb   :  { %v3631_v6 = vpop.permute.xlu0 %3630 }
 0x5ec   :  { %v3633_v48 = vsel %vm2925_vm12, %v3626_v2, %v3631_v6  ;;  %v3794_v6 = vrot.slane %v3789_v59, %v3654_v22  ;;  %v3798_v2 = vrot.slane %v3789_v59, %v3658_v19 }
 0x5ed   :  { %4159 = vmatmul.mubr.msk.f32.vlgmr.msra.gmra.mrb[54].mxu1 %vm3662_vm14, %v3633_v48 }
 0x5ee   :  { %4740 = vmatpush1.bf16.msra.mxu1 %v4739_v18 }
 0x5ef   :  { %4741 = vmatprep.subr.bf16.mxu1 %v4816_v47 }
 0x5f2   :  { %4743 = vmatpush1.bf16.msra.mxu1 %v4742_v4 }
 0x5f3   :  { %4744 = vmatprep.subr.bf16.mxu1 %v4816_v47 }
 0x5f6   :  { %4746 = vmatpush1.bf16.msra.mxu1 %v4745_v57 }
 0x5f7   :  { %4747 = vmatprep.subr.bf16.mxu1 %v4816_v47 }
 0x5fa   :  { %4749 = vmatpush1.bf16.msra.mxu1 %v4748_v51 }
 0x5fb   :  { %4750 = vmatprep.subr.bf16.mxu1 %v4816_v47 }
 0x5fe   :  { %4752 = vmatpush1.bf16.msra.mxu1 %v4751_v39 }
 0x5ff   :  { %4753 = vmatprep.subr.bf16.mxu1 %v4816_v47 }
 0x602   :  { %4755 = vmatpush1.bf16.msra.mxu1 %v4754_v3 }
 0x603   :  { %4756 = vmatprep.subr.bf16.mxu1 %v4816_v47 }
 0x606   :  { %4758 = vmatpush1.bf16.msra.mxu1 %v4757_v60 }
 0x607   :  { %4759 = vmatprep.subr.bf16.mxu1 %v4816_v47 }
 0x60a   :  { %4761 = vmatpush1.bf16.msra.mxu1 %v4760_v63 }
 0x60b   :  { %4762 = vmatprep.subr.bf16.mxu1 %v4816_v47 }
 0x60e   :  { %4764 = vmatpush1.bf16.msra.mxu1 %v4763_v1 }
 0x60f   :  { %4765 = vmatprep.subr.bf16.mxu1 %v4816_v47 }
 0x612   :  { %4767 = vmatpush1.bf16.msra.mxu1 %v4766_v29 }
 0x613   :  { %4768 = vmatprep.subr.bf16.mxu1 %v4816_v47 }
 0x616   :  { %4770 = vmatpush1.bf16.msra.mxu1 %v4769_v62 }
 0x617   :  { %4771 = vmatprep.subr.bf16.mxu1 %v4816_v47 }
 0x61a   :  { %4773 = vmatpush1.bf16.msra.mxu1 %v4772_v36 }
 0x61b   :  { %3961 = vmatprep.subr.mxu1 %v6974_v25  ;;  %v4161_v25 = vld [vmem:[%s6895_s12] ss:$0 sm:$0xff] }
 0x61e   :  { %3962 = vmatpush1.msra.mxu1 %v3902_v13 }
 0x6c0   :  { %v3732_v35 = vpop.f32.mrb[54].mxu1 }
 0x6c1   :  { %v3733_v40 = vadd.f32 %v3732_v35, %v3655_v10  ;;  %v3734_v8 = vpop.f32.mrb[55].mxu1 }
 0x6c2   :  { %v3735_v15 = vadd.f32 %v3734_v8, %v3659_v41 }
 0x6c3   :  { %v3737_v17 = vmax.f32 %v3733_v40, 0.0 }
 0x6c4   :  { %v3738_v0 = vmax.f32 %v3735_v15, 0.0 }
 0x6c6   :  { %4160 = vmatprep.mubr.msk.f32.mxu0 %vm3801_vm15, %v3738_v0 }
 0x6c7   :  { %3870 = vmatmul.mubr.f32.vlgmr.msra.gmra.mrb[62].mxu0 %v3737_v17 }
 0x79a   :  { %v3871_v48 = vpop.f32.mrb[62].mxu0 }
 0x79b   :  { %v3872_v16 = vadd.f32 %v3871_v48, %v3794_v6  ;;  %v3873_v32 = vpop.f32.mrb[63].mxu0 }
 0x79c   :  { %v3874_v23 = vadd.f32 %v3873_v32, %v3798_v2 }
 0x79d   :  { %v3876_v61 = vmax.f32 %v3872_v16, 0.0 }
 0x79e   :  { %v3877_v37 = vmax.f32 %v3874_v23, 0.0 }
 0x7a0   :  { %4162 = vmatprep.mubr.msk.f32.mxu1 %vm3801_vm15, %v3877_v37 }
 0x7a1   :  { %3978 = vmatmul.mubr.f32.vlgmr.msra.gmra.mrb[56].mxu1 %v3876_v61 }
 0x874   :  { %v3979_v46 = vpop.f32.mrb[56].mxu1 }
 0x875   :  { %v3980_v44 = vadd.f32 %v4161_v25, %v3979_v46  ;;  %v3981_v11 = vpop.f32.mrb[57].mxu1 }
 0x877   :  { %3984 = vst.msk [vmem:[#allocation6] sm:$0xf] %vm3983_vm0, %v3980_v44 }
 0x878   :  { %4797 = shalt.err (!%p4794_p4)
}
 0x879   :  { %s4798_s16 = scalar_lea.hbm %s6896_s13, 64 }
 0x87a   :  { %p4799_p5 = scmp.ne.s32.totalorder %s6896_s13, %s4798_s16  ;;  %p4802_p6 = scmp.lt.u32.totalorder %s4798_s16, %s6896_s13 }
 0x87c   :  { %p4804_p7 = pnand %p4802_p6, %p4799_p5 }
 0x87e   :  { %4807 = shalt.err (!%p4804_p7)
}
 0x87f   :  { %3994 = dma.vmem_to_hbm [thread:$0]  %s3992_s30, 64, %s6896_s13, [#allocation7]  }
 0x880   :  { %4808 = dma.done.wait [#allocation7], 64  }
 0x881   :  { %4809 = vsyncadd [#allocation7], 4294967232 }
 0x882   :  { %3998 = vsyncpa [#allocation7], 1 }

</bundles_post_ra>
